<compile_context>
chip_gen: v6e
topology: v6e:2x2x1
jax: 0.10.0
libtpu: 0.0.40
codegen_flags: <defaults>
</compile_context>

<pallas_src>
import jax
import jax.numpy as jnp
from jax.experimental import pallas as pl
from jax.experimental.pallas import tpu as pltpu

D_IN = 128      # fc1 in
D_H1 = 1024     # fc1 out / fc2 in
D_H2 = 4096     # fc2 out / fc3 in
D_OUT = 784     # fc3 out (28*28)
N3_PAD = 1024   # fc3 out padded to a lane-aligned multiple of 128
CK = 1024       # streamed chunk of the shared 4096 axis (fc2-out == fc3-in)
KC = D_H2 // CK # 4 grid steps


def _generator_kernel(z_ref, w1_ref, b1_ref,
                      w2q_ref, s2_ref, b2_ref,
                      w3q_ref, s3_ref, b3_ref,
                      o_ref, x1_ref, acc_ref):
    k = pl.program_id(0)

    @pl.when(k == 0)
    def _():
        # fc1 + ReLU, computed once; result stays resident in VMEM scratch.
        h = jnp.dot(z_ref[...].astype(jnp.bfloat16), w1_ref[...],
                    preferred_element_type=jnp.float32)
        x1_ref[...] = jnp.maximum(h + b1_ref[...], 0.0).astype(x1_ref.dtype)
        acc_ref[...] = jnp.zeros_like(acc_ref)

    # fc2, output-column chunk k: int8 -> bf16 dequant on the VPU (idle slots);
    # per-column scale + bias + ReLU in a small f32 epilogue.
    w2c = w2q_ref[...].astype(jnp.bfloat16)                # (D_H1, CK)
    t = jnp.dot(x1_ref[...], w2c, preferred_element_type=jnp.float32)
    x2c = jnp.maximum(t * s2_ref[...] + b2_ref[...], 0.0)  # (B, CK) f32

    # fc3 partial product over the matching K-chunk; accumulate in f32 scratch.
    w3c = w3q_ref[...].astype(jnp.bfloat16)                # (CK, N3_PAD)
    acc_ref[...] += jnp.dot(x2c.astype(jnp.bfloat16), w3c,
                            preferred_element_type=jnp.float32)

    @pl.when(k == pl.num_programs(0) - 1)
    def _():
        y = acc_ref[...] * s3_ref[...] + b3_ref[...]
        o_ref[...] = jnp.tanh(y)


@jax.jit
def generator_forward(params, z):
    B = z.shape[0]
    out = pl.pallas_call(
        _generator_kernel,
        out_shape=jax.ShapeDtypeStruct((B, N3_PAD), jnp.float32),
        grid_spec=pltpu.PrefetchScalarGridSpec(
            num_scalar_prefetch=0,
            grid=(KC,),
            in_specs=[
                pl.BlockSpec((B, D_IN), lambda k: (0, 0)),          # z (resident)
                pl.BlockSpec((D_IN, D_H1), lambda k: (0, 0)),       # w1 bf16 (resident)
                pl.BlockSpec((1, D_H1), lambda k: (0, 0)),          # b1
                pl.BlockSpec((None, D_H1, CK), lambda k: (k, 0, 0)),  # w2 int8 block (contiguous)
                pl.BlockSpec((1, CK), lambda k: (0, k)),            # s2 chunk
                pl.BlockSpec((1, CK), lambda k: (0, k)),            # b2 chunk
                pl.BlockSpec((CK, N3_PAD), lambda k: (k, 0)),       # w3 int8 row chunk
                pl.BlockSpec((1, N3_PAD), lambda k: (0, 0)),        # s3 (resident)
                pl.BlockSpec((1, N3_PAD), lambda k: (0, 0)),        # b3 (resident)
            ],
            out_specs=pl.BlockSpec((B, N3_PAD), lambda k: (0, 0)),
            scratch_shapes=[
                pltpu.VMEM((B, D_H1), jnp.float32),    # x1 = relu(fc1)
                pltpu.VMEM((B, N3_PAD), jnp.float32),  # fc3 accumulator
            ],
        ),
        compiler_params=pltpu.CompilerParams(
            dimension_semantics=("arbitrary",),
            vmem_limit_bytes=32 * 1024 * 1024,
        ),
    )(z.astype(jnp.float32),
      params["w1"], params["b1"],
      params["w2q"], params["s2"], params["b2"],
      params["w3q"], params["s3"], params["b3"])
    # drop padded columns (tanh(0)=0 there) and reshape to NCHW
    return out[:, :D_OUT].reshape(-1, 1, 28, 28)


def _quantize_per_column(w):
    """Symmetric int8 quantization with one f32 scale per output column."""
    scale = jnp.max(jnp.abs(w), axis=0, keepdims=True) / 127.0
    scale = jnp.maximum(scale, 1e-8)
    q = jnp.clip(jnp.round(w / scale), -127, 127).astype(jnp.int8)
    return q, scale.astype(jnp.float32)


def init_generator_params(key):
    """Deterministic synthetic params matching the nn.Linear shapes.

    Returns (kernel_params, raw_f32_params).  Kernel storage formats:
      w1: bf16 (128,1024);  b1,b2,b3,s2,s3: f32 row vectors
      w2: int8 pre-blocked (KC, 1024, CK) + per-column scale s2
      w3: int8 (4096, N3_PAD) zero-padded + per-column scale s3
    """
    dims = [(D_IN, D_H1), (D_H1, D_H2), (D_H2, D_OUT)]
    raw = {}
    for idx, (fan_in, fan_out) in enumerate(dims, start=1):
        key, kw, kb = jax.random.split(key, 3)
        bound = 1.0 / (fan_in ** 0.5)
        raw[f"w{idx}"] = jax.random.uniform(kw, (fan_in, fan_out), jnp.float32,
                                            -bound, bound)
        raw[f"b{idx}"] = jax.random.uniform(kb, (fan_out,), jnp.float32,
                                            -bound, bound)

    params = {}
    params["w1"] = raw["w1"].astype(jnp.bfloat16)
    params["b1"] = raw["b1"].reshape(1, D_H1).astype(jnp.float32)

    w2q, s2 = _quantize_per_column(raw["w2"])
    # pre-block so each streamed (1024, CK) block is one contiguous DMA
    params["w2q"] = w2q.reshape(D_H1, KC, CK).transpose(1, 0, 2)
    params["s2"] = s2
    params["b2"] = raw["b2"].reshape(1, D_H2).astype(jnp.float32)

    w3q, s3 = _quantize_per_column(raw["w3"])
    pad = N3_PAD - D_OUT
    params["w3q"] = jnp.pad(w3q, ((0, 0), (0, pad)))
    params["s3"] = jnp.pad(s3, ((0, 0), (0, pad)), constant_values=1.0)
    params["b3"] = jnp.pad(raw["b3"].reshape(1, D_OUT),
                           ((0, 0), (0, pad))).astype(jnp.float32)
    return params, raw


if __name__ == "__main__":
    key = jax.random.PRNGKey(0)
    kparams, kz = jax.random.split(key)

    params, raw = init_generator_params(kparams)
    batch = 8
    z = jax.random.normal(kz, (batch, D_IN), dtype=jnp.float32)

    out = jax.block_until_ready(generator_forward(params, z))
    assert out.shape == (batch, 1, 28, 28)

    # pure-f32 reference with the ORIGINAL (unquantized) weights
    x = jnp.maximum(z @ raw["w1"] + raw["b1"], 0.0)
    x = jnp.maximum(x @ raw["w2"] + raw["b2"], 0.0)
    ref = jnp.tanh(x @ raw["w3"] + raw["b3"]).reshape(-1, 1, 28, 28)

    err = float(jnp.max(jnp.abs(out - ref)))
    assert err < 5e-2, f"max abs err {err}"  # int8 weights + bf16 matmul rounding
    print("KERNEL_OK")
</pallas_src>

<mosaic_0001>
module attributes {stable_mosaic.version = 11 : i64} {
  func.func @_generator_kernel(%arg0: i32, %arg1: memref<8x128xf32, #tpu.memory_space<vmem>>, %arg2: memref<128x1024xbf16, #tpu.memory_space<vmem>>, %arg3: memref<1x1024xf32, #tpu.memory_space<vmem>>, %arg4: memref<1x1024x1024xi8, #tpu.memory_space<vmem>>, %arg5: memref<1x1024xf32, #tpu.memory_space<vmem>>, %arg6: memref<1x1024xf32, #tpu.memory_space<vmem>>, %arg7: memref<1024x1024xi8, #tpu.memory_space<vmem>>, %arg8: memref<1x1024xf32, #tpu.memory_space<vmem>>, %arg9: memref<1x1024xf32, #tpu.memory_space<vmem>>, %arg10: memref<8x1024xf32, #tpu.memory_space<vmem>>, %arg11: memref<8x1024xf32, #tpu.memory_space<vmem>>, %arg12: memref<8x1024xf32, #tpu.memory_space<vmem>>) attributes {dimension_semantics = [#tpu.dimension_semantics<arbitrary>], iteration_bounds = array<i64: 4>, scalar_prefetch = 0 : i64, scratch_operands = 2 : i64, tpu.core_type = #tpu.core_type<tc>, window_params = [{pipeline_mode = #tpu.pipeline_mode<synchronous>, transform_indices = @transform_0, window_bounds = array<i64: 8, 128>}, {pipeline_mode = #tpu.pipeline_mode<synchronous>, transform_indices = @transform_1, window_bounds = array<i64: 128, 1024>}, {pipeline_mode = #tpu.pipeline_mode<synchronous>, transform_indices = @transform_2, window_bounds = array<i64: 1, 1024>}, {transform_indices = @transform_3, window_bounds = array<i64: 1, 1024, 1024>}, {transform_indices = @transform_4, window_bounds = array<i64: 1, 1024>}, {transform_indices = @transform_5, window_bounds = array<i64: 1, 1024>}, {transform_indices = @transform_6, window_bounds = array<i64: 1024, 1024>}, {pipeline_mode = #tpu.pipeline_mode<synchronous>, transform_indices = @transform_7, window_bounds = array<i64: 1, 1024>}, {pipeline_mode = #tpu.pipeline_mode<synchronous>, transform_indices = @transform_8, window_bounds = array<i64: 1, 1024>}, {pipeline_mode = #tpu.pipeline_mode<synchronous>, transform_indices = @transform_9, window_bounds = array<i64: 8, 1024>}]} {
    %c0_i32 = arith.constant 0 : i32
    %0 = arith.cmpi eq, %arg0, %c0_i32 : i32
    %1 = arith.extui %0 : i1 to i32
    %c0_i32_0 = arith.constant 0 : i32
    %2 = arith.cmpi ne, %1, %c0_i32_0 : i32
    scf.if %2 {
      %c0_18 = arith.constant 0 : index
      %c0_19 = arith.constant 0 : index
      %26 = vector.load %arg1[%c0_18, %c0_19] : memref<8x128xf32, #tpu.memory_space<vmem>>, vector<8x128xf32>
      %27 = arith.truncf %26 : vector<8x128xf32> to vector<8x128xbf16>
      %c0_20 = arith.constant 0 : index
      %c0_21 = arith.constant 0 : index
      %28 = vector.load %arg2[%c0_20, %c0_21] : memref<128x1024xbf16, #tpu.memory_space<vmem>>, vector<128x1024xbf16>
      %cst_22 = arith.constant dense<0.000000e+00> : vector<8x1024xf32>
      %29 = tpu.matmul %27, %28, %cst_22 {dimension_numbers = #tpu.dot_dimension_numbers<[1], [0], [0], [1], [0, 0, 1, 1], [], []>} : vector<8x128xbf16>, vector<128x1024xbf16>, vector<8x1024xf32> -> vector<8x1024xf32>
      %c0_23 = arith.constant 0 : index
      %c0_24 = arith.constant 0 : index
      %30 = vector.load %arg3[%c0_23, %c0_24] : memref<1x1024xf32, #tpu.memory_space<vmem>>, vector<1x1024xf32>
      %31 = vector.broadcast %30 : vector<1x1024xf32> to vector<8x1024xf32>
      %32 = arith.addf %29, %31 : vector<8x1024xf32>
      %cst_25 = arith.constant 0.000000e+00 : f32
      %33 = vector.broadcast %cst_25 : f32 to vector<8x1024xf32>
      %34 = arith.maximumf %32, %33 : vector<8x1024xf32>
      %c0_26 = arith.constant 0 : index
      %c0_27 = arith.constant 0 : index
      %35 = vector.load %arg11[%c0_26, %c0_27] : memref<8x1024xf32, #tpu.memory_space<vmem>>, vector<8x1024xf32>
      tpu.vector_store %arg11[%c0_26, %c0_27], %34 {strides = array<i32>} : memref<8x1024xf32, #tpu.memory_space<vmem>>, vector<8x1024xf32>,
      %cst_28 = arith.constant 0.000000e+00 : f32
      %36 = vector.broadcast %cst_28 : f32 to vector<8x1024xf32>
      %c0_29 = arith.constant 0 : index
      %c0_30 = arith.constant 0 : index
      %37 = vector.load %arg12[%c0_29, %c0_30] : memref<8x1024xf32, #tpu.memory_space<vmem>>, vector<8x1024xf32>
      tpu.vector_store %arg12[%c0_29, %c0_30], %36 {strides = array<i32>} : memref<8x1024xf32, #tpu.memory_space<vmem>>, vector<8x1024xf32>,
    } else {
    }
    %c0 = arith.constant 0 : index
    %c0_1 = arith.constant 0 : index
    %c0_2 = arith.constant 0 : index
    %3 = vector.load %arg4[%c0, %c0_1, %c0_2] : memref<1x1024x1024xi8, #tpu.memory_space<vmem>>, vector<1x1024x1024xi8>
    %4 = vector.shape_cast %3 : vector<1x1024x1024xi8> to vector<1024x1024xi8>
    %5 = arith.sitofp %4 : vector<1024x1024xi8> to vector<1024x1024xbf16>
    %c0_3 = arith.constant 0 : index
    %c0_4 = arith.constant 0 : index
    %6 = vector.load %arg11[%c0_3, %c0_4] : memref<8x1024xf32, #tpu.memory_space<vmem>>, vector<8x1024xf32>
    %cst = arith.constant dense<0.000000e+00> : vector<8x1024xf32>
    %7 = tpu.matmul %6, %5, %cst {dimension_numbers = #tpu.dot_dimension_numbers<[1], [0], [0], [1], [0, 0, 1, 1], [], []>} : vector<8x1024xf32>, vector<1024x1024xbf16>, vector<8x1024xf32> -> vector<8x1024xf32>
    %c0_5 = arith.constant 0 : index
    %c0_6 = arith.constant 0 : index
    %8 = vector.load %arg5[%c0_5, %c0_6] : memref<1x1024xf32, #tpu.memory_space<vmem>>, vector<1x1024xf32>
    %9 = vector.broadcast %8 : vector<1x1024xf32> to vector<8x1024xf32>
    %10 = arith.mulf %7, %9 : vector<8x1024xf32>
    %c0_7 = arith.constant 0 : index
    %c0_8 = arith.constant 0 : index
    %11 = vector.load %arg6[%c0_7, %c0_8] : memref<1x1024xf32, #tpu.memory_space<vmem>>, vector<1x1024xf32>
    %12 = vector.broadcast %11 : vector<1x1024xf32> to vector<8x1024xf32>
    %13 = arith.addf %10, %12 : vector<8x1024xf32>
    %cst_9 = arith.constant 0.000000e+00 : f32
    %14 = vector.broadcast %cst_9 : f32 to vector<8x1024xf32>
    %15 = arith.maximumf %13, %14 : vector<8x1024xf32>
    %c0_10 = arith.constant 0 : index
    %c0_11 = arith.constant 0 : index
    %16 = vector.load %arg7[%c0_10, %c0_11] : memref<1024x1024xi8, #tpu.memory_space<vmem>>, vector<1024x1024xi8>
    %17 = arith.sitofp %16 : vector<1024x1024xi8> to vector<1024x1024xbf16>
    %c0_12 = arith.constant 0 : index
    %c0_13 = arith.constant 0 : index
    %18 = vector.load %arg12[%c0_12, %c0_13] : memref<8x1024xf32, #tpu.memory_space<vmem>>, vector<8x1024xf32>
    %19 = arith.truncf %15 : vector<8x1024xf32> to vector<8x1024xbf16>
    %cst_14 = arith.constant dense<0.000000e+00> : vector<8x1024xf32>
    %20 = tpu.matmul %19, %17, %cst_14 {dimension_numbers = #tpu.dot_dimension_numbers<[1], [0], [0], [1], [0, 0, 1, 1], [], []>} : vector<8x1024xbf16>, vector<1024x1024xbf16>, vector<8x1024xf32> -> vector<8x1024xf32>
    %21 = arith.addf %18, %20 : vector<8x1024xf32>
    %c0_15 = arith.constant 0 : index
    %c0_16 = arith.constant 0 : index
    %22 = vector.load %arg12[%c0_15, %c0_16] : memref<8x1024xf32, #tpu.memory_space<vmem>>, vector<8x1024xf32>
    tpu.vector_store %arg12[%c0_15, %c0_16], %21 {strides = array<i32>} : memref<8x1024xf32, #tpu.memory_space<vmem>>, vector<8x1024xf32>,
    %c3_i32 = arith.constant 3 : i32
    %23 = arith.cmpi eq, %arg0, %c3_i32 : i32
    %24 = arith.extui %23 : i1 to i32
    %c0_i32_17 = arith.constant 0 : i32
    %25 = arith.cmpi ne, %24, %c0_i32_17 : i32
    scf.if %25 {
      %c0_18 = arith.constant 0 : index
      %c0_19 = arith.constant 0 : index
      %26 = vector.load %arg12[%c0_18, %c0_19] : memref<8x1024xf32, #tpu.memory_space<vmem>>, vector<8x1024xf32>
      %c0_20 = arith.constant 0 : index
      %c0_21 = arith.constant 0 : index
      %27 = vector.load %arg8[%c0_20, %c0_21] : memref<1x1024xf32, #tpu.memory_space<vmem>>, vector<1x1024xf32>
      %28 = vector.broadcast %27 : vector<1x1024xf32> to vector<8x1024xf32>
      %29 = arith.mulf %26, %28 : vector<8x1024xf32>
      %c0_22 = arith.constant 0 : index
      %c0_23 = arith.constant 0 : index
      %30 = vector.load %arg9[%c0_22, %c0_23] : memref<1x1024xf32, #tpu.memory_space<vmem>>, vector<1x1024xf32>
      %31 = vector.broadcast %30 : vector<1x1024xf32> to vector<8x1024xf32>
      %32 = arith.addf %29, %31 : vector<8x1024xf32>
      %33 = math.tanh %32 : vector<8x1024xf32>
      %c0_24 = arith.constant 0 : index
      %c0_25 = arith.constant 0 : index
      %34 = vector.load %arg10[%c0_24, %c0_25] : memref<8x1024xf32, #tpu.memory_space<vmem>>, vector<8x1024xf32>
      tpu.vector_store %arg10[%c0_24, %c0_25], %33 {strides = array<i32>} : memref<8x1024xf32, #tpu.memory_space<vmem>>, vector<8x1024xf32>,
    } else {
    }
    return
  }
  func.func @transform_0(%arg0: i32) -> (i32, i32) {
    %c0_i32 = arith.constant 0 : i32
    %c0_i32_0 = arith.constant 0 : i32
    %c0_i32_1 = arith.constant 0 : i32
    return %c0_i32, %c0_i32_0 : i32, i32
  }
  func.func @transform_1(%arg0: i32) -> (i32, i32) {
    %c0_i32 = arith.constant 0 : i32
    %c0_i32_0 = arith.constant 0 : i32
    %c0_i32_1 = arith.constant 0 : i32
    return %c0_i32, %c0_i32_0 : i32, i32
  }
  func.func @transform_2(%arg0: i32) -> (i32, i32) {
    %c0_i32 = arith.constant 0 : i32
    %c0_i32_0 = arith.constant 0 : i32
    %c0_i32_1 = arith.constant 0 : i32
    return %c0_i32, %c0_i32_0 : i32, i32
  }
  func.func @transform_3(%arg0: i32) -> (i32, i32, i32) {
    %c0_i32 = arith.constant 0 : i32
    %c0_i32_0 = arith.constant 0 : i32
    %c0_i32_1 = arith.constant 0 : i32
    return %arg0, %c0_i32, %c0_i32_0 : i32, i32, i32
  }
  func.func @transform_4(%arg0: i32) -> (i32, i32) {
    %c0_i32 = arith.constant 0 : i32
    %c0_i32_0 = arith.constant 0 : i32
    return %c0_i32, %arg0 : i32, i32
  }
  func.func @transform_5(%arg0: i32) -> (i32, i32) {
    %c0_i32 = arith.constant 0 : i32
    %c0_i32_0 = arith.constant 0 : i32
    return %c0_i32, %arg0 : i32, i32
  }
  func.func @transform_6(%arg0: i32) -> (i32, i32) {
    %c0_i32 = arith.constant 0 : i32
    %c0_i32_0 = arith.constant 0 : i32
    return %arg0, %c0_i32 : i32, i32
  }
  func.func @transform_7(%arg0: i32) -> (i32, i32) {
    %c0_i32 = arith.constant 0 : i32
    %c0_i32_0 = arith.constant 0 : i32
    %c0_i32_1 = arith.constant 0 : i32
    return %c0_i32, %c0_i32_0 : i32, i32
  }
  func.func @transform_8(%arg0: i32) -> (i32, i32) {
    %c0_i32 = arith.constant 0 : i32
    %c0_i32_0 = arith.constant 0 : i32
    %c0_i32_1 = arith.constant 0 : i32
    return %c0_i32, %c0_i32_0 : i32, i32
  }
  func.func @transform_9(%arg0: i32) -> (i32, i32) {
    %c0_i32 = arith.constant 0 : i32
    %c0_i32_0 = arith.constant 0 : i32
    %c0_i32_1 = arith.constant 0 : i32
    return %c0_i32, %c0_i32_0 : i32, i32
  }
}

</mosaic_0001>

<bundles_post_ra>
// kernel: generator_forward.1
= control target key start
LH: loop header
LB: loop body
LE: loop exit
PB: predicated region body
PF: predicated region fallthrough
CT: control target
= control target key end

     0   :  { %s6097_s0 = inlined_call_operand.hbm [shape: f32[8,128], index: 0, kind: input, shape index: {}]   ;;  %s6098_s1 = inlined_call_operand.hbm [shape: bf16[128,1024], index: 1, kind: input, shape index: {}]   ;;  %s6099_s2 = inlined_call_operand.hbm [shape: f32[1,1024], index: 2, kind: input, shape index: {}]   ;;  %s6100_s3 = inlined_call_operand.hbm [shape: s8[4,1024,1024], index: 3, kind: input, shape index: {}]   ;;  %s6101_s4 = inlined_call_operand.hbm [shape: f32[1,4096], index: 4, kind: input, shape index: {}]   ;;  %s6102_s5 = inlined_call_operand.hbm [shape: f32[1,4096], index: 5, kind: input, shape index: {}]   ;;  %s6103_s6 = inlined_call_operand.hbm [shape: s8[4096,1024], index: 6, kind: input, shape index: {}]   ;;  %s6104_s7 = inlined_call_operand.hbm [shape: f32[1,1024], index: 7, kind: input, shape index: {}]   ;;  %s6105_s8 = inlined_call_operand.hbm [shape: f32[1,1024], index: 8, kind: input, shape index: {}]   ;;  %s6106_s9 = inlined_call_operand.vmem [shape: f32[8,1024], index: 9, kind: output, shape index: {}]  }
   0x1   :  { %6128 = sst [smem:[#allocation28_spill]] %s6098_s1 }
   0x2   :  { %6129 = sst [smem:[#allocation29_spill]] %s6100_s3 }
   0x3   :  { %6130 = sst [smem:[#allocation30_spill]] %s6104_s7 }
   0x4   :  { %6131 = sst [smem:[#allocation31_spill]] %s6106_s9 }
   0x5   :  { %14 = vsyncpa [#allocation5], 0 }
   0x6   :  { %15 = vsyncpa [#allocation7], 0 }
   0x7   :  { %16 = vsyncpa [#allocation10], 0 }
   0x8   :  { %18 = vsyncpa [#allocation10 + $0x1], 0 }
   0x9   :  { %19 = vsyncpa [#allocation13], 0 }
   0xa   :  { %21 = vsyncpa [#allocation13 + $0x1], 0 }
   0xb   :  { %22 = vsyncpa [#allocation16], 0  ;;  %s4982_s30 = smov 0   ;;  %s4984_s10 = smov 0  }
   0xc   :  { %s4986_s11 = smov 0   ;;  %s4988_s12 = smov 0  }
   0xd LB: > { %6132 = sst [smem:[#allocation23_spill]] %s4907_s10  ;;  %s4917_s13 = smov [#allocation6]   ;;  %s4915_s12 = sphi %s4988_s12, %s6167_s12   ;;  %s4911_s11 = sphi %s4986_s11, %s6170_s11   ;;  %s4907_s10 = sphi %s4984_s10, %s6169_s10   ;;  %s4903_s30 = sphi %s4982_s30, %s6168_s30  }
   0xe   : > { %6133 = sst [smem:[#allocation24_spill]] %s4911_s11  ;;  %s286_s14 = sshll.u32 %s4917_s13, 4  ;;  %s287_s14 = int_to_ptr.vmem [resolvable:$true] %s286_s14 }
   0xf   : > { %s5003_s15 = sadd.s32 4294967295, %s4915_s12   ;;  %p4383_p0 = scmp.ge.s32.totalorder %s4915_s12, 1 }
  0x10   : > { %p6107_p1 = scmp.eq.s32.totalorder %s5003_s15, 0  ;;  %p263_p2 = scmp.lt.s32.totalorder %s4915_s12, 5 }
  0x11   : > { %s4918_s17 = smov [#allocation15]   ;;  %s4634_s21 = scalar_lea.vmem %s287_s14, 8192 }
  0x12   : > { %p5009_p4 = pnand %p4383_p0, %p263_p2  ;;  %s311_s18 = sshll.u32 %s4918_s17, 4  ;;  %s312_s18 = int_to_ptr.vmem [resolvable:$true] %s311_s18 }
  0x13   : > { %p4635_p8 = scmp.ne.s32.totalorder %s287_s14, %s4634_s21  ;;  %p4642_p11 = scmp.lt.s32.totalorder %s287_s14, %s287_s14 }
  0x14   : > { %s6134_s16 = scalar_select %p5009_p4, 1, 0 }
  0x15   : > { %p4514_p5 = pneg %p5009_p4  ;;  %p4643_p12 = scmp.lt.s32.totalorder %s4634_s21, %s4634_s21 }
  0x17   : > { %p5017_p6 = pnand %p4514_p5, %p6107_p1  ;;  %p4644_p13 = por %p4643_p12, %p4642_p11 }
  0x19   : > { %s6135_s19 = scalar_select %p5017_p6, 1, 0 }
  0x1a   : > { %p5023_p7 = pneg %p5017_p6 }
  0x1c   : > { %s6136_s20 = scalar_select %p5023_p7, 1, 0 }
  0x1d   : > { %p4637_p9 = pnand %p4635_p8, %p5023_p7 }
  0x1f   : > { %p4638_p10 = pneg %p4637_p9 }
  0x21   : > { %p4645_p0 = pnand %p4644_p13, %p4638_p10 }
  0x23   : > { %4648 = shalt.err (!%p4645_p0)
}
  0x24   : > { %s4919_s22 = smov 512   ;;  %s4920_s23 = smov 32  }
  0x25   : > { %s6137_s1 = sld [smem:[#allocation28_spill]]  ;;  %s4660_s26 = scalar_lea.vmem %s312_s18, 128 }
  0x26   : > { %p4661_p2 = scmp.ne.s32.totalorder %s312_s18, %s4660_s26  ;;  %p4668_p9 = scmp.lt.s32.totalorder %s312_s18, %s312_s18 }
  0x27   : > { %p4669_p3 = scmp.lt.s32.totalorder %s4660_s26, %s4660_s26 }
  0x28   : > { %p4663_p5 = pnand %p4661_p2, %p5023_p7 }
  0x29   : > { %p4670_p1 = por %p4669_p3, %p4668_p9 }
  0x2a   : > { %p4664_p8 = pneg %p4663_p5 }
  0x2b   : > { %4520 = dma.hbm_to_vmem [thread:$0]  (!%p5017_p6), %s6137_s1, 8192, %s287_s14, [#allocation7], %s4919_s22, %s4919_s22, %s4920_s23  }
  0x2c   : > { %p4671_p11 = pnand %p4670_p1, %p4664_p8 }
  0x2e   : > { %4674 = shalt.err (!%p4671_p11)
}
  0x2f   : > { %s6138_s7 = sld [smem:[#allocation30_spill]]  ;;  %s5042_s29 = sadd.s32 1, %s4915_s12  }
  0x30   : > { %6139 = sst [smem:[#allocation25_spill]] %s5042_s29  ;;  %s98_s13 = sadd.s32 1, %s4911_s11 }
  0x31   : > { %s95_s14 = ssub.s32 %s4915_s12, %s5042_s29  ;;  %p105_p1 = scmp.ne.s32.totalorder %s4911_s11, %s4907_s10 }
  0x32   : > { %p96_p3 = scmp.eq.s32.totalorder %s95_s14, 0  ;;  %p106_p10 = scmp.eq.s32.totalorder %s4915_s12, 0 }
  0x33   : > { %p111_p12 = scmp.ne.s32.totalorder %s4907_s10, %s4903_s30  ;;  %p4548_p13 = scmp.lt.s32.totalorder %s4915_s12, 4 }
  0x34   : > { %s5054_s17 = scalar_select %p96_p3, %s4911_s11, %s98_s13  }
  0x35   : > { %4526 = dma.hbm_to_vmem [thread:$0]  (!%p5017_p6), %s6138_s7, 128, %s312_s18, [#allocation16]  }
  0x36   : > { %6140 = sst [smem:[#allocation26_spill]] %s5054_s17  ;;  %p107_p0 = por %p106_p10, %p105_p1 }
  0x37   : > { %p6141_p2 = scmp.eq.s32.totalorder %s5003_s15, 0  ;;  %s6110_s18 = sand.u32 1, %s4915_s12  }
  0x38   : > { %s6108_s22 = sand.u32 1, %s4911_s11   ;;  %s6109_s24 = sshll.u32 %s4915_s12, 15 }
  0x39   : > { %p5058_p5 = por %p6141_p2, %p111_p12  ;;  %s5066_s23 = sshll.u32 %s6108_s22, 11 }
  0x3a   : > { %s6144_s3 = sld [smem:[#allocation29_spill]]  ;;  %s337_s27 = scalar_lea.vmem [#allocation9], %s5066_s23 }
  0x3b   : > { %s6142_s21 = scalar_select %p5058_p5, 1, 0 }
  0x3c   : > { %s344_s28 = sshll.u32 %s337_s27, 4  ;;  %p5079_p8 = pnand %p4548_p13, %p107_p0  ;;  %s5077_s28 = int_to_ptr.vmem [resolvable:$true] %s344_s28 }
  0x3d   : > { %6143 = sst [smem:[#allocation27_spill]] %s6142_s21  ;;  %s5085_s14 = scalar_lea.sflag [#allocation10], %s6110_s18 }
  0x3e   : > { %p5091_p11 = pneg %p5079_p8 }
  0x40   : > { %s5074_s30 = scalar_lea.hbm %s6144_s3, %s6109_s24  ;;  %s4680_s24 = scalar_lea.hbm %s6144_s3, 131072 }
  0x41   : > { %s4675_s22 = scalar_lea.hbm %s5074_s30, 32768  ;;  %p4681_p10 = scmp.lt.s32.totalorder %s5074_s30, %s6144_s3 }
  0x42   : > { %p4676_p9 = scmp.ne.s32.totalorder %s5074_s30, %s4675_s22  ;;  %p4682_p12 = scmp.lt.s32.totalorder %s4680_s24, %s4675_s22 }
  0x43   : > { %s6146_s25 = scalar_select %p5091_p11, 1, 0 }
  0x44   : > { %p4678_p1 = pnand %p5091_p11, %p4676_p9  ;;  %p4683_p13 = por %p4682_p12, %p4681_p10 }
  0x46   : > { %p4679_p3 = pneg %p4678_p1 }
  0x48   : > { %p4684_p0 = pnand %p4683_p13, %p4679_p3 }
  0x4a   : > { %4687 = shalt.err (!%p4684_p0)
}
  0x4b   : > { %s4688_s18 = scalar_lea.vmem %s5077_s28, 32768  ;;  %s4921_s17 = smov [#allocation9]  }
  0x4c   : > { %p4689_p2 = scmp.ne.s32.totalorder %s5077_s28, %s4688_s18  ;;  %s4693_s26 = sshll.u32 %s4921_s17, 4  ;;  %s4694_s26 = int_to_ptr.vmem [resolvable:$false] %s4693_s26 }
  0x4d   : > { %s4695_s27 = scalar_lea.vmem %s4694_s26, 65536  ;;  %p4696_p5 = scmp.lt.s32.totalorder %s5077_s28, %s4694_s26 }
  0x4e   : > { %p4691_p9 = pnand %p4689_p2, %p5091_p11  ;;  %p4697_p4 = scmp.lt.s32.totalorder %s4695_s27, %s4688_s18 }
  0x50   : > { %p4692_p1 = pneg %p4691_p9  ;;  %p4698_p6 = por %p4697_p4, %p4696_p5 }
  0x52   : > { %p4699_p7 = pnand %p4698_p6, %p4692_p1 }
  0x54   : > { %4702 = shalt.err (!%p4699_p7)
}
  0x55   : > { %s6123_s1 = smov 1024   ;;  %s6124_s7 = smov 64  }
  0x56   : > { %4533 = dma.hbm_to_vmem [thread:$0]  (!%p5079_p8), %s5074_s30, 32768, %s5077_s28, %s5085_s14, %s6123_s1, %s6123_s1, %s6124_s7  }
  0x57   : > { %s6147_s17 = sshll.u32 %s4915_s12, 15  ;;  %s396_s26 = scalar_lea.vmem [#allocation14], %s5066_s23 }
  0x58   : > { %s5122_s24 = scalar_lea.hbm %s6103_s6, %s6147_s17  ;;  %s404_s27 = sshll.u32 %s396_s26, 4  ;;  %s5125_s27 = int_to_ptr.vmem [resolvable:$true] %s404_s27 }
  0x59   : > { %s6148_s3 = sand.u32 1, %s4911_s11   ;;  %s4482_s9 = sshll.u32 %s4915_s12, 7 }
  0x5a   : > { %s5129_s29 = sshll.u32 %s6148_s3, 3  ;;  %s5135_s30 = scalar_lea.hbm %s6101_s4, %s4482_s9 }
  0x5b   : > { %s5140_s17 = scalar_lea.hbm %s6102_s5, %s4482_s9  ;;  %s377_s23 = scalar_lea.vmem [#allocation12], %s5129_s29 }
  0x5c   : > { %s385_s18 = sshll.u32 %s377_s23, 4  ;;  %s4924_s3 = smov [#allocation4]   ;;  %s386_s18 = int_to_ptr.vmem [resolvable:$true] %s385_s18 }
  0x5d   : > { %s276_s22 = sshll.u32 %s4924_s3, 4  ;;  %s6149_s26 = sand.u32 1, %s4915_s12   ;;  %s277_s22 = int_to_ptr.vmem [resolvable:$true] %s276_s22 }
  0x5e   : > { %s5145_s7 = scalar_lea.sflag [#allocation13], %s6149_s26  ;;  %s4703_s11 = scalar_lea.hbm %s5140_s17, 128 }
  0x5f   : > { %p4704_p4 = scmp.ne.s32.totalorder %s5140_s17, %s4703_s11  ;;  %s4708_s9 = scalar_lea.hbm %s6102_s5, 512 }
  0x60   : > { %p4709_p5 = scmp.lt.s32.totalorder %s5140_s17, %s6102_s5  ;;  %p4710_p3 = scmp.lt.s32.totalorder %s4708_s9, %s4703_s11 }
  0x61   : > { %p4706_p6 = pnand %p4704_p4, %p5091_p11 }
  0x62   : > { %p4711_p10 = por %p4710_p3, %p4709_p5 }
  0x63   : > { %p4707_p7 = pneg %p4706_p6 }
  0x65   : > { %p4712_p12 = pnand %p4711_p10, %p4707_p7 }
  0x67   : > { %4715 = shalt.err (!%p4712_p12)
}
  0x68   : > { %s4716_s12 = scalar_lea.vmem %s386_s18, 128  ;;  %s4925_s23 = smov [#allocation12]  }
  0x69   : > { %p4717_p13 = scmp.ne.s32.totalorder %s386_s18, %s4716_s12  ;;  %s4721_s3 = sshll.u32 %s4925_s23, 4  ;;  %s4722_s3 = int_to_ptr.vmem [resolvable:$false] %s4721_s3 }
  0x6a   : > { %s4723_s26 = scalar_lea.vmem %s4722_s3, 256  ;;  %p4724_p9 = scmp.lt.s32.totalorder %s386_s18, %s4722_s3 }
  0x6b   : > { %p4719_p0 = pnand %p4717_p13, %p5091_p11  ;;  %p4725_p1 = scmp.lt.s32.totalorder %s4723_s26, %s4716_s12 }
  0x6d   : > { %p4720_p2 = pneg %p4719_p0  ;;  %p4726_p4 = por %p4725_p1, %p4724_p9 }
  0x6f   : > { %p4727_p6 = pnand %p4726_p4, %p4720_p2 }
  0x71   : > { %4730 = shalt.err (!%p4727_p6)
}
  0x72   : > { %4539 = dma.hbm_to_vmem [thread:$0]  (!%p5079_p8), %s5140_s17, 128, %s386_s18, %s5145_s7  }
  0x73   : > { %s4742_s11 = scalar_lea.vmem %s277_s22, 128  ;;  %p6150_p5 = scmp.ne.s32.totalorder %s6136_s20, 0 }
  0x74   : > { %p4743_p7 = scmp.ne.s32.totalorder %s277_s22, %s4742_s11  ;;  %p4750_p12 = scmp.lt.s32.totalorder %s277_s22, %s277_s22 }
  0x75   : > { %p4751_p13 = scmp.lt.s32.totalorder %s4742_s11, %s4742_s11 }
  0x76   : > { %p4745_p3 = pnand %p4743_p7, %p6150_p5 }
  0x77   : > { %p4752_p0 = por %p4751_p13, %p4750_p12 }
  0x78   : > { %p4746_p10 = pneg %p4745_p3 }
  0x7a   : > { %p4753_p11 = pnand %p4752_p0, %p4746_p10 }
  0x7c   : > { %4756 = shalt.err (!%p4753_p11)
}
  0x7d   : > { %p6151_p2 = scmp.ne.s32.totalorder %s6135_s19, 0  ;;  %s4926_s9 = smov [#allocation8]  }
  0x7e   : > { %s300_s17 = sshll.u32 %s4926_s9, 4  ;;  %s4927_s18 = smov [#allocation17]   ;;  %s301_s17 = int_to_ptr.vmem [resolvable:$true] %s300_s17 }
  0x7f   : > { %4517 = dma.hbm_to_vmem [thread:$0]  (!%p6151_p2), %s6097_s0, 128, %s277_s22, [#allocation5]  }
  0x80   : > { %s322_s1 = sshll.u32 %s4927_s18, 4  ;;  %s4768_s28 = scalar_lea.vmem %s301_s17, 128  ;;  %s323_s1 = int_to_ptr.vmem [resolvable:$true] %s322_s1 }
  0x81   : > { %p4769_p9 = scmp.ne.s32.totalorder %s301_s17, %s4768_s28  ;;  %p4776_p6 = scmp.lt.s32.totalorder %s301_s17, %s301_s17 }
  0x82   : > { %p4777_p7 = scmp.lt.s32.totalorder %s4768_s28, %s4768_s28 }
  0x83   : > { %p4771_p1 = pnand %p4769_p9, %p6150_p5 }
  0x84   : > { %p4778_p11 = por %p4777_p7, %p4776_p6 }
  0x85   : > { %p4772_p4 = pneg %p4771_p1 }
  0x87   : > { %p4779_p3 = pnand %p4778_p11, %p4772_p4 }
  0x89   : > { %4782 = shalt.err (!%p4779_p3)
}
  0x8a   : > { %4523 = dma.hbm_to_vmem [thread:$0]  (!%p6151_p2), %s6099_s2, 128, %s301_s17, [#allocation7]  }
  0x8b   : > { %s358_s22 = scalar_lea.vmem [#allocation11], %s5129_s29  ;;  %s4794_s26 = scalar_lea.vmem %s323_s1, 128 }
  0x8c   : > { %s366_s3 = sshll.u32 %s358_s22, 4  ;;  %p4795_p10 = scmp.ne.s32.totalorder %s323_s1, %s4794_s26  ;;  %s367_s3 = int_to_ptr.vmem [resolvable:$true] %s366_s3 }
  0x8d   : > { %p4802_p0 = scmp.lt.s32.totalorder %s323_s1, %s323_s1  ;;  %p4803_p9 = scmp.lt.s32.totalorder %s4794_s26, %s4794_s26 }
  0x8e   : > { %p4797_p12 = pnand %p4795_p10, %p6150_p5 }
  0x8f   : > { %p4804_p1 = por %p4803_p9, %p4802_p0 }
  0x90   : > { %p4798_p13 = pneg %p4797_p12 }
  0x92   : > { %p4805_p4 = pnand %p4804_p1, %p4798_p13 }
  0x94   : > { %4808 = shalt.err (!%p4805_p4)
}
  0x95   : > { %4529 = dma.hbm_to_vmem [thread:$0]  (!%p6151_p2), %s6105_s8, 128, %s323_s1, [#allocation16]  }
  0x96   : > { %s4809_s29 = scalar_lea.hbm %s5135_s30, 128  ;;  %p6152_p5 = scmp.ne.s32.totalorder %s6146_s25, 0 }
  0x97   : > { %p4810_p6 = scmp.ne.s32.totalorder %s5135_s30, %s4809_s29  ;;  %s4814_s9 = scalar_lea.hbm %s6101_s4, 512 }
  0x98   : > { %p4815_p3 = scmp.lt.s32.totalorder %s5135_s30, %s6101_s4  ;;  %p4816_p10 = scmp.lt.s32.totalorder %s4814_s9, %s4809_s29 }
  0x99   : > { %p4812_p7 = pnand %p4810_p6, %p6152_p5 }
  0x9a   : > { %p4817_p12 = por %p4816_p10, %p4815_p3 }
  0x9b   : > { %p4813_p11 = pneg %p4812_p7 }
  0x9d   : > { %p4818_p13 = pnand %p4817_p12, %p4813_p11 }
  0x9f   : > { %4821 = shalt.err (!%p4818_p13)
}
  0xa0   : > { %s4822_s18 = scalar_lea.vmem %s367_s3, 128  ;;  %s4928_s1 = smov [#allocation11]  }
  0xa1   : > { %p4823_p2 = scmp.ne.s32.totalorder %s367_s3, %s4822_s18  ;;  %s4827_s28 = sshll.u32 %s4928_s1, 4  ;;  %s4828_s28 = int_to_ptr.vmem [resolvable:$false] %s4827_s28 }
  0xa2   : > { %s4829_s12 = scalar_lea.vmem %s4828_s28, 256  ;;  %p4830_p1 = scmp.lt.s32.totalorder %s367_s3, %s4828_s28 }
  0xa3   : > { %p4825_p0 = pnand %p4823_p2, %p6152_p5  ;;  %p4831_p4 = scmp.lt.s32.totalorder %s4829_s12, %s4822_s18 }
  0xa5   : > { %p4826_p9 = pneg %p4825_p0  ;;  %p4832_p6 = por %p4831_p4, %p4830_p1 }
  0xa7   : > { %p4833_p7 = pnand %p4832_p6, %p4826_p9 }
  0xa9   : > { %4836 = shalt.err (!%p4833_p7)
}
  0xaa   : > { %4536 = dma.hbm_to_vmem [thread:$0]  (!%p5079_p8), %s5135_s30, 128, %s367_s3, %s5085_s14  }
  0xab   : > { %s4837_s23 = scalar_lea.hbm %s5122_s24, 32768  ;;  %s4842_s11 = scalar_lea.hbm %s6103_s6, 131072 }
  0xac   : > { %p4838_p11 = scmp.ne.s32.totalorder %s5122_s24, %s4837_s23  ;;  %p4843_p12 = scmp.lt.s32.totalorder %s5122_s24, %s6103_s6 }
  0xad   : > { %p4844_p13 = scmp.lt.s32.totalorder %s4842_s11, %s4837_s23 }
  0xae   : > { %p4840_p3 = pnand %p4838_p11, %p6152_p5 }
  0xaf   : > { %p4845_p2 = por %p4844_p13, %p4843_p12 }
  0xb0   : > { %p4841_p10 = pneg %p4840_p3 }
  0xb2   : > { %p4846_p0 = pnand %p4845_p2, %p4841_p10 }
  0xb4   : > { %4849 = shalt.err (!%p4846_p0)
}
  0xb5   : > { %s4850_s14 = scalar_lea.vmem %s5125_s27, 32768  ;;  %s4929_s30 = smov [#allocation14]  }
  0xb6   : > { %p4851_p9 = scmp.ne.s32.totalorder %s5125_s27, %s4850_s14  ;;  %s4855_s3 = sshll.u32 %s4929_s30, 4  ;;  %s4856_s3 = int_to_ptr.vmem [resolvable:$false] %s4855_s3 }
  0xb7   : > { %s4857_s20 = scalar_lea.vmem %s4856_s3, 65536  ;;  %p4858_p6 = scmp.lt.s32.totalorder %s5125_s27, %s4856_s3 }
  0xb8   : > { %p4853_p1 = pnand %p4851_p9, %p6152_p5  ;;  %p4859_p7 = scmp.lt.s32.totalorder %s4857_s20, %s4850_s14 }
  0xba   : > { %p4854_p4 = pneg %p4853_p1  ;;  %p4860_p11 = por %p4859_p7, %p4858_p6 }
  0xbc   : > { %p4861_p3 = pnand %p4860_p11, %p4854_p4 }
  0xbe   : > { %4864 = shalt.err (!%p4861_p3)
}
  0xbf   : > { %s6153_s21 = smov 64   ;;  %s6154_s9 = smov 1024  }
  0xc0   : > { %4542 = dma.hbm_to_vmem [thread:$0]  (!%p5079_p8), %s5122_s24, 32768, %s5125_s27, %s5145_s7, %s6154_s9, %s6154_s9, %s6153_s21  }
  0xc1   : > { %p6155_p5 = scmp.ne.s32.totalorder %s6134_s16, 0 }
  0xc2   : > { %p6156_p10 = scmp.eq.s32.totalorder (!%p6155_p5), %s5003_s15, 0 }
  0xc3   : > { %416 = sbr.rel (%p6155_p5) target bundleno = 1831 (0x727), region = 56 }
  0xc8   : > { %4882 = dma.done.wait (%p6156_p10), [#allocation5], 128   ;;  %p6157_p12 = pmov %p6156_p10 }
  0xc9   : > { %p6158_p13 = pmov %p6156_p10 }
  0xca   : > { %4884 = vsyncadd (%p6157_p12), [#allocation5], 4294967168 }
  0xcb   : > { %4886 = dma.done.wait (%p6158_p13), [#allocation7], 8320   ;;  %p6159_p2 = pmov %p6156_p10 }
  0xcc   : > { %s6160_s13 = sld [smem:[#allocation23_spill]]  ;;  %s430_s17 = sand.u32 1, %s5003_s15  }
  0xcd   : > { %4888 = vsyncadd (%p6159_p2), [#allocation7], 4294958976  ;;  %s6161_s25 = sld [smem:[#allocation27_spill]]  ;;  %s431_s16 = scalar_lea.sflag [#allocation10], %s430_s17 }
  0xd2   : > { %s432_s7 = sand.u32 1, %s6160_s13  }
  0xd3   : > { %s4407_s24 = sshll.u32 %s432_s7, 11  ;;  %p6162_p8 = scmp.ne.s32.totalorder %s6161_s25, 0 }
  0xd4   : > { %s5239_s27 = scalar_lea.vmem [#allocation9], %s4407_s24 }
  0xd5   : > { %4890 = dma.done.wait (%p6162_p8), %s431_s16, 32896  }
  0xd6   : > { %4892 = vsyncadd (%p6162_p8), %s431_s16, 4294934400  ;;  %s5245_s19 = sshll.u32 %s432_s7, 3  ;;  %s449_s1 = scalar_lea.sflag [#allocation13], %s430_s17 }
  0xd7   : > { %s443_s18 = scalar_lea.vmem [#allocation11], %s5245_s19  ;;  %s452_s28 = scalar_lea.vmem [#allocation12], %s5245_s19 }
  0xd8   : > { %4894 = dma.done.wait (%p6162_p8), %s449_s1, 32896  }
  0xd9   : > { %4896 = vsyncadd (%p6162_p8), %s449_s1, 4294934400  ;;  %s5253_s12 = scalar_lea.vmem [#allocation14], %s4407_s24  ;;  %p6163_p0 = pmov %p6159_p2 }
  0xdb   : > { %4898 = dma.done.wait (%p6163_p0), [#allocation16], 256   ;;  %p6164_p9 = pmov %p6163_p0 }
  0xdc   : > { %p6165_p1 = scmp.ne.s32.totalorder %s5003_s15, 0 }
  0xdd   : > { %4900 = vsyncadd (%p6164_p9), [#allocation16], 4294967040 }
  0xde   : > { %521 = sbr.rel (%p6165_p1) target bundleno = 495 (0x1ef), region = 96 }
  0xe3   : > { %v580_v0 = vld [vmem:[#allocation6 + $0x1c0] sm:$0xff]  ;;  %v581_v2 = vld [vmem:[#allocation6 + $0x1c8] sm:$0xff]  ;;  %v4930_v8 = vmov 0   ;;  %v582_v63 = vld [vmem:[#allocation6 + $0x1d0] sm:$0xff] }
  0xe4   : > { %v584_v1 = vld [vmem:[#allocation6 + $0x1e0] sm:$0xff]  ;;  %v585_v4 = vld [vmem:[#allocation6 + $0x1e8] sm:$0xff]  ;;  %982 = vmatprep.mubr.bf16.mxu0 %v4930_v8  ;;  %1023 = vmatprep.mubr.bf16.mxu1 %v4930_v8 }
  0xe5   : > { %v4471_v3 = vcombine.high %v580_v0, %v584_v1  ;;  %v4470_v5 = vcombine.low %v580_v0, %v584_v1  ;;  %v572_v6 = vld [vmem:[#allocation6 + $0x180] sm:$0xff]  ;;  %v4473_v9 = vcombine.high %v581_v2, %v585_v4  ;;  %v4472_v10 = vcombine.low %v581_v2, %v585_v4  ;;  %v573_v12 = vld [vmem:[#allocation6 + $0x188] sm:$0xff]  ;;  %v586_v0 = vld [vmem:[#allocation6 + $0x1f0] sm:$0xff] }
  0xe6   : > { %v576_v7 = vld [vmem:[#allocation6 + $0x1a0] sm:$0xff]  ;;  %v577_v13 = vld [vmem:[#allocation6 + $0x1a8] sm:$0xff]  ;;  %v583_v1 = vld [vmem:[#allocation6 + $0x1d8] sm:$0xff] }
  0xe7   : > { %v4463_v11 = vcombine.high %v572_v6, %v576_v7  ;;  %v564_v14 = vld [vmem:[#allocation6 + $0x140] sm:$0xff]  ;;  %950 = vmatprep.subr.bf16.mxu0 %v4471_v3  ;;  %v4465_v15 = vcombine.high %v573_v12, %v577_v13  ;;  %v565_v17 = vld [vmem:[#allocation6 + $0x148] sm:$0xff]  ;;  %991 = vmatprep.subr.bf16.mxu1 %v4473_v9  ;;  %v4462_v19 = vcombine.low %v572_v6, %v576_v7  ;;  %v587_v2 = vld [vmem:[#allocation6 + $0x1f8] sm:$0xff] }
  0xe8   : > { %v568_v16 = vld [vmem:[#allocation6 + $0x160] sm:$0xff]  ;;  %v569_v18 = vld [vmem:[#allocation6 + $0x168] sm:$0xff]  ;;  %951 = vmatpush1.bf16.msra.mxu0 %v4470_v5  ;;  %992 = vmatpush1.bf16.msra.mxu1 %v4472_v10  ;;  %v4464_v20 = vcombine.low %v573_v12, %v577_v13  ;;  %v522_v4 = vld [vmem:[#allocation4] sm:$0xff]  ;;  %v4475_v6 = vcombine.high %v582_v63, %v586_v0  ;;  %v4477_v7 = vcombine.high %v583_v1, %v587_v2 }
  0xe9   : > { %952 = vmatprep.subr.bf16.mxu0 %v4463_v11  ;;  %v4455_v21 = vcombine.high %v564_v14, %v568_v16  ;;  %993 = vmatprep.subr.bf16.mxu1 %v4465_v15  ;;  %v4457_v22 = vcombine.high %v565_v17, %v569_v18  ;;  %v556_v23 = vld [vmem:[#allocation6 + $0x100] sm:$0xff]  ;;  %v557_v25 = vld [vmem:[#allocation6 + $0x108] sm:$0xff]  ;;  %v4454_v27 = vcombine.low %v564_v14, %v568_v16  ;;  %v574_v9 = vld [vmem:[#allocation6 + $0x190] sm:$0xff] }
  0xea   : > { %v560_v24 = vld [vmem:[#allocation6 + $0x120] sm:$0xff]  ;;  %v561_v26 = vld [vmem:[#allocation6 + $0x128] sm:$0xff]  ;;  %v4456_v28 = vcombine.low %v565_v17, %v569_v18  ;;  %v578_v10 = vld [vmem:[#allocation6 + $0x1b0] sm:$0xff]  ;;  %v5263_v11 = vpack.c.bf16 %v522_v4, %v522_v4  ;;  %v4474_v14 = vcombine.low %v582_v63, %v586_v0  ;;  %v4476_v15 = vcombine.low %v583_v1, %v587_v2 }
  0xeb   : > { %v4447_v29 = vcombine.high %v556_v23, %v560_v24  ;;  %v4449_v30 = vcombine.high %v557_v25, %v561_v26  ;;  %v548_v31 = vld [vmem:[#allocation6 + $0xc0] sm:$0xff]  ;;  %v549_v33 = vld [vmem:[#allocation6 + $0xc8] sm:$0xff]  ;;  %v4446_v35 = vcombine.low %v556_v23, %v560_v24  ;;  %v4448_v36 = vcombine.low %v557_v25, %v561_v26  ;;  %v575_v12 = vld [vmem:[#allocation6 + $0x198] sm:$0xff] }
  0xec   : > { %953 = vmatpush1.bf16.msra.mxu0 %v4462_v19  ;;  %994 = vmatpush1.bf16.msra.mxu1 %v4464_v20  ;;  %v552_v32 = vld [vmem:[#allocation6 + $0xe0] sm:$0xff]  ;;  %v553_v34 = vld [vmem:[#allocation6 + $0xe8] sm:$0xff]  ;;  %v579_v13 = vld [vmem:[#allocation6 + $0x1b8] sm:$0xff]  ;;  %v4467_v16 = vcombine.high %v574_v9, %v578_v10  ;;  %v590_v4 = vlaneseq }
  0xed   : > { %954 = vmatprep.subr.bf16.mxu0 %v4455_v21  ;;  %995 = vmatprep.subr.bf16.mxu1 %v4457_v22  ;;  %v4439_v37 = vcombine.high %v548_v31, %v552_v32  ;;  %v4441_v38 = vcombine.high %v549_v33, %v553_v34  ;;  %v540_v39 = vld [vmem:[#allocation6 + $0x80] sm:$0xff]  ;;  %v541_v41 = vld [vmem:[#allocation6 + $0x88] sm:$0xff]  ;;  %v4438_v43 = vcombine.low %v548_v31, %v552_v32  ;;  %v566_v18 = vld [vmem:[#allocation6 + $0x150] sm:$0xff] }
  0xee   : > { %v544_v40 = vld [vmem:[#allocation6 + $0xa0] sm:$0xff]  ;;  %v545_v42 = vld [vmem:[#allocation6 + $0xa8] sm:$0xff]  ;;  %v4440_v44 = vcombine.low %v549_v33, %v553_v34  ;;  %v4469_v17 = vcombine.high %v575_v12, %v579_v13  ;;  %v570_v19 = vld [vmem:[#allocation6 + $0x170] sm:$0xff]  ;;  %v4466_v22 = vcombine.low %v574_v9, %v578_v10  ;;  %v4468_v23 = vcombine.low %v575_v12, %v579_v13 }
  0xef   : > { %v4431_v45 = vcombine.high %v540_v39, %v544_v40  ;;  %v4433_v46 = vcombine.high %v541_v41, %v545_v42  ;;  %v532_v47 = vld [vmem:[#allocation6 + $0x40] sm:$0xff]  ;;  %v533_v49 = vld [vmem:[#allocation6 + $0x48] sm:$0xff]  ;;  %v4430_v51 = vcombine.low %v540_v39, %v544_v40  ;;  %v4432_v52 = vcombine.low %v541_v41, %v545_v42  ;;  %v567_v20 = vld [vmem:[#allocation6 + $0x158] sm:$0xff] }
  0xf0   : > { %955 = vmatpush1.bf16.msra.mxu0 %v4454_v27  ;;  %996 = vmatpush1.bf16.msra.mxu1 %v4456_v28  ;;  %v536_v48 = vld [vmem:[#allocation6 + $0x60] sm:$0xff]  ;;  %v537_v50 = vld [vmem:[#allocation6 + $0x68] sm:$0xff]  ;;  %v571_v21 = vld [vmem:[#allocation6 + $0x178] sm:$0xff]  ;;  %v4459_v24 = vcombine.high %v566_v18, %v570_v19 }
  0xf1   : > { %956 = vmatprep.subr.bf16.mxu0 %v4447_v29  ;;  %997 = vmatprep.subr.bf16.mxu1 %v4449_v30  ;;  %v4423_v53 = vcombine.high %v532_v47, %v536_v48  ;;  %v4425_v54 = vcombine.high %v533_v49, %v537_v50  ;;  %v524_v55 = vld [vmem:[#allocation6] sm:$0xff]  ;;  %v525_v57 = vld [vmem:[#allocation6 + $0x8] sm:$0xff]  ;;  %v4422_v59 = vcombine.low %v532_v47, %v536_v48  ;;  %v558_v26 = vld [vmem:[#allocation6 + $0x110] sm:$0xff] }
  0xf2   : > { %v528_v56 = vld [vmem:[#allocation6 + $0x20] sm:$0xff]  ;;  %v529_v58 = vld [vmem:[#allocation6 + $0x28] sm:$0xff]  ;;  %v4424_v60 = vcombine.low %v533_v49, %v537_v50  ;;  %v4461_v25 = vcombine.high %v567_v20, %v571_v21  ;;  %v562_v27 = vld [vmem:[#allocation6 + $0x130] sm:$0xff]  ;;  %v4458_v30 = vcombine.low %v566_v18, %v570_v19  ;;  %v4460_v31 = vcombine.low %v567_v20, %v571_v21 }
  0xf3   : > { %v4415_v61 = vcombine.high %v524_v55, %v528_v56  ;;  %v4417_v62 = vcombine.high %v525_v57, %v529_v58  ;;  %v4414_v3 = vcombine.low %v524_v55, %v528_v56  ;;  %v4416_v5 = vcombine.low %v525_v57, %v529_v58  ;;  %v559_v28 = vld [vmem:[#allocation6 + $0x118] sm:$0xff]  ;;  %v550_v34 = vld [vmem:[#allocation6 + $0xd0] sm:$0xff] }
  0xf4   : > { %957 = vmatpush1.bf16.msra.mxu0 %v4446_v35  ;;  %998 = vmatpush1.bf16.msra.mxu1 %v4448_v36  ;;  %v563_v29 = vld [vmem:[#allocation6 + $0x138] sm:$0xff]  ;;  %v4451_v32 = vcombine.high %v558_v26, %v562_v27  ;;  %v554_v35 = vld [vmem:[#allocation6 + $0xf0] sm:$0xff] }
  0xf5   : > { %958 = vmatprep.subr.bf16.mxu0 %v4439_v37  ;;  %999 = vmatprep.subr.bf16.mxu1 %v4441_v38  ;;  %v4453_v33 = vcombine.high %v559_v28, %v563_v29  ;;  %v551_v36 = vld [vmem:[#allocation6 + $0xd8] sm:$0xff]  ;;  %v4450_v38 = vcombine.low %v558_v26, %v562_v27  ;;  %v4452_v39 = vcombine.low %v559_v28, %v563_v29  ;;  %v542_v41 = vld [vmem:[#allocation6 + $0x90] sm:$0xff] }
  0xf6   : > { %v555_v37 = vld [vmem:[#allocation6 + $0xf8] sm:$0xff]  ;;  %v4443_v40 = vcombine.high %v550_v34, %v554_v35  ;;  %v546_v42 = vld [vmem:[#allocation6 + $0xb0] sm:$0xff] }
  0xf7   : > { %v4435_v47 = vcombine.high %v542_v41, %v546_v42  ;;  %v534_v49 = vld [vmem:[#allocation6 + $0x50] sm:$0xff] }
  0xf8   : > { %959 = vmatpush1.bf16.msra.mxu0 %v4438_v43  ;;  %1000 = vmatpush1.bf16.msra.mxu1 %v4440_v44  ;;  %v543_v43 = vld [vmem:[#allocation6 + $0x98] sm:$0xff]  ;;  %v538_v50 = vld [vmem:[#allocation6 + $0x70] sm:$0xff] }
  0xf9   : > { %960 = vmatprep.subr.bf16.mxu0 %v4431_v45  ;;  %1001 = vmatprep.subr.bf16.mxu1 %v4433_v46  ;;  %v547_v44 = vld [vmem:[#allocation6 + $0xb8] sm:$0xff]  ;;  %v4442_v45 = vcombine.low %v550_v34, %v554_v35  ;;  %v4444_v46 = vcombine.low %v551_v36, %v555_v37  ;;  %v4427_v55 = vcombine.high %v534_v49, %v538_v50  ;;  %v526_v57 = vld [vmem:[#allocation6 + $0x10] sm:$0xff] }
  0xfa   : > { %v4437_v48 = vcombine.high %v543_v43, %v547_v44  ;;  %v530_v58 = vld [vmem:[#allocation6 + $0x30] sm:$0xff] }
  0xfb   : > { %v4419_v63 = vcombine.high %v526_v57, %v530_v58  ;;  %v4418_v1 = vcombine.low %v526_v57, %v530_v58 }
  0xfc   : > { %961 = vmatpush1.bf16.msra.mxu0 %v4430_v51  ;;  %1002 = vmatpush1.bf16.msra.mxu1 %v4432_v52  ;;  %v535_v51 = vld [vmem:[#allocation6 + $0x58] sm:$0xff] }
  0xfd   : > { %962 = vmatprep.subr.bf16.mxu0 %v4423_v53  ;;  %1003 = vmatprep.subr.bf16.mxu1 %v4425_v54  ;;  %v539_v52 = vld [vmem:[#allocation6 + $0x78] sm:$0xff]  ;;  %v4434_v53 = vcombine.low %v542_v41, %v546_v42  ;;  %v4436_v54 = vcombine.low %v543_v43, %v547_v44 }
  0xfe   : > { %v4429_v56 = vcombine.high %v535_v51, %v539_v52 }
 0x100   : > { %963 = vmatpush1.bf16.msra.mxu0 %v4422_v59  ;;  %1004 = vmatpush1.bf16.msra.mxu1 %v4424_v60  ;;  %v527_v59 = vld [vmem:[#allocation6 + $0x18] sm:$0xff] }
 0x101   : > { %964 = vmatprep.subr.bf16.mxu0 %v4415_v61  ;;  %1005 = vmatprep.subr.bf16.mxu1 %v4417_v62  ;;  %v531_v60 = vld [vmem:[#allocation6 + $0x38] sm:$0xff]  ;;  %v4426_v61 = vcombine.low %v534_v49, %v538_v50  ;;  %v4428_v62 = vcombine.low %v535_v51, %v539_v52 }
 0x102   : > { %v4421_v0 = vcombine.high %v527_v59, %v531_v60  ;;  %v4420_v2 = vcombine.low %v527_v59, %v531_v60 }
 0x104   : > { %965 = vmatpush1.bf16.msra.mxu0 %v4414_v3  ;;  %1006 = vmatpush1.bf16.msra.mxu1 %v4416_v5  ;;  %v4931_v3 = vmov 0.0   ;;  %v591_v5 = vshrl.u32 %v590_v4, 7 }
 0x105   : > { %1032 = vmatprep.subr.bf16.mxu0 %v4475_v6  ;;  %1073 = vmatprep.subr.bf16.mxu1 %v4477_v7  ;;  %1130 = vst [vmem:[#allocation3] sm:$0xff] %v4931_v3  ;;  %1131 = vst [vmem:[#allocation3 + $0x18] sm:$0xff] %v4931_v3  ;;  %v588_v7 = vld [vmem:[#allocation8] sm:$0xff] }
 0x106   : > { %1132 = vst [vmem:[#allocation3 + $0x10] sm:$0xff] %v4931_v3  ;;  %1133 = vst [vmem:[#allocation3 + $0x20] sm:$0xff] %v4931_v3  ;;  %v592_v6 = vsub.s32 0, %v591_v5  ;;  %v600_v9 = vsub.s32 2, %v591_v5  ;;  %v596_v10 = vsub.s32 1, %v591_v5  ;;  %v604_v12 = vsub.s32 3, %v591_v5 }
 0x107   : > { %983 = vmatmul.mubr.bf16.vlgmr.msra.gmra.mxu0 %v5263_v11  ;;  %1024 = vmatmul.mubr.bf16.vlgmr.msra.gmra.mxu1 %v5263_v11  ;;  %1134 = vst [vmem:[#allocation3 + $0x28] sm:$0xff] %v4931_v3  ;;  %1135 = vst [vmem:[#allocation3 + $0x8] sm:$0xff] %v4931_v3  ;;  %v612_v34 = vsub.s32 5, %v591_v5  ;;  %v620_v35 = vsub.s32 7, %v591_v5 }
 0x108   : > { %1033 = vmatpush1.bf16.msra.mxu0 %v4474_v14  ;;  %1074 = vmatpush1.bf16.msra.mxu1 %v4476_v15  ;;  %1136 = vst [vmem:[#allocation3 + $0x30] sm:$0xff] %v4931_v3  ;;  %1137 = vst [vmem:[#allocation3 + $0x38] sm:$0xff] %v4931_v3  ;;  %v593_v13 = vrot.slane %v588_v7, %v592_v6  ;;  %v601_v14 = vrot.slane %v588_v7, %v600_v9 }
 0x109   : > { %1034 = vmatprep.subr.bf16.mxu0 %v4467_v16  ;;  %1075 = vmatprep.subr.bf16.mxu1 %v4469_v17  ;;  %v597_v15 = vrot.slane %v588_v7, %v596_v10  ;;  %v605_v16 = vrot.slane %v588_v7, %v604_v12 }
 0x10a   : > { %1064 = vmatprep.mubr.bf16.mxu0 %v4930_v8  ;;  %1105 = vmatprep.mubr.bf16.mxu1 %v4930_v8  ;;  %v4445_v8 = vcombine.high %v551_v36, %v555_v37 }
 0x10c   : > { %1035 = vmatpush1.bf16.msra.mxu0 %v4466_v22  ;;  %1076 = vmatpush1.bf16.msra.mxu1 %v4468_v23 }
 0x10d   : > { %1036 = vmatprep.subr.bf16.mxu0 %v4459_v24  ;;  %1077 = vmatprep.subr.bf16.mxu1 %v4461_v25 }
 0x110   : > { %1037 = vmatpush1.bf16.msra.mxu0 %v4458_v30  ;;  %1078 = vmatpush1.bf16.msra.mxu1 %v4460_v31 }
 0x111   : > { %1038 = vmatprep.subr.bf16.mxu0 %v4451_v32  ;;  %1079 = vmatprep.subr.bf16.mxu1 %v4453_v33  ;;  %v608_v32 = vsub.s32 4, %v591_v5  ;;  %v616_v33 = vsub.s32 6, %v591_v5 }
 0x113   : > { %v609_v36 = vrot.slane %v588_v7, %v608_v32  ;;  %v617_v37 = vrot.slane %v588_v7, %v616_v33 }
 0x114   : > { %1039 = vmatpush1.bf16.msra.mxu0 %v4450_v38  ;;  %1080 = vmatpush1.bf16.msra.mxu1 %v4452_v39  ;;  %v613_v38 = vrot.slane %v588_v7, %v612_v34 }
 0x115   : > { %1040 = vmatprep.subr.bf16.mxu0 %v4443_v40  ;;  %1081 = vmatprep.subr.bf16.mxu1 %v4445_v8  ;;  %v621_v40 = vrot.slane %v588_v7, %v620_v35 }
 0x118   : > { %1041 = vmatpush1.bf16.msra.mxu0 %v4442_v45  ;;  %1082 = vmatpush1.bf16.msra.mxu1 %v4444_v46 }
 0x119   : > { %1042 = vmatprep.subr.bf16.mxu0 %v4435_v47  ;;  %1083 = vmatprep.subr.bf16.mxu1 %v4437_v48 }
 0x11c   : > { %1043 = vmatpush1.bf16.msra.mxu0 %v4434_v53  ;;  %1084 = vmatpush1.bf16.msra.mxu1 %v4436_v54 }
 0x11d   : > { %1044 = vmatprep.subr.bf16.mxu0 %v4427_v55  ;;  %1085 = vmatprep.subr.bf16.mxu1 %v4429_v56 }
 0x120   : > { %1045 = vmatpush1.bf16.msra.mxu0 %v4426_v61  ;;  %1086 = vmatpush1.bf16.msra.mxu1 %v4428_v62 }
 0x121   : > { %1046 = vmatprep.subr.bf16.mxu0 %v4419_v63  ;;  %1087 = vmatprep.subr.bf16.mxu1 %v4421_v0 }
 0x124   : > { %1047 = vmatpush1.bf16.msra.mxu0 %v4418_v1  ;;  %1088 = vmatpush1.bf16.msra.mxu1 %v4420_v2 }
 0x127   : > { %1065 = vmatmul.mubr.bf16.vlgmr.msra.gmra.mxu0 %v5263_v11  ;;  %1106 = vmatmul.mubr.bf16.vlgmr.msra.gmra.mxu1 %v5263_v11 }
 0x1c7   : > { %v984_v11 = vpop.f32.mrf.mxu0  ;;  %v1025_v18 = vpop.f32.mrf.mxu1 }
 0x1c8   : > { %v985_v17 = vadd.f32 %v984_v11, %v593_v13  ;;  %v1026_v19 = vadd.f32 %v1025_v18, %v601_v14 }
 0x1c9   : > { %v986_v20 = vpop.f32.mrf.mxu0  ;;  %v1027_v23 = vpop.f32.mrf.mxu1 }
 0x1ca   : > { %v1114_v21 = vmax.f32 %v985_v17, 0.0  ;;  %v987_v22 = vadd.f32 %v986_v20, %v597_v15  ;;  %v1116_v24 = vmax.f32 %v1026_v19, 0.0  ;;  %v1028_v25 = vadd.f32 %v1027_v23, %v605_v16 }
 0x1cb   : > { %v988_v26 = vpop.f32.mrf.mxu0  ;;  %v1029_v28 = vpop.f32.mrf.mxu1 }
 0x1cc   : > { %1122 = vst [vmem:[#allocation2 + $0x30] sm:$0xff] %v1114_v21  ;;  %v1115_v27 = vmax.f32 %v987_v22, 0.0  ;;  %1124 = vst [vmem:[#allocation2 + $0x18] sm:$0xff] %v1116_v24  ;;  %v1117_v29 = vmax.f32 %v1028_v25, 0.0 }
 0x1cd   : > { %v989_v30 = vpop.f32.mrf.mxu0  ;;  %v1030_v31 = vpop.f32.mrf.mxu1 }
 0x1ce   : > { %1123 = vst [vmem:[#allocation2] sm:$0xff] %v1115_v27  ;;  %1125 = vst [vmem:[#allocation2 + $0x10] sm:$0xff] %v1117_v29 }
 0x1e7   : > { %v1066_v39 = vpop.f32.mrf.mxu0  ;;  %v1107_v41 = vpop.f32.mrf.mxu1 }
 0x1e8   : > { %v1067_v8 = vadd.f32 %v1066_v39, %v609_v36  ;;  %v1108_v42 = vadd.f32 %v1107_v41, %v617_v37 }
 0x1e9   : > { %v1068_v43 = vpop.f32.mrf.mxu0  ;;  %v1109_v46 = vpop.f32.mrf.mxu1 }
 0x1ea   : > { %v1118_v44 = vmax.f32 %v1067_v8, 0.0  ;;  %v1069_v45 = vadd.f32 %v1068_v43, %v613_v38  ;;  %v1120_v47 = vmax.f32 %v1108_v42, 0.0  ;;  %v1110_v48 = vadd.f32 %v1109_v46, %v621_v40 }
 0x1eb   : > { %v1070_v49 = vpop.f32.mrf.mxu0  ;;  %v1111_v51 = vpop.f32.mrf.mxu1 }
 0x1ec   : > { %1126 = vst [vmem:[#allocation2 + $0x8] sm:$0xff] %v1118_v44  ;;  %v1119_v50 = vmax.f32 %v1069_v45, 0.0  ;;  %1128 = vst [vmem:[#allocation2 + $0x28] sm:$0xff] %v1120_v47  ;;  %v1121_v52 = vmax.f32 %v1110_v48, 0.0 }
 0x1ed   : > { %v1071_v53 = vpop.f32.mrf.mxu0  ;;  %v1112_v54 = vpop.f32.mrf.mxu1 }
 0x1ee   : > { %1127 = vst [vmem:[#allocation2 + $0x20] sm:$0xff] %v1119_v50  ;;  %1129 = vst [vmem:[#allocation2 + $0x38] sm:$0xff] %v1121_v52 }
 0x1ef PF: > { %v1163_v55 = vld [vmem:[%s5239_s27 + $0xc8] sm:$0xff]  ;;  %v1162_v57 = vld [vmem:[%s5239_s27 + $0xc0] sm:$0xff]  ;;  %v5281_v16 = vld [vmem:[#allocation2] sm:$0xff]  ;;  %p4478_p4 = scmp.ne.s32.totalorder %s5003_s15, 3 }
 0x1f0   : > { %v1227_v56 = vld [vmem:[%s5239_s27 + $0x2c8] sm:$0xff]  ;;  %v1443_v58 = vunpack.c.l.s8.bf16 %v1163_v55  ;;  %v1451_v59 = vunpack.c.h.s8.bf16 %v1163_v55  ;;  %v1226_v62 = vld [vmem:[%s5239_s27 + $0x2c0] sm:$0xff]  ;;  %v1450_v63 = vunpack.c.h.s8.bf16 %v1162_v57  ;;  %v1442_v3 = vunpack.c.l.s8.bf16 %v1162_v57  ;;  %1946 = vmatprep.mubr.f32.mxu0 %v5281_v16  ;;  %s6166_s22 = sld [smem:[#allocation31_spill]] (!%p4478_p4) }
 0x1f1   : > { %v1571_v60 = vunpack.c.l.s8.bf16 %v1227_v56  ;;  %v1579_v61 = vunpack.c.h.s8.bf16 %v1227_v56  ;;  %v1578_v0 = vunpack.c.h.s8.bf16 %v1226_v62  ;;  %v1155_v1 = vld [vmem:[%s5239_s27 + $0x88] sm:$0xff]  ;;  %v1570_v4 = vunpack.c.l.s8.bf16 %v1226_v62  ;;  %v1154_v7 = vld [vmem:[%s5239_s27 + $0x80] sm:$0xff] }
 0x1f2   : > { %v1219_v2 = vld [vmem:[%s5239_s27 + $0x288] sm:$0xff]  ;;  %1914 = vmatprep.subr.bf16.mxu0 %v1451_v59  ;;  %v1435_v5 = vunpack.c.h.s8.bf16 %v1155_v1  ;;  %v1218_v9 = vld [vmem:[%s5239_s27 + $0x280] sm:$0xff]  ;;  %v1434_v10 = vunpack.c.h.s8.bf16 %v1154_v7  ;;  %v1427_v13 = vunpack.c.l.s8.bf16 %v1155_v1  ;;  %v1426_v18 = vunpack.c.l.s8.bf16 %v1154_v7 }
 0x1f3   : > { %1953 = vmatprep.subr.bf16.mxu1 %v1579_v61  ;;  %1915 = vmatpush1.bf16.msra.mxu0 %v1450_v63  ;;  %v1563_v6 = vunpack.c.h.s8.bf16 %v1219_v2  ;;  %v1562_v12 = vunpack.c.h.s8.bf16 %v1218_v9  ;;  %v1555_v14 = vunpack.c.l.s8.bf16 %v1219_v2  ;;  %v1147_v15 = vld [vmem:[%s5239_s27 + $0x48] sm:$0xff]  ;;  %v5284_v17 = vld [vmem:[#allocation2 + $0x10] sm:$0xff]  ;;  %v1554_v19 = vunpack.c.l.s8.bf16 %v1218_v9 }
 0x1f4   : > { %1954 = vmatpush1.bf16.msra.mxu1 %v1578_v0  ;;  %1916 = vmatprep.subr.bf16.mxu0 %v1443_v58  ;;  %v1211_v11 = vld [vmem:[%s5239_s27 + $0x248] sm:$0xff]  ;;  %v1419_v20 = vunpack.c.h.s8.bf16 %v1147_v15  ;;  %v1146_v22 = vld [vmem:[%s5239_s27 + $0x40] sm:$0xff]  ;;  %v1411_v26 = vunpack.c.l.s8.bf16 %v1147_v15 }
 0x1f5   : > { %1955 = vmatprep.subr.bf16.mxu1 %v1571_v60  ;;  %v1547_v21 = vunpack.c.h.s8.bf16 %v1211_v11  ;;  %v1210_v23 = vld [vmem:[%s5239_s27 + $0x240] sm:$0xff]  ;;  %1985 = vmatprep.mubr.f32.mxu1 %v5284_v17  ;;  %v1418_v24 = vunpack.c.h.s8.bf16 %v1146_v22  ;;  %v1539_v27 = vunpack.c.l.s8.bf16 %v1211_v11  ;;  %v1139_v28 = vld [vmem:[%s5239_s27 + $0x8] sm:$0xff]  ;;  %v1410_v30 = vunpack.c.l.s8.bf16 %v1146_v22 }
 0x1f6   : > { %v1546_v25 = vunpack.c.h.s8.bf16 %v1210_v23  ;;  %v1203_v29 = vld [vmem:[%s5239_s27 + $0x208] sm:$0xff]  ;;  %v1538_v31 = vunpack.c.l.s8.bf16 %v1210_v23  ;;  %v1403_v32 = vunpack.c.h.s8.bf16 %v1139_v28  ;;  %v1138_v34 = vld [vmem:[%s5239_s27] sm:$0xff]  ;;  %v1395_v38 = vunpack.c.l.s8.bf16 %v1139_v28 }
 0x1f7   : > { %1917 = vmatpush1.bf16.msra.mxu0 %v1442_v3  ;;  %v1531_v33 = vunpack.c.h.s8.bf16 %v1203_v29  ;;  %v1202_v35 = vld [vmem:[%s5239_s27 + $0x200] sm:$0xff]  ;;  %v1402_v36 = vunpack.c.h.s8.bf16 %v1138_v34  ;;  %v1523_v39 = vunpack.c.l.s8.bf16 %v1203_v29  ;;  %v1195_v40 = vld [vmem:[%s5239_s27 + $0x1c8] sm:$0xff]  ;;  %v1394_v41 = vunpack.c.l.s8.bf16 %v1138_v34 }
 0x1f8   : > { %1956 = vmatpush1.bf16.msra.mxu1 %v1570_v4  ;;  %1918 = vmatprep.subr.bf16.mxu0 %v1435_v5  ;;  %v1530_v37 = vunpack.c.h.s8.bf16 %v1202_v35  ;;  %v1259_v8 = vld [vmem:[%s5239_s27 + $0x3c8] sm:$0xff]  ;;  %v1522_v42 = vunpack.c.l.s8.bf16 %v1202_v35  ;;  %v1515_v43 = vunpack.c.h.s8.bf16 %v1195_v40  ;;  %v1194_v45 = vld [vmem:[%s5239_s27 + $0x1c0] sm:$0xff]  ;;  %v1507_v49 = vunpack.c.l.s8.bf16 %v1195_v40 }
 0x1f9   : > { %1957 = vmatprep.subr.bf16.mxu1 %v1563_v6  ;;  %v1643_v44 = vunpack.c.h.s8.bf16 %v1259_v8  ;;  %v1258_v46 = vld [vmem:[%s5239_s27 + $0x3c0] sm:$0xff]  ;;  %v1514_v47 = vunpack.c.h.s8.bf16 %v1194_v45  ;;  %v1635_v50 = vunpack.c.l.s8.bf16 %v1259_v8  ;;  %v1187_v51 = vld [vmem:[%s5239_s27 + $0x188] sm:$0xff]  ;;  %v1506_v53 = vunpack.c.l.s8.bf16 %v1194_v45 }
 0x1fa   : > { %v1642_v48 = vunpack.c.h.s8.bf16 %v1258_v46  ;;  %v1251_v52 = vld [vmem:[%s5239_s27 + $0x388] sm:$0xff]  ;;  %v1634_v54 = vunpack.c.l.s8.bf16 %v1258_v46  ;;  %v1499_v55 = vunpack.c.h.s8.bf16 %v1187_v51  ;;  %v1186_v57 = vld [vmem:[%s5239_s27 + $0x180] sm:$0xff]  ;;  %v1491_v61 = vunpack.c.l.s8.bf16 %v1187_v51 }
 0x1fb   : > { %1919 = vmatpush1.bf16.msra.mxu0 %v1434_v10  ;;  %v1627_v56 = vunpack.c.h.s8.bf16 %v1251_v52  ;;  %v1250_v58 = vld [vmem:[%s5239_s27 + $0x380] sm:$0xff]  ;;  %v1498_v59 = vunpack.c.h.s8.bf16 %v1186_v57  ;;  %v1619_v62 = vunpack.c.l.s8.bf16 %v1251_v52  ;;  %v1179_v63 = vld [vmem:[%s5239_s27 + $0x148] sm:$0xff]  ;;  %v1490_v1 = vunpack.c.l.s8.bf16 %v1186_v57 }
 0x1fc   : > { %1958 = vmatpush1.bf16.msra.mxu1 %v1562_v12  ;;  %1920 = vmatprep.subr.bf16.mxu0 %v1427_v13  ;;  %v1626_v60 = vunpack.c.h.s8.bf16 %v1250_v58  ;;  %v1243_v0 = vld [vmem:[%s5239_s27 + $0x348] sm:$0xff]  ;;  %v1618_v2 = vunpack.c.l.s8.bf16 %v1250_v58  ;;  %v1483_v3 = vunpack.c.h.s8.bf16 %v1179_v63  ;;  %v1178_v5 = vld [vmem:[%s5239_s27 + $0x140] sm:$0xff]  ;;  %v1475_v10 = vunpack.c.l.s8.bf16 %v1179_v63 }
 0x1fd   : > { %1959 = vmatprep.subr.bf16.mxu1 %v1555_v14  ;;  %v1611_v4 = vunpack.c.h.s8.bf16 %v1243_v0  ;;  %v1242_v6 = vld [vmem:[%s5239_s27 + $0x340] sm:$0xff]  ;;  %v1482_v7 = vunpack.c.h.s8.bf16 %v1178_v5  ;;  %v1603_v12 = vunpack.c.l.s8.bf16 %v1243_v0  ;;  %v1171_v13 = vld [vmem:[%s5239_s27 + $0x108] sm:$0xff]  ;;  %v1474_v15 = vunpack.c.l.s8.bf16 %v1178_v5 }
 0x1fe   : > { %v1610_v9 = vunpack.c.h.s8.bf16 %v1242_v6  ;;  %v1235_v14 = vld [vmem:[%s5239_s27 + $0x308] sm:$0xff]  ;;  %v1602_v11 = vunpack.c.l.s8.bf16 %v1242_v6  ;;  %v5313_v34 = vld [vmem:[#allocation2 + $0x30] sm:$0xff] }
 0x1ff   : > { %1921 = vmatpush1.bf16.msra.mxu0 %v1426_v18  ;;  %v1467_v18 = vunpack.c.h.s8.bf16 %v1171_v13  ;;  %v5315_v35 = vld [vmem:[#allocation2 + $0x18] sm:$0xff] }
 0x200   : > { %1960 = vmatpush1.bf16.msra.mxu1 %v1554_v19  ;;  %1922 = vmatprep.subr.bf16.mxu0 %v1419_v20  ;;  %v1595_v19 = vunpack.c.h.s8.bf16 %v1235_v14  ;;  %v1170_v20 = vld [vmem:[%s5239_s27 + $0x100] sm:$0xff]  ;;  %v1283_v40 = vld [vmem:[%s5239_s27 + $0x488] sm:$0xff] }
 0x201   : > { %1961 = vmatprep.subr.bf16.mxu1 %v1547_v21  ;;  %v1234_v21 = vld [vmem:[%s5239_s27 + $0x300] sm:$0xff]  ;;  %v1466_v22 = vunpack.c.h.s8.bf16 %v1170_v20  ;;  %v1458_v28 = vunpack.c.l.s8.bf16 %v1170_v20  ;;  %v1347_v8 = vld [vmem:[%s5239_s27 + $0x688] sm:$0xff]  ;;  %v1691_v45 = vunpack.c.h.s8.bf16 %v1283_v40  ;;  %v1683_v51 = vunpack.c.l.s8.bf16 %v1283_v40 }
 0x202   : > { %v1594_v23 = vunpack.c.h.s8.bf16 %v1234_v21  ;;  %v1586_v29 = vunpack.c.l.s8.bf16 %v1234_v21  ;;  %v1819_v46 = vunpack.c.h.s8.bf16 %v1347_v8  ;;  %v1811_v52 = vunpack.c.l.s8.bf16 %v1347_v8 }
 0x203   : > { %1923 = vmatpush1.bf16.msra.mxu0 %v1418_v24  ;;  %v1459_v24 = vunpack.c.l.s8.bf16 %v1171_v13 }
 0x204   : > { %1962 = vmatpush1.bf16.msra.mxu1 %v1546_v25  ;;  %1924 = vmatprep.subr.bf16.mxu0 %v1411_v26  ;;  %v1587_v25 = vunpack.c.l.s8.bf16 %v1235_v14  ;;  %v1291_v26 = vld [vmem:[%s5239_s27 + $0x4c8] sm:$0xff] }
 0x205   : > { %1963 = vmatprep.subr.bf16.mxu1 %v1539_v27  ;;  %v1355_v27 = vld [vmem:[%s5239_s27 + $0x6c8] sm:$0xff] }
 0x207   : > { %1925 = vmatpush1.bf16.msra.mxu0 %v1410_v30  ;;  %v1707_v30 = vunpack.c.h.s8.bf16 %v1291_v26 }
 0x208   : > { %1964 = vmatpush1.bf16.msra.mxu1 %v1538_v31  ;;  %1926 = vmatprep.subr.bf16.mxu0 %v1403_v32  ;;  %v1835_v31 = vunpack.c.h.s8.bf16 %v1355_v27  ;;  %v1290_v32 = vld [vmem:[%s5239_s27 + $0x4c0] sm:$0xff] }
 0x209   : > { %1965 = vmatprep.subr.bf16.mxu1 %v1531_v33  ;;  %v1354_v33 = vld [vmem:[%s5239_s27 + $0x6c0] sm:$0xff] }
 0x20b   : > { %1927 = vmatpush1.bf16.msra.mxu0 %v1402_v36  ;;  %v1706_v36 = vunpack.c.h.s8.bf16 %v1290_v32 }
 0x20c   : > { %1966 = vmatpush1.bf16.msra.mxu1 %v1530_v37  ;;  %1928 = vmatprep.subr.bf16.mxu0 %v1395_v38  ;;  %v1834_v37 = vunpack.c.h.s8.bf16 %v1354_v33  ;;  %v1699_v38 = vunpack.c.l.s8.bf16 %v1291_v26 }
 0x20d   : > { %1967 = vmatprep.subr.bf16.mxu1 %v1523_v39  ;;  %v1827_v39 = vunpack.c.l.s8.bf16 %v1355_v27 }
 0x20f   : > { %1929 = vmatpush1.bf16.msra.mxu0 %v1394_v41  ;;  %v5321_v41 = vld [vmem:[#allocation2 + $0x20] sm:$0xff] }
 0x210   : > { %1968 = vmatpush1.bf16.msra.mxu1 %v1522_v42  ;;  %1930 = vmatprep.subr.bf16.mxu0 %v1515_v43  ;;  %v5323_v42 = vld [vmem:[#allocation2 + $0x38] sm:$0xff]  ;;  %v1698_v43 = vunpack.c.l.s8.bf16 %v1290_v32 }
 0x211   : > { %1969 = vmatprep.subr.bf16.mxu1 %v1643_v44  ;;  %v1826_v44 = vunpack.c.l.s8.bf16 %v1354_v33 }
 0x213   : > { %1931 = vmatpush2.bf16.msra.mxu0 %v1514_v47  ;;  %v1282_v47 = vld [vmem:[%s5239_s27 + $0x480] sm:$0xff] }
 0x214   : > { %1970 = vmatpush2.bf16.msra.mxu1 %v1642_v48  ;;  %1932 = vmatprep.subr.bf16.mxu0 %v1507_v49  ;;  %v1346_v48 = vld [vmem:[%s5239_s27 + $0x680] sm:$0xff]  ;;  %v1690_v49 = vunpack.c.h.s8.bf16 %v1282_v47 }
 0x215   : > { %1971 = vmatprep.subr.bf16.mxu1 %v1635_v50  ;;  %v1818_v50 = vunpack.c.h.s8.bf16 %v1346_v48 }
 0x217   : > { %1933 = vmatpush2.bf16.msra.mxu0 %v1506_v53  ;;  %v1275_v53 = vld [vmem:[%s5239_s27 + $0x448] sm:$0xff] }
 0x218   : > { %1972 = vmatpush2.bf16.msra.mxu1 %v1634_v54  ;;  %1934 = vmatprep.subr.bf16.mxu0 %v1499_v55  ;;  %v1339_v54 = vld [vmem:[%s5239_s27 + $0x648] sm:$0xff]  ;;  %v1682_v55 = vunpack.c.l.s8.bf16 %v1282_v47  ;;  %v1675_v57 = vunpack.c.h.s8.bf16 %v1275_v53  ;;  %v1667_v63 = vunpack.c.l.s8.bf16 %v1275_v53 }
 0x219   : > { %1973 = vmatprep.subr.bf16.mxu1 %v1627_v56  ;;  %v1810_v56 = vunpack.c.l.s8.bf16 %v1346_v48  ;;  %v1803_v58 = vunpack.c.h.s8.bf16 %v1339_v54  ;;  %v1795_v0 = vunpack.c.l.s8.bf16 %v1339_v54 }
 0x21b   : > { %1935 = vmatpush2.bf16.msra.mxu0 %v1498_v59  ;;  %v1274_v59 = vld [vmem:[%s5239_s27 + $0x440] sm:$0xff] }
 0x21c   : > { %1974 = vmatpush2.bf16.msra.mxu1 %v1626_v60  ;;  %1936 = vmatprep.subr.bf16.mxu0 %v1491_v61  ;;  %v1338_v60 = vld [vmem:[%s5239_s27 + $0x640] sm:$0xff]  ;;  %v1674_v61 = vunpack.c.h.s8.bf16 %v1274_v59 }
 0x21d   : > { %1975 = vmatprep.subr.bf16.mxu1 %v1619_v62  ;;  %v1802_v62 = vunpack.c.h.s8.bf16 %v1338_v60 }
 0x21f   : > { %1937 = vmatpush2.bf16.msra.mxu0 %v1490_v1  ;;  %v1267_v1 = vld [vmem:[%s5239_s27 + $0x408] sm:$0xff] }
 0x220   : > { %1976 = vmatpush2.bf16.msra.mxu1 %v1618_v2  ;;  %1938 = vmatprep.subr.bf16.mxu0 %v1483_v3  ;;  %v1331_v2 = vld [vmem:[%s5239_s27 + $0x608] sm:$0xff]  ;;  %v1666_v3 = vunpack.c.l.s8.bf16 %v1274_v59  ;;  %v1659_v5 = vunpack.c.h.s8.bf16 %v1267_v1  ;;  %v1651_v13 = vunpack.c.l.s8.bf16 %v1267_v1 }
 0x221   : > { %1977 = vmatprep.subr.bf16.mxu1 %v1611_v4  ;;  %v1794_v4 = vunpack.c.l.s8.bf16 %v1338_v60  ;;  %v1787_v6 = vunpack.c.h.s8.bf16 %v1331_v2  ;;  %v1779_v14 = vunpack.c.l.s8.bf16 %v1331_v2 }
 0x223   : > { %1939 = vmatpush2.bf16.msra.mxu0 %v1482_v7  ;;  %v1266_v7 = vld [vmem:[%s5239_s27 + $0x400] sm:$0xff] }
 0x224   : > { %1978 = vmatpush2.bf16.msra.mxu1 %v1610_v9  ;;  %1940 = vmatprep.subr.bf16.mxu0 %v1475_v10  ;;  %v1330_v9 = vld [vmem:[%s5239_s27 + $0x600] sm:$0xff]  ;;  %v1658_v10 = vunpack.c.h.s8.bf16 %v1266_v7 }
 0x225   : > { %1979 = vmatprep.subr.bf16.mxu1 %v1603_v12  ;;  %v1786_v12 = vunpack.c.h.s8.bf16 %v1330_v9 }
 0x227   : > { %1941 = vmatpush2.bf16.msra.mxu0 %v1474_v15  ;;  %v1323_v15 = vld [vmem:[%s5239_s27 + $0x5c8] sm:$0xff] }
 0x228   : > { %1980 = vmatpush2.bf16.msra.mxu1 %v1602_v11  ;;  %1942 = vmatprep.subr.bf16.mxu0 %v1467_v18  ;;  %v1387_v11 = vld [vmem:[%s5239_s27 + $0x7c8] sm:$0xff]  ;;  %v1650_v18 = vunpack.c.l.s8.bf16 %v1266_v7  ;;  %v1771_v20 = vunpack.c.h.s8.bf16 %v1323_v15  ;;  %v1763_v26 = vunpack.c.l.s8.bf16 %v1323_v15 }
 0x229   : > { %1981 = vmatprep.subr.bf16.mxu1 %v1595_v19  ;;  %v1778_v19 = vunpack.c.l.s8.bf16 %v1330_v9  ;;  %v1899_v21 = vunpack.c.h.s8.bf16 %v1387_v11  ;;  %v1891_v27 = vunpack.c.l.s8.bf16 %v1387_v11 }
 0x22b   : > { %1943 = vmatpush2.bf16.msra.mxu0 %v1466_v22  ;;  %v1322_v22 = vld [vmem:[%s5239_s27 + $0x5c0] sm:$0xff] }
 0x22c   : > { %1982 = vmatpush2.bf16.msra.mxu1 %v1594_v23  ;;  %1944 = vmatprep.subr.bf16.mxu0 %v1459_v24  ;;  %v1386_v23 = vld [vmem:[%s5239_s27 + $0x7c0] sm:$0xff]  ;;  %v1770_v24 = vunpack.c.h.s8.bf16 %v1322_v22 }
 0x22d   : > { %1983 = vmatprep.subr.bf16.mxu1 %v1587_v25  ;;  %v1898_v25 = vunpack.c.h.s8.bf16 %v1386_v23 }
 0x22f   : > { %1945 = vmatpush2.bf16.msra.mxu0 %v1458_v28  ;;  %v1315_v28 = vld [vmem:[%s5239_s27 + $0x588] sm:$0xff] }
 0x230   : > { %1984 = vmatpush2.bf16.msra.mxu1 %v1586_v29  ;;  %1992 = vmatprep.subr.bf16.mxu0 %v1707_v30  ;;  %v1379_v29 = vld [vmem:[%s5239_s27 + $0x788] sm:$0xff]  ;;  %v1762_v30 = vunpack.c.l.s8.bf16 %v1322_v22  ;;  %v1755_v32 = vunpack.c.h.s8.bf16 %v1315_v28  ;;  %v1747_v40 = vunpack.c.l.s8.bf16 %v1315_v28 }
 0x231   : > { %2031 = vmatprep.subr.bf16.mxu1 %v1835_v31  ;;  %v1890_v31 = vunpack.c.l.s8.bf16 %v1386_v23  ;;  %v1883_v33 = vunpack.c.h.s8.bf16 %v1379_v29  ;;  %v1875_v8 = vunpack.c.l.s8.bf16 %v1379_v29 }
 0x232   : > { %1947 = vmatmul.mubr.f32.vlgmr.msra.gmra.mxu0 %v5313_v34 }
 0x233   : > { %1986 = vmatmul.mubr.f32.vlgmr.msra.gmra.mxu1 %v5315_v35  ;;  %1993 = vmatpush1.bf16.msra.mxu0 %v1706_v36  ;;  %v1314_v36 = vld [vmem:[%s5239_s27 + $0x580] sm:$0xff] }
 0x234   : > { %2032 = vmatpush1.bf16.msra.mxu1 %v1834_v37  ;;  %1994 = vmatprep.subr.bf16.mxu0 %v1699_v38  ;;  %v1378_v37 = vld [vmem:[%s5239_s27 + $0x780] sm:$0xff]  ;;  %v1754_v38 = vunpack.c.h.s8.bf16 %v1314_v36 }
 0x235   : > { %2033 = vmatprep.subr.bf16.mxu1 %v1827_v39  ;;  %2024 = vmatprep.mubr.f32.mxu0 %v5321_v41  ;;  %v1882_v39 = vunpack.c.h.s8.bf16 %v1378_v37 }
 0x236   : > { %2063 = vmatprep.mubr.f32.mxu1 %v5323_v42 }
 0x237   : > { %1995 = vmatpush1.bf16.msra.mxu0 %v1698_v43  ;;  %v1307_v43 = vld [vmem:[%s5239_s27 + $0x548] sm:$0xff] }
 0x238   : > { %2034 = vmatpush1.bf16.msra.mxu1 %v1826_v44  ;;  %1996 = vmatprep.subr.bf16.mxu0 %v1691_v45  ;;  %v1371_v44 = vld [vmem:[%s5239_s27 + $0x748] sm:$0xff]  ;;  %v1746_v45 = vunpack.c.l.s8.bf16 %v1314_v36  ;;  %v1739_v47 = vunpack.c.h.s8.bf16 %v1307_v43  ;;  %v1731_v53 = vunpack.c.l.s8.bf16 %v1307_v43 }
 0x239   : > { %2035 = vmatprep.subr.bf16.mxu1 %v1819_v46  ;;  %v1874_v46 = vunpack.c.l.s8.bf16 %v1378_v37  ;;  %v1867_v48 = vunpack.c.h.s8.bf16 %v1371_v44  ;;  %v1859_v54 = vunpack.c.l.s8.bf16 %v1371_v44 }
 0x23b   : > { %1997 = vmatpush1.bf16.msra.mxu0 %v1690_v49  ;;  %v1306_v49 = vld [vmem:[%s5239_s27 + $0x540] sm:$0xff] }
 0x23c   : > { %2036 = vmatpush1.bf16.msra.mxu1 %v1818_v50  ;;  %1998 = vmatprep.subr.bf16.mxu0 %v1683_v51  ;;  %v1370_v50 = vld [vmem:[%s5239_s27 + $0x740] sm:$0xff]  ;;  %v1738_v51 = vunpack.c.h.s8.bf16 %v1306_v49 }
 0x23d   : > { %2037 = vmatprep.subr.bf16.mxu1 %v1811_v52  ;;  %v1866_v52 = vunpack.c.h.s8.bf16 %v1370_v50 }
 0x23f   : > { %1999 = vmatpush1.bf16.msra.mxu0 %v1682_v55  ;;  %v1299_v55 = vld [vmem:[%s5239_s27 + $0x508] sm:$0xff] }
 0x240   : > { %2038 = vmatpush1.bf16.msra.mxu1 %v1810_v56  ;;  %2000 = vmatprep.subr.bf16.mxu0 %v1675_v57  ;;  %v1363_v56 = vld [vmem:[%s5239_s27 + $0x708] sm:$0xff]  ;;  %v1730_v57 = vunpack.c.l.s8.bf16 %v1306_v49  ;;  %v1723_v59 = vunpack.c.h.s8.bf16 %v1299_v55  ;;  %v1715_v1 = vunpack.c.l.s8.bf16 %v1299_v55 }
 0x241   : > { %2039 = vmatprep.subr.bf16.mxu1 %v1803_v58  ;;  %v1858_v58 = vunpack.c.l.s8.bf16 %v1370_v50  ;;  %v1851_v60 = vunpack.c.h.s8.bf16 %v1363_v56  ;;  %v1843_v2 = vunpack.c.l.s8.bf16 %v1363_v56 }
 0x243   : > { %2001 = vmatpush1.bf16.msra.mxu0 %v1674_v61  ;;  %v1298_v61 = vld [vmem:[%s5239_s27 + $0x500] sm:$0xff] }
 0x244   : > { %2040 = vmatpush1.bf16.msra.mxu1 %v1802_v62  ;;  %2002 = vmatprep.subr.bf16.mxu0 %v1667_v63  ;;  %v1362_v62 = vld [vmem:[%s5239_s27 + $0x700] sm:$0xff]  ;;  %v1722_v63 = vunpack.c.h.s8.bf16 %v1298_v61 }
 0x245   : > { %2041 = vmatprep.subr.bf16.mxu1 %v1795_v0  ;;  %v1850_v0 = vunpack.c.h.s8.bf16 %v1362_v62 }
 0x247   : > { %2003 = vmatpush1.bf16.msra.mxu0 %v1666_v3  ;;  %v1165_v3 = vld [vmem:[%s5239_s27 + $0xd8] sm:$0xff] }
 0x248   : > { %2042 = vmatpush1.bf16.msra.mxu1 %v1794_v4  ;;  %2004 = vmatprep.subr.bf16.mxu0 %v1659_v5  ;;  %v1229_v4 = vld [vmem:[%s5239_s27 + $0x2d8] sm:$0xff]  ;;  %v1714_v5 = vunpack.c.l.s8.bf16 %v1298_v61  ;;  %v1453_v7 = vunpack.c.h.s8.bf16 %v1165_v3 }
 0x249   : > { %2043 = vmatprep.subr.bf16.mxu1 %v1787_v6  ;;  %v1842_v6 = vunpack.c.l.s8.bf16 %v1362_v62  ;;  %v1581_v9 = vunpack.c.h.s8.bf16 %v1229_v4 }
 0x24b   : > { %2005 = vmatpush1.bf16.msra.mxu0 %v1658_v10  ;;  %v1164_v10 = vld [vmem:[%s5239_s27 + $0xd0] sm:$0xff] }
 0x24c   : > { %2044 = vmatpush1.bf16.msra.mxu1 %v1786_v12  ;;  %2006 = vmatprep.subr.bf16.mxu0 %v1651_v13  ;;  %v1228_v12 = vld [vmem:[%s5239_s27 + $0x2d0] sm:$0xff]  ;;  %v5357_v13 = vld [vmem:[#allocation2 + $0x8] sm:$0xff]  ;;  %v1452_v15 = vunpack.c.h.s8.bf16 %v1164_v10  ;;  %v1444_v22 = vunpack.c.l.s8.bf16 %v1164_v10 }
 0x24d   : > { %2045 = vmatprep.subr.bf16.mxu1 %v1779_v14  ;;  %v5359_v14 = vld [vmem:[#allocation2 + $0x28] sm:$0xff]  ;;  %v1580_v11 = vunpack.c.h.s8.bf16 %v1228_v12  ;;  %v1572_v23 = vunpack.c.l.s8.bf16 %v1228_v12 }
 0x24f   : > { %2007 = vmatpush1.bf16.msra.mxu0 %v1650_v18  ;;  %v1445_v18 = vunpack.c.l.s8.bf16 %v1165_v3 }
 0x250   : > { %2046 = vmatpush1.bf16.msra.mxu1 %v1778_v19  ;;  %2008 = vmatprep.subr.bf16.mxu0 %v1771_v20  ;;  %v1573_v19 = vunpack.c.l.s8.bf16 %v1229_v4  ;;  %v1157_v20 = vld [vmem:[%s5239_s27 + $0x98] sm:$0xff] }
 0x251   : > { %2047 = vmatprep.subr.bf16.mxu1 %v1899_v21  ;;  %v1221_v21 = vld [vmem:[%s5239_s27 + $0x298] sm:$0xff] }
 0x253   : > { %2009 = vmatpush2.bf16.msra.mxu0 %v1770_v24  ;;  %v1437_v24 = vunpack.c.h.s8.bf16 %v1157_v20 }
 0x254   : > { %2048 = vmatpush2.bf16.msra.mxu1 %v1898_v25  ;;  %2010 = vmatprep.subr.bf16.mxu0 %v1763_v26  ;;  %v1565_v25 = vunpack.c.h.s8.bf16 %v1221_v21  ;;  %v1156_v26 = vld [vmem:[%s5239_s27 + $0x90] sm:$0xff] }
 0x255   : > { %2049 = vmatprep.subr.bf16.mxu1 %v1891_v27  ;;  %v1220_v27 = vld [vmem:[%s5239_s27 + $0x290] sm:$0xff]  ;;  %v1436_v28 = vunpack.c.h.s8.bf16 %v1156_v26  ;;  %v1428_v36 = vunpack.c.l.s8.bf16 %v1156_v26 }
 0x256   : > { %v1564_v29 = vunpack.c.h.s8.bf16 %v1220_v27  ;;  %v1556_v37 = vunpack.c.l.s8.bf16 %v1220_v27 }
 0x257   : > { %2011 = vmatpush2.bf16.msra.mxu0 %v1762_v30  ;;  %v1429_v30 = vunpack.c.l.s8.bf16 %v1157_v20 }
 0x258   : > { %2050 = vmatpush2.bf16.msra.mxu1 %v1890_v31  ;;  %2012 = vmatprep.subr.bf16.mxu0 %v1755_v32  ;;  %v1557_v31 = vunpack.c.l.s8.bf16 %v1221_v21  ;;  %v1149_v32 = vld [vmem:[%s5239_s27 + $0x58] sm:$0xff] }
 0x259   : > { %2051 = vmatprep.subr.bf16.mxu1 %v1883_v33  ;;  %v1213_v33 = vld [vmem:[%s5239_s27 + $0x258] sm:$0xff]  ;;  %v1413_v43 = vunpack.c.l.s8.bf16 %v1149_v32 }
 0x25a   : > { %v1541_v44 = vunpack.c.l.s8.bf16 %v1213_v33 }
 0x25b   : > { %2013 = vmatpush2.bf16.msra.mxu0 %v1754_v38  ;;  %v1148_v38 = vld [vmem:[%s5239_s27 + $0x50] sm:$0xff] }
 0x25c   : > { %2052 = vmatpush2.bf16.msra.mxu1 %v1882_v39  ;;  %2014 = vmatprep.subr.bf16.mxu0 %v1747_v40  ;;  %v1212_v39 = vld [vmem:[%s5239_s27 + $0x250] sm:$0xff]  ;;  %v1420_v40 = vunpack.c.h.s8.bf16 %v1148_v38 }
 0x25d   : > { %2053 = vmatprep.subr.bf16.mxu1 %v1875_v8  ;;  %v1548_v8 = vunpack.c.h.s8.bf16 %v1212_v39 }
 0x25f   : > { %2015 = vmatpush2.bf16.msra.mxu0 %v1746_v45  ;;  %v1141_v45 = vld [vmem:[%s5239_s27 + $0x18] sm:$0xff] }
 0x260   : > { %2054 = vmatpush2.bf16.msra.mxu1 %v1874_v46  ;;  %2016 = vmatprep.subr.bf16.mxu0 %v1739_v47  ;;  %v1205_v46 = vld [vmem:[%s5239_s27 + $0x218] sm:$0xff]  ;;  %v1412_v47 = vunpack.c.l.s8.bf16 %v1148_v38  ;;  %v1405_v49 = vunpack.c.h.s8.bf16 %v1141_v45  ;;  %v1397_v55 = vunpack.c.l.s8.bf16 %v1141_v45 }
 0x261   : > { %2055 = vmatprep.subr.bf16.mxu1 %v1867_v48  ;;  %v1540_v48 = vunpack.c.l.s8.bf16 %v1212_v39  ;;  %v1533_v50 = vunpack.c.h.s8.bf16 %v1205_v46  ;;  %v1525_v56 = vunpack.c.l.s8.bf16 %v1205_v46 }
 0x263   : > { %2017 = vmatpush2.bf16.msra.mxu0 %v1738_v51  ;;  %v1140_v51 = vld [vmem:[%s5239_s27 + $0x10] sm:$0xff] }
 0x264   : > { %2056 = vmatpush2.bf16.msra.mxu1 %v1866_v52  ;;  %2018 = vmatprep.subr.bf16.mxu0 %v1731_v53  ;;  %v1204_v52 = vld [vmem:[%s5239_s27 + $0x210] sm:$0xff]  ;;  %v1404_v53 = vunpack.c.h.s8.bf16 %v1140_v51 }
 0x265   : > { %2057 = vmatprep.subr.bf16.mxu1 %v1859_v54  ;;  %v1532_v54 = vunpack.c.h.s8.bf16 %v1204_v52 }
 0x267   : > { %2019 = vmatpush2.bf16.msra.mxu0 %v1730_v57  ;;  %v1197_v57 = vld [vmem:[%s5239_s27 + $0x1d8] sm:$0xff] }
 0x268   : > { %2058 = vmatpush2.bf16.msra.mxu1 %v1858_v58  ;;  %2020 = vmatprep.subr.bf16.mxu0 %v1723_v59  ;;  %v1261_v58 = vld [vmem:[%s5239_s27 + $0x3d8] sm:$0xff]  ;;  %v1396_v59 = vunpack.c.l.s8.bf16 %v1140_v51  ;;  %v1517_v61 = vunpack.c.h.s8.bf16 %v1197_v57  ;;  %v1509_v3 = vunpack.c.l.s8.bf16 %v1197_v57 }
 0x269   : > { %2059 = vmatprep.subr.bf16.mxu1 %v1851_v60  ;;  %v1524_v60 = vunpack.c.l.s8.bf16 %v1204_v52  ;;  %v1645_v62 = vunpack.c.h.s8.bf16 %v1261_v58  ;;  %v1637_v4 = vunpack.c.l.s8.bf16 %v1261_v58 }
 0x26b   : > { %2021 = vmatpush2.bf16.msra.mxu0 %v1722_v63  ;;  %v1196_v63 = vld [vmem:[%s5239_s27 + $0x1d0] sm:$0xff] }
 0x26c   : > { %2060 = vmatpush2.bf16.msra.mxu1 %v1850_v0  ;;  %2022 = vmatprep.subr.bf16.mxu0 %v1715_v1  ;;  %v1260_v0 = vld [vmem:[%s5239_s27 + $0x3d0] sm:$0xff]  ;;  %v1516_v1 = vunpack.c.h.s8.bf16 %v1196_v63 }
 0x26d   : > { %2061 = vmatprep.subr.bf16.mxu1 %v1843_v2  ;;  %v1644_v2 = vunpack.c.h.s8.bf16 %v1260_v0 }
 0x26f   : > { %2023 = vmatpush2.bf16.msra.mxu0 %v1714_v5  ;;  %v1189_v5 = vld [vmem:[%s5239_s27 + $0x198] sm:$0xff] }
 0x270   : > { %2062 = vmatpush2.bf16.msra.mxu1 %v1842_v6  ;;  %2070 = vmatprep.subr.bf16.mxu0 %v1453_v7  ;;  %v1253_v6 = vld [vmem:[%s5239_s27 + $0x398] sm:$0xff]  ;;  %v1508_v7 = vunpack.c.l.s8.bf16 %v1196_v63  ;;  %v1501_v10 = vunpack.c.h.s8.bf16 %v1189_v5  ;;  %v1493_v20 = vunpack.c.l.s8.bf16 %v1189_v5 }
 0x271   : > { %2109 = vmatprep.subr.bf16.mxu1 %v1581_v9  ;;  %v1636_v9 = vunpack.c.l.s8.bf16 %v1260_v0  ;;  %v1629_v12 = vunpack.c.h.s8.bf16 %v1253_v6  ;;  %v1621_v21 = vunpack.c.l.s8.bf16 %v1253_v6  ;;  %v1277_v5 = vld [vmem:[%s5239_s27 + $0x458] sm:$0xff] }
 0x272   : > { %2025 = vmatmul.mubr.f32.vlgmr.msra.gmra.mxu0 %v5357_v13  ;;  %v1341_v6 = vld [vmem:[%s5239_s27 + $0x658] sm:$0xff] }
 0x273   : > { %2064 = vmatmul.mubr.f32.vlgmr.msra.gmra.mxu1 %v5359_v14  ;;  %2071 = vmatpush1.bf16.msra.mxu0 %v1452_v15  ;;  %v1188_v15 = vld [vmem:[%s5239_s27 + $0x190] sm:$0xff] }
 0x274   : > { %2110 = vmatpush1.bf16.msra.mxu1 %v1580_v11  ;;  %2072 = vmatprep.subr.bf16.mxu0 %v1445_v18  ;;  %v1252_v11 = vld [vmem:[%s5239_s27 + $0x390] sm:$0xff]  ;;  %v1500_v18 = vunpack.c.h.s8.bf16 %v1188_v15 }
 0x275   : > { %2111 = vmatprep.subr.bf16.mxu1 %v1573_v19  ;;  %2102 = vmatprep.mubr.f32.mxu0 %v5281_v16  ;;  %v1421_v16 = vunpack.c.h.s8.bf16 %v1149_v32  ;;  %v1628_v19 = vunpack.c.h.s8.bf16 %v1252_v11 }
 0x276   : > { %2141 = vmatprep.mubr.f32.mxu1 %v5284_v17  ;;  %v1549_v17 = vunpack.c.h.s8.bf16 %v1213_v33 }
 0x277   : > { %2073 = vmatpush1.bf16.msra.mxu0 %v1444_v22  ;;  %v1181_v22 = vld [vmem:[%s5239_s27 + $0x158] sm:$0xff] }
 0x278   : > { %2112 = vmatpush1.bf16.msra.mxu1 %v1572_v23  ;;  %2074 = vmatprep.subr.bf16.mxu0 %v1437_v24  ;;  %v1245_v23 = vld [vmem:[%s5239_s27 + $0x358] sm:$0xff]  ;;  %v1492_v24 = vunpack.c.l.s8.bf16 %v1188_v15  ;;  %v1485_v26 = vunpack.c.h.s8.bf16 %v1181_v22  ;;  %v1477_v32 = vunpack.c.l.s8.bf16 %v1181_v22 }
 0x279   : > { %2113 = vmatprep.subr.bf16.mxu1 %v1565_v25  ;;  %v1620_v25 = vunpack.c.l.s8.bf16 %v1252_v11  ;;  %v1613_v27 = vunpack.c.h.s8.bf16 %v1245_v23  ;;  %v1605_v33 = vunpack.c.l.s8.bf16 %v1245_v23 }
 0x27b   : > { %2075 = vmatpush1.bf16.msra.mxu0 %v1436_v28  ;;  %v1180_v28 = vld [vmem:[%s5239_s27 + $0x150] sm:$0xff] }
 0x27c   : > { %2114 = vmatpush1.bf16.msra.mxu1 %v1564_v29  ;;  %2076 = vmatprep.subr.bf16.mxu0 %v1429_v30  ;;  %v1244_v29 = vld [vmem:[%s5239_s27 + $0x350] sm:$0xff]  ;;  %v1484_v30 = vunpack.c.h.s8.bf16 %v1180_v28 }
 0x27d   : > { %2115 = vmatprep.subr.bf16.mxu1 %v1557_v31  ;;  %v1612_v31 = vunpack.c.h.s8.bf16 %v1244_v29 }
 0x27f   : > { %2077 = vmatpush1.bf16.msra.mxu0 %v1428_v36  ;;  %v1173_v36 = vld [vmem:[%s5239_s27 + $0x118] sm:$0xff] }
 0x280   : > { %2116 = vmatpush1.bf16.msra.mxu1 %v1556_v37  ;;  %2078 = vmatprep.subr.bf16.mxu0 %v1421_v16  ;;  %v1237_v37 = vld [vmem:[%s5239_s27 + $0x318] sm:$0xff]  ;;  %v1476_v16 = vunpack.c.l.s8.bf16 %v1180_v28  ;;  %v1469_v38 = vunpack.c.h.s8.bf16 %v1173_v36  ;;  %v1461_v45 = vunpack.c.l.s8.bf16 %v1173_v36 }
 0x281   : > { %2117 = vmatprep.subr.bf16.mxu1 %v1549_v17  ;;  %v1604_v17 = vunpack.c.l.s8.bf16 %v1244_v29  ;;  %v1597_v39 = vunpack.c.h.s8.bf16 %v1237_v37  ;;  %v1589_v46 = vunpack.c.l.s8.bf16 %v1237_v37 }
 0x283   : > { %2079 = vmatpush1.bf16.msra.mxu0 %v1420_v40  ;;  %v1172_v40 = vld [vmem:[%s5239_s27 + $0x110] sm:$0xff] }
 0x284   : > { %2118 = vmatpush1.bf16.msra.mxu1 %v1548_v8  ;;  %2080 = vmatprep.subr.bf16.mxu0 %v1413_v43  ;;  %v1236_v8 = vld [vmem:[%s5239_s27 + $0x310] sm:$0xff]  ;;  %v1468_v43 = vunpack.c.h.s8.bf16 %v1172_v40 }
 0x285   : > { %2119 = vmatprep.subr.bf16.mxu1 %v1541_v44  ;;  %v1596_v44 = vunpack.c.h.s8.bf16 %v1236_v8 }
 0x287   : > { %2081 = vmatpush1.bf16.msra.mxu0 %v1412_v47  ;;  %v1293_v47 = vld [vmem:[%s5239_s27 + $0x4d8] sm:$0xff] }
 0x288   : > { %2120 = vmatpush1.bf16.msra.mxu1 %v1540_v48  ;;  %2082 = vmatprep.subr.bf16.mxu0 %v1405_v49  ;;  %v1357_v48 = vld [vmem:[%s5239_s27 + $0x6d8] sm:$0xff]  ;;  %v1460_v49 = vunpack.c.l.s8.bf16 %v1172_v40  ;;  %v1709_v51 = vunpack.c.h.s8.bf16 %v1293_v47  ;;  %v1701_v57 = vunpack.c.l.s8.bf16 %v1293_v47 }
 0x289   : > { %2121 = vmatprep.subr.bf16.mxu1 %v1533_v50  ;;  %v1588_v50 = vunpack.c.l.s8.bf16 %v1236_v8  ;;  %v1837_v52 = vunpack.c.h.s8.bf16 %v1357_v48  ;;  %v1829_v58 = vunpack.c.l.s8.bf16 %v1357_v48 }
 0x28b   : > { %2083 = vmatpush1.bf16.msra.mxu0 %v1404_v53  ;;  %v1292_v53 = vld [vmem:[%s5239_s27 + $0x4d0] sm:$0xff] }
 0x28c   : > { %2122 = vmatpush1.bf16.msra.mxu1 %v1532_v54  ;;  %2084 = vmatprep.subr.bf16.mxu0 %v1397_v55  ;;  %v1356_v54 = vld [vmem:[%s5239_s27 + $0x6d0] sm:$0xff]  ;;  %v1708_v55 = vunpack.c.h.s8.bf16 %v1292_v53 }
 0x28d   : > { %2123 = vmatprep.subr.bf16.mxu1 %v1525_v56  ;;  %v1836_v56 = vunpack.c.h.s8.bf16 %v1356_v54 }
 0x28f   : > { %2085 = vmatpush1.bf16.msra.mxu0 %v1396_v59  ;;  %v1285_v59 = vld [vmem:[%s5239_s27 + $0x498] sm:$0xff] }
 0x290   : > { %2124 = vmatpush1.bf16.msra.mxu1 %v1524_v60  ;;  %2086 = vmatprep.subr.bf16.mxu0 %v1517_v61  ;;  %v1349_v60 = vld [vmem:[%s5239_s27 + $0x698] sm:$0xff]  ;;  %v1700_v61 = vunpack.c.l.s8.bf16 %v1292_v53  ;;  %v1693_v63 = vunpack.c.h.s8.bf16 %v1285_v59 }
 0x291   : > { %2125 = vmatprep.subr.bf16.mxu1 %v1645_v62  ;;  %v1828_v62 = vunpack.c.l.s8.bf16 %v1356_v54  ;;  %v1821_v0 = vunpack.c.h.s8.bf16 %v1349_v60 }
 0x293   : > { %2087 = vmatpush2.bf16.msra.mxu0 %v1516_v1  ;;  %v1284_v1 = vld [vmem:[%s5239_s27 + $0x490] sm:$0xff] }
 0x294   : > { %2126 = vmatpush2.bf16.msra.mxu1 %v1644_v2  ;;  %2088 = vmatprep.subr.bf16.mxu0 %v1509_v3  ;;  %v1348_v2 = vld [vmem:[%s5239_s27 + $0x690] sm:$0xff]  ;;  %v1685_v3 = vunpack.c.l.s8.bf16 %v1285_v59 }
 0x295   : > { %2127 = vmatprep.subr.bf16.mxu1 %v1637_v4  ;;  %v1813_v4 = vunpack.c.l.s8.bf16 %v1349_v60 }
 0x297   : > { %2089 = vmatpush2.bf16.msra.mxu0 %v1508_v7  ;;  %v1684_v7 = vunpack.c.l.s8.bf16 %v1284_v1 }
 0x298   : > { %2128 = vmatpush2.bf16.msra.mxu1 %v1636_v9  ;;  %2090 = vmatprep.subr.bf16.mxu0 %v1501_v10  ;;  %v1812_v9 = vunpack.c.l.s8.bf16 %v1348_v2  ;;  %v1276_v10 = vld [vmem:[%s5239_s27 + $0x450] sm:$0xff] }
 0x299   : > { %2129 = vmatprep.subr.bf16.mxu1 %v1629_v12  ;;  %v1340_v12 = vld [vmem:[%s5239_s27 + $0x650] sm:$0xff]  ;;  %v1676_v15 = vunpack.c.h.s8.bf16 %v1276_v10  ;;  %v1668_v22 = vunpack.c.l.s8.bf16 %v1276_v10 }
 0x29a   : > { %v1804_v11 = vunpack.c.h.s8.bf16 %v1340_v12  ;;  %v1796_v23 = vunpack.c.l.s8.bf16 %v1340_v12 }
 0x29b   : > { %2091 = vmatpush2.bf16.msra.mxu0 %v1500_v18  ;;  %v1669_v18 = vunpack.c.l.s8.bf16 %v1277_v5 }
 0x29c   : > { %2130 = vmatpush2.bf16.msra.mxu1 %v1628_v19  ;;  %2092 = vmatprep.subr.bf16.mxu0 %v1493_v20  ;;  %v1797_v19 = vunpack.c.l.s8.bf16 %v1341_v6  ;;  %v1269_v20 = vld [vmem:[%s5239_s27 + $0x418] sm:$0xff] }
 0x29d   : > { %2131 = vmatprep.subr.bf16.mxu1 %v1621_v21  ;;  %v1333_v21 = vld [vmem:[%s5239_s27 + $0x618] sm:$0xff] }
 0x29f   : > { %2093 = vmatpush2.bf16.msra.mxu0 %v1492_v24  ;;  %v1661_v24 = vunpack.c.h.s8.bf16 %v1269_v20 }
 0x2a0   : > { %2132 = vmatpush2.bf16.msra.mxu1 %v1620_v25  ;;  %2094 = vmatprep.subr.bf16.mxu0 %v1485_v26  ;;  %v1789_v25 = vunpack.c.h.s8.bf16 %v1333_v21  ;;  %v1268_v26 = vld [vmem:[%s5239_s27 + $0x410] sm:$0xff] }
 0x2a1   : > { %2133 = vmatprep.subr.bf16.mxu1 %v1613_v27  ;;  %v1332_v27 = vld [vmem:[%s5239_s27 + $0x610] sm:$0xff]  ;;  %v1660_v28 = vunpack.c.h.s8.bf16 %v1268_v26  ;;  %v1652_v36 = vunpack.c.l.s8.bf16 %v1268_v26 }
 0x2a2   : > { %v1788_v29 = vunpack.c.h.s8.bf16 %v1332_v27  ;;  %v1780_v37 = vunpack.c.l.s8.bf16 %v1332_v27 }
 0x2a3   : > { %2095 = vmatpush2.bf16.msra.mxu0 %v1484_v30  ;;  %v1653_v30 = vunpack.c.l.s8.bf16 %v1269_v20 }
 0x2a4   : > { %2134 = vmatpush2.bf16.msra.mxu1 %v1612_v31  ;;  %2096 = vmatprep.subr.bf16.mxu0 %v1477_v32  ;;  %v1781_v31 = vunpack.c.l.s8.bf16 %v1333_v21  ;;  %v1325_v32 = vld [vmem:[%s5239_s27 + $0x5d8] sm:$0xff] }
 0x2a5   : > { %2135 = vmatprep.subr.bf16.mxu1 %v1605_v33  ;;  %v1389_v33 = vld [vmem:[%s5239_s27 + $0x7d8] sm:$0xff] }
 0x2a7   : > { %2097 = vmatpush2.bf16.msra.mxu0 %v1476_v16  ;;  %v1773_v16 = vunpack.c.h.s8.bf16 %v1325_v32 }
 0x2a8   : > { %2136 = vmatpush2.bf16.msra.mxu1 %v1604_v17  ;;  %2098 = vmatprep.subr.bf16.mxu0 %v1469_v38  ;;  %v1901_v17 = vunpack.c.h.s8.bf16 %v1389_v33  ;;  %v1324_v38 = vld [vmem:[%s5239_s27 + $0x5d0] sm:$0xff] }
 0x2a9   : > { %2137 = vmatprep.subr.bf16.mxu1 %v1597_v39  ;;  %v1388_v39 = vld [vmem:[%s5239_s27 + $0x7d0] sm:$0xff]  ;;  %v1772_v40 = vunpack.c.h.s8.bf16 %v1324_v38  ;;  %v1764_v47 = vunpack.c.l.s8.bf16 %v1324_v38 }
 0x2aa   : > { %v1900_v8 = vunpack.c.h.s8.bf16 %v1388_v39  ;;  %v1892_v48 = vunpack.c.l.s8.bf16 %v1388_v39  ;;  %v1158_v39 = vld [vmem:[%s5239_s27 + $0xa0] sm:$0xff] }
 0x2ab   : > { %2099 = vmatpush2.bf16.msra.mxu0 %v1468_v43  ;;  %v1765_v43 = vunpack.c.l.s8.bf16 %v1325_v32 }
 0x2ac   : > { %2138 = vmatpush2.bf16.msra.mxu1 %v1596_v44  ;;  %2100 = vmatprep.subr.bf16.mxu0 %v1461_v45  ;;  %v1893_v44 = vunpack.c.l.s8.bf16 %v1389_v33  ;;  %v1317_v45 = vld [vmem:[%s5239_s27 + $0x598] sm:$0xff] }
 0x2ad   : > { %2139 = vmatprep.subr.bf16.mxu1 %v1589_v46  ;;  %v1381_v46 = vld [vmem:[%s5239_s27 + $0x798] sm:$0xff] }
 0x2af   : > { %2101 = vmatpush2.bf16.msra.mxu0 %v1460_v49  ;;  %v1757_v49 = vunpack.c.h.s8.bf16 %v1317_v45 }
 0x2b0   : > { %2140 = vmatpush2.bf16.msra.mxu1 %v1588_v50  ;;  %2148 = vmatprep.subr.bf16.mxu0 %v1709_v51  ;;  %v1885_v50 = vunpack.c.h.s8.bf16 %v1381_v46  ;;  %v1316_v51 = vld [vmem:[%s5239_s27 + $0x590] sm:$0xff] }
 0x2b1   : > { %2187 = vmatprep.subr.bf16.mxu1 %v1837_v52  ;;  %v1380_v52 = vld [vmem:[%s5239_s27 + $0x790] sm:$0xff]  ;;  %v1756_v53 = vunpack.c.h.s8.bf16 %v1316_v51  ;;  %v1748_v59 = vunpack.c.l.s8.bf16 %v1316_v51 }
 0x2b2   : > { %2103 = vmatmul.mubr.f32.vlgmr.msra.gmra.mxu0 %v5313_v34  ;;  %v1692_v34 = vunpack.c.h.s8.bf16 %v1284_v1  ;;  %v1884_v54 = vunpack.c.h.s8.bf16 %v1380_v52  ;;  %v1876_v60 = vunpack.c.l.s8.bf16 %v1380_v52  ;;  %v1150_v52 = vld [vmem:[%s5239_s27 + $0x60] sm:$0xff] }
 0x2b3   : > { %2142 = vmatmul.mubr.f32.vlgmr.msra.gmra.mxu1 %v5315_v35  ;;  %2149 = vmatpush1.bf16.msra.mxu0 %v1708_v55  ;;  %v1820_v35 = vunpack.c.h.s8.bf16 %v1348_v2  ;;  %v1749_v55 = vunpack.c.l.s8.bf16 %v1317_v45 }
 0x2b4   : > { %2188 = vmatpush1.bf16.msra.mxu1 %v1836_v56  ;;  %2150 = vmatprep.subr.bf16.mxu0 %v1701_v57  ;;  %v1877_v56 = vunpack.c.l.s8.bf16 %v1381_v46  ;;  %v1309_v57 = vld [vmem:[%s5239_s27 + $0x558] sm:$0xff]  ;;  %v1151_v46 = vld [vmem:[%s5239_s27 + $0x68] sm:$0xff] }
 0x2b5   : > { %2189 = vmatprep.subr.bf16.mxu1 %v1829_v58  ;;  %2180 = vmatprep.mubr.f32.mxu0 %v5321_v41  ;;  %v1677_v41 = vunpack.c.h.s8.bf16 %v1277_v5  ;;  %v1373_v58 = vld [vmem:[%s5239_s27 + $0x758] sm:$0xff] }
 0x2b6   : > { %2219 = vmatprep.mubr.f32.mxu1 %v5323_v42  ;;  %v1805_v42 = vunpack.c.h.s8.bf16 %v1341_v6 }
 0x2b7   : > { %2151 = vmatpush1.bf16.msra.mxu0 %v1700_v61  ;;  %v1741_v61 = vunpack.c.h.s8.bf16 %v1309_v57 }
 0x2b8   : > { %2190 = vmatpush1.bf16.msra.mxu1 %v1828_v62  ;;  %2152 = vmatprep.subr.bf16.mxu0 %v1693_v63  ;;  %v1869_v62 = vunpack.c.h.s8.bf16 %v1373_v58  ;;  %v1308_v63 = vld [vmem:[%s5239_s27 + $0x550] sm:$0xff] }
 0x2b9   : > { %2191 = vmatprep.subr.bf16.mxu1 %v1821_v0  ;;  %v1372_v0 = vld [vmem:[%s5239_s27 + $0x750] sm:$0xff]  ;;  %v1740_v1 = vunpack.c.h.s8.bf16 %v1308_v63  ;;  %v1732_v5 = vunpack.c.l.s8.bf16 %v1308_v63 }
 0x2ba   : > { %v1868_v2 = vunpack.c.h.s8.bf16 %v1372_v0  ;;  %v1860_v6 = vunpack.c.l.s8.bf16 %v1372_v0  ;;  %v1142_v0 = vld [vmem:[%s5239_s27 + $0x20] sm:$0xff] }
 0x2bb   : > { %2153 = vmatpush1.bf16.msra.mxu0 %v1692_v34  ;;  %v1733_v34 = vunpack.c.l.s8.bf16 %v1309_v57 }
 0x2bc   : > { %2192 = vmatpush1.bf16.msra.mxu1 %v1820_v35  ;;  %2154 = vmatprep.subr.bf16.mxu0 %v1685_v3  ;;  %v1861_v35 = vunpack.c.l.s8.bf16 %v1373_v58  ;;  %v1301_v3 = vld [vmem:[%s5239_s27 + $0x518] sm:$0xff]  ;;  %v1143_v58 = vld [vmem:[%s5239_s27 + $0x28] sm:$0xff] }
 0x2bd   : > { %2193 = vmatprep.subr.bf16.mxu1 %v1813_v4  ;;  %v1365_v4 = vld [vmem:[%s5239_s27 + $0x718] sm:$0xff] }
 0x2bf   : > { %2155 = vmatpush1.bf16.msra.mxu0 %v1684_v7  ;;  %v1725_v7 = vunpack.c.h.s8.bf16 %v1301_v3 }
 0x2c0   : > { %2194 = vmatpush1.bf16.msra.mxu1 %v1812_v9  ;;  %2156 = vmatprep.subr.bf16.mxu0 %v1677_v41  ;;  %v1853_v9 = vunpack.c.h.s8.bf16 %v1365_v4  ;;  %v1300_v41 = vld [vmem:[%s5239_s27 + $0x510] sm:$0xff] }
 0x2c1   : > { %2195 = vmatprep.subr.bf16.mxu1 %v1805_v42  ;;  %v1364_v42 = vld [vmem:[%s5239_s27 + $0x710] sm:$0xff]  ;;  %v1724_v10 = vunpack.c.h.s8.bf16 %v1300_v41  ;;  %v1716_v20 = vunpack.c.l.s8.bf16 %v1300_v41 }
 0x2c2   : > { %v1852_v12 = vunpack.c.h.s8.bf16 %v1364_v42  ;;  %v1844_v21 = vunpack.c.l.s8.bf16 %v1364_v42  ;;  %v1198_v42 = vld [vmem:[%s5239_s27 + $0x1e0] sm:$0xff] }
 0x2c3   : > { %2157 = vmatpush1.bf16.msra.mxu0 %v1676_v15  ;;  %v1717_v15 = vunpack.c.l.s8.bf16 %v1301_v3 }
 0x2c4   : > { %2196 = vmatpush1.bf16.msra.mxu1 %v1804_v11  ;;  %2158 = vmatprep.subr.bf16.mxu0 %v1669_v18  ;;  %v1845_v11 = vunpack.c.l.s8.bf16 %v1365_v4  ;;  %v1167_v18 = vld [vmem:[%s5239_s27 + $0xe8] sm:$0xff] }
 0x2c5   : > { %2197 = vmatprep.subr.bf16.mxu1 %v1797_v19  ;;  %v1231_v19 = vld [vmem:[%s5239_s27 + $0x2e8] sm:$0xff] }
 0x2c6   : > { %v1199_v4 = vld [vmem:[%s5239_s27 + $0x1e8] sm:$0xff] }
 0x2c7   : > { %2159 = vmatpush1.bf16.msra.mxu0 %v1668_v22  ;;  %v1455_v22 = vunpack.c.h.s8.bf16 %v1167_v18 }
 0x2c8   : > { %2198 = vmatpush1.bf16.msra.mxu1 %v1796_v23  ;;  %2160 = vmatprep.subr.bf16.mxu0 %v1661_v24  ;;  %v1583_v23 = vunpack.c.h.s8.bf16 %v1231_v19  ;;  %v1166_v24 = vld [vmem:[%s5239_s27 + $0xe0] sm:$0xff] }
 0x2c9   : > { %2199 = vmatprep.subr.bf16.mxu1 %v1789_v25  ;;  %v1230_v25 = vld [vmem:[%s5239_s27 + $0x2e0] sm:$0xff]  ;;  %v1454_v26 = vunpack.c.h.s8.bf16 %v1166_v24 }
 0x2ca   : > { %v1582_v27 = vunpack.c.h.s8.bf16 %v1230_v25 }
 0x2cb   : > { %2161 = vmatpush1.bf16.msra.mxu0 %v1660_v28  ;;  %v1447_v28 = vunpack.c.l.s8.bf16 %v1167_v18 }
 0x2cc   : > { %2200 = vmatpush1.bf16.msra.mxu1 %v1788_v29  ;;  %2162 = vmatprep.subr.bf16.mxu0 %v1653_v30  ;;  %v1575_v29 = vunpack.c.l.s8.bf16 %v1231_v19  ;;  %v1159_v30 = vld [vmem:[%s5239_s27 + $0xa8] sm:$0xff] }
 0x2cd   : > { %2201 = vmatprep.subr.bf16.mxu1 %v1781_v31  ;;  %v1223_v31 = vld [vmem:[%s5239_s27 + $0x2a8] sm:$0xff] }
 0x2ce   : > { %v1567_v38 = vunpack.c.h.s8.bf16 %v1223_v31  ;;  %v1559_v45 = vunpack.c.l.s8.bf16 %v1223_v31  ;;  %v1191_v19 = vld [vmem:[%s5239_s27 + $0x1a8] sm:$0xff] }
 0x2cf   : > { %2163 = vmatpush1.bf16.msra.mxu0 %v1652_v36  ;;  %v1183_v31 = vld [vmem:[%s5239_s27 + $0x168] sm:$0xff] }
 0x2d0   : > { %2202 = vmatpush1.bf16.msra.mxu1 %v1780_v37  ;;  %2164 = vmatprep.subr.bf16.mxu0 %v1773_v16  ;;  %v1446_v37 = vunpack.c.l.s8.bf16 %v1166_v24  ;;  %v1574_v16 = vunpack.c.l.s8.bf16 %v1230_v25  ;;  %v1190_v25 = vld [vmem:[%s5239_s27 + $0x1a0] sm:$0xff] }
 0x2d1   : > { %2203 = vmatprep.subr.bf16.mxu1 %v1901_v17  ;;  %v1439_v17 = vunpack.c.h.s8.bf16 %v1159_v30 }
 0x2d3   : > { %2165 = vmatpush2.bf16.msra.mxu0 %v1772_v40  ;;  %v1222_v40 = vld [vmem:[%s5239_s27 + $0x2a0] sm:$0xff] }
 0x2d4   : > { %2204 = vmatpush2.bf16.msra.mxu1 %v1900_v8  ;;  %2166 = vmatprep.subr.bf16.mxu0 %v1765_v43  ;;  %v5441_v8 = vld [vmem:[#allocation2] sm:$0xff]  ;;  %v1566_v43 = vunpack.c.h.s8.bf16 %v1222_v40 }
 0x2d5   : > { %2205 = vmatprep.subr.bf16.mxu1 %v1893_v44  ;;  %v1431_v44 = vunpack.c.l.s8.bf16 %v1159_v30 }
 0x2d7   : > { %2167 = vmatpush2.bf16.msra.mxu0 %v1764_v47  ;;  %v1215_v47 = vld [vmem:[%s5239_s27 + $0x268] sm:$0xff] }
 0x2d8   : > { %2206 = vmatpush2.bf16.msra.mxu1 %v1892_v48  ;;  %2168 = vmatprep.subr.bf16.mxu0 %v1757_v49  ;;  %v1430_v48 = vunpack.c.l.s8.bf16 %v1158_v39  ;;  %v1558_v49 = vunpack.c.l.s8.bf16 %v1222_v40  ;;  %v1551_v51 = vunpack.c.h.s8.bf16 %v1215_v47  ;;  %v1543_v57 = vunpack.c.l.s8.bf16 %v1215_v47 }
 0x2d9   : > { %2207 = vmatprep.subr.bf16.mxu1 %v1885_v50  ;;  %v1423_v50 = vunpack.c.h.s8.bf16 %v1151_v46 }
 0x2db   : > { %2169 = vmatpush2.bf16.msra.mxu0 %v1756_v53  ;;  %v1214_v53 = vld [vmem:[%s5239_s27 + $0x260] sm:$0xff] }
 0x2dc   : > { %2208 = vmatpush2.bf16.msra.mxu1 %v1884_v54  ;;  %2170 = vmatprep.subr.bf16.mxu0 %v1749_v55  ;;  %v1422_v54 = vunpack.c.h.s8.bf16 %v1150_v52  ;;  %v1550_v55 = vunpack.c.h.s8.bf16 %v1214_v53 }
 0x2dd   : > { %2209 = vmatprep.subr.bf16.mxu1 %v1877_v56  ;;  %v1415_v56 = vunpack.c.l.s8.bf16 %v1151_v46  ;;  %v1239_v46 = vld [vmem:[%s5239_s27 + $0x328] sm:$0xff] }
 0x2df   : > { %2171 = vmatpush2.bf16.msra.mxu0 %v1748_v59  ;;  %v1207_v59 = vld [vmem:[%s5239_s27 + $0x228] sm:$0xff] }
 0x2e0   : > { %2210 = vmatpush2.bf16.msra.mxu1 %v1876_v60  ;;  %2172 = vmatprep.subr.bf16.mxu0 %v1741_v61  ;;  %v1414_v60 = vunpack.c.l.s8.bf16 %v1150_v52  ;;  %v1542_v61 = vunpack.c.l.s8.bf16 %v1214_v53  ;;  %v1535_v63 = vunpack.c.h.s8.bf16 %v1207_v59  ;;  %v1527_v3 = vunpack.c.l.s8.bf16 %v1207_v59  ;;  %v1238_v52 = vld [vmem:[%s5239_s27 + $0x320] sm:$0xff] }
 0x2e1   : > { %2211 = vmatprep.subr.bf16.mxu1 %v1869_v62  ;;  %v1407_v62 = vunpack.c.h.s8.bf16 %v1143_v58 }
 0x2e3   : > { %2173 = vmatpush2.bf16.msra.mxu0 %v1740_v1  ;;  %v1206_v1 = vld [vmem:[%s5239_s27 + $0x220] sm:$0xff] }
 0x2e4   : > { %2212 = vmatpush2.bf16.msra.mxu1 %v1868_v2  ;;  %2174 = vmatprep.subr.bf16.mxu0 %v1733_v34  ;;  %v1406_v2 = vunpack.c.h.s8.bf16 %v1142_v0  ;;  %v1534_v34 = vunpack.c.h.s8.bf16 %v1206_v1 }
 0x2e5   : > { %2213 = vmatprep.subr.bf16.mxu1 %v1861_v35  ;;  %v1399_v35 = vunpack.c.l.s8.bf16 %v1143_v58  ;;  %v1359_v58 = vld [vmem:[%s5239_s27 + $0x6e8] sm:$0xff] }
 0x2e7   : > { %2175 = vmatpush2.bf16.msra.mxu0 %v1732_v5  ;;  %v1263_v5 = vld [vmem:[%s5239_s27 + $0x3e8] sm:$0xff] }
 0x2e8   : > { %2214 = vmatpush2.bf16.msra.mxu1 %v1860_v6  ;;  %2176 = vmatprep.subr.bf16.mxu0 %v1725_v7  ;;  %v1398_v6 = vunpack.c.l.s8.bf16 %v1142_v0  ;;  %v1526_v7 = vunpack.c.l.s8.bf16 %v1206_v1  ;;  %v1647_v41 = vunpack.c.h.s8.bf16 %v1263_v5  ;;  %v1639_v18 = vunpack.c.l.s8.bf16 %v1263_v5  ;;  %v1358_v0 = vld [vmem:[%s5239_s27 + $0x6e0] sm:$0xff]  ;;  %v1287_v5 = vld [vmem:[%s5239_s27 + $0x4a8] sm:$0xff] }
 0x2e9   : > { %2215 = vmatprep.subr.bf16.mxu1 %v1853_v9  ;;  %v1519_v9 = vunpack.c.h.s8.bf16 %v1199_v4 }
 0x2eb   : > { %2177 = vmatpush2.bf16.msra.mxu0 %v1724_v10  ;;  %v1262_v10 = vld [vmem:[%s5239_s27 + $0x3e0] sm:$0xff] }
 0x2ec   : > { %2216 = vmatpush2.bf16.msra.mxu1 %v1852_v12  ;;  %2178 = vmatprep.subr.bf16.mxu0 %v1717_v15  ;;  %v1518_v12 = vunpack.c.h.s8.bf16 %v1198_v42  ;;  %v1646_v15 = vunpack.c.h.s8.bf16 %v1262_v10 }
 0x2ed   : > { %2217 = vmatprep.subr.bf16.mxu1 %v1845_v11  ;;  %v1511_v11 = vunpack.c.l.s8.bf16 %v1199_v4  ;;  %v1831_v4 = vunpack.c.l.s8.bf16 %v1359_v58 }
 0x2ef   : > { %2179 = vmatpush2.bf16.msra.mxu0 %v1716_v20  ;;  %v1255_v20 = vld [vmem:[%s5239_s27 + $0x3a8] sm:$0xff] }
 0x2f0   : > { %2218 = vmatpush2.bf16.msra.mxu1 %v1844_v21  ;;  %2226 = vmatprep.subr.bf16.mxu0 %v1455_v22  ;;  %v1510_v21 = vunpack.c.l.s8.bf16 %v1198_v42  ;;  %v1638_v22 = vunpack.c.l.s8.bf16 %v1262_v10  ;;  %v1631_v24 = vunpack.c.h.s8.bf16 %v1255_v20  ;;  %v1623_v30 = vunpack.c.l.s8.bf16 %v1255_v20  ;;  %v1350_v20 = vld [vmem:[%s5239_s27 + $0x6a0] sm:$0xff] }
 0x2f1   : > { %2265 = vmatprep.subr.bf16.mxu1 %v1583_v23  ;;  %v1503_v23 = vunpack.c.h.s8.bf16 %v1191_v19 }
 0x2f2   : > { %v1948_v32 = vpop.f32.mrf.mxu0  ;;  %2181 = vmatmul.mubr.f32.vlgmr.msra.gmra.mxu0 %v5357_v13  ;;  %v5444_v13 = vld [vmem:[#allocation2 + $0x10] sm:$0xff] }
 0x2f3   : > { %v1987_v33 = vpop.f32.mrf.mxu1  ;;  %2220 = vmatmul.mubr.f32.vlgmr.msra.gmra.mxu1 %v5359_v14  ;;  %2227 = vmatpush1.bf16.msra.mxu0 %v1454_v26  ;;  %v1438_v14 = vunpack.c.h.s8.bf16 %v1158_v39  ;;  %v1254_v26 = vld [vmem:[%s5239_s27 + $0x3a0] sm:$0xff] }
 0x2f4   : > { %v5437_v36 = vadd.f32 %v1987_v33, %v1948_v32  ;;  %2266 = vmatpush1.bf16.msra.mxu1 %v1582_v27  ;;  %2228 = vmatprep.subr.bf16.mxu0 %v1447_v28  ;;  %v1502_v27 = vunpack.c.h.s8.bf16 %v1190_v25  ;;  %v1630_v28 = vunpack.c.h.s8.bf16 %v1254_v26  ;;  %v1247_v32 = vld [vmem:[%s5239_s27 + $0x368] sm:$0xff]  ;;  %v1494_v33 = vunpack.c.l.s8.bf16 %v1190_v25  ;;  %v1246_v39 = vld [vmem:[%s5239_s27 + $0x360] sm:$0xff] }
 0x2f5   : > { %2267 = vmatprep.subr.bf16.mxu1 %v1575_v29  ;;  %2258 = vmatprep.mubr.f32.mxu0 %v5441_v8  ;;  %v1495_v29 = vunpack.c.l.s8.bf16 %v1191_v19  ;;  %v1286_v19 = vld [vmem:[%s5239_s27 + $0x4a0] sm:$0xff]  ;;  %v1687_v25 = vunpack.c.l.s8.bf16 %v1287_v5 }
 0x2f6   : > { %2297 = vmatprep.mubr.f32.mxu1 %v5444_v13 }
 0x2f7   : > { %2229 = vmatpush1.bf16.msra.mxu0 %v1446_v37  ;;  %v1622_v37 = vunpack.c.l.s8.bf16 %v1254_v26 }
 0x2f8   : > { %2268 = vmatpush1.bf16.msra.mxu1 %v1574_v16  ;;  %2230 = vmatprep.subr.bf16.mxu0 %v1439_v17  ;;  %v1487_v16 = vunpack.c.h.s8.bf16 %v1183_v31  ;;  %v1615_v17 = vunpack.c.h.s8.bf16 %v1247_v32 }
 0x2f9   : > { %2269 = vmatprep.subr.bf16.mxu1 %v1567_v38  ;;  %v1182_v38 = vld [vmem:[%s5239_s27 + $0x160] sm:$0xff] }
 0x2fa   : > { %v1486_v40 = vunpack.c.h.s8.bf16 %v1182_v38  ;;  %v1478_v47 = vunpack.c.l.s8.bf16 %v1182_v38 }
 0x2fb   : > { %2231 = vmatpush1.bf16.msra.mxu0 %v1438_v14  ;;  %v1614_v14 = vunpack.c.h.s8.bf16 %v1246_v39 }
 0x2fc   : > { %2270 = vmatpush1.bf16.msra.mxu1 %v1566_v43  ;;  %2232 = vmatprep.subr.bf16.mxu0 %v1431_v44  ;;  %v1479_v43 = vunpack.c.l.s8.bf16 %v1183_v31  ;;  %v1607_v44 = vunpack.c.l.s8.bf16 %v1247_v32 }
 0x2fd   : > { %2271 = vmatprep.subr.bf16.mxu1 %v1559_v45  ;;  %v1175_v45 = vld [vmem:[%s5239_s27 + $0x128] sm:$0xff] }
 0x2ff   : > { %2233 = vmatpush1.bf16.msra.mxu0 %v1430_v48  ;;  %v1606_v48 = vunpack.c.l.s8.bf16 %v1246_v39 }
 0x300   : > { %2272 = vmatpush1.bf16.msra.mxu1 %v1558_v49  ;;  %2234 = vmatprep.subr.bf16.mxu0 %v1423_v50  ;;  %v1471_v49 = vunpack.c.h.s8.bf16 %v1175_v45  ;;  %v1599_v50 = vunpack.c.h.s8.bf16 %v1239_v46 }
 0x301   : > { %2273 = vmatprep.subr.bf16.mxu1 %v1551_v51  ;;  %v1174_v51 = vld [vmem:[%s5239_s27 + $0x120] sm:$0xff] }
 0x302   : > { %v1470_v53 = vunpack.c.h.s8.bf16 %v1174_v51  ;;  %v1462_v59 = vunpack.c.l.s8.bf16 %v1174_v51 }
 0x303   : > { %2235 = vmatpush1.bf16.msra.mxu0 %v1422_v54  ;;  %v1598_v54 = vunpack.c.h.s8.bf16 %v1238_v52 }
 0x304   : > { %2274 = vmatpush1.bf16.msra.mxu1 %v1550_v55  ;;  %2236 = vmatprep.subr.bf16.mxu0 %v1415_v56  ;;  %v1463_v55 = vunpack.c.l.s8.bf16 %v1175_v45  ;;  %v1591_v56 = vunpack.c.l.s8.bf16 %v1239_v46 }
 0x305   : > { %2275 = vmatprep.subr.bf16.mxu1 %v1543_v57  ;;  %v1295_v57 = vld [vmem:[%s5239_s27 + $0x4e8] sm:$0xff] }
 0x307   : > { %2237 = vmatpush1.bf16.msra.mxu0 %v1414_v60  ;;  %v1590_v60 = vunpack.c.l.s8.bf16 %v1238_v52 }
 0x308   : > { %2276 = vmatpush1.bf16.msra.mxu1 %v1542_v61  ;;  %2238 = vmatprep.subr.bf16.mxu0 %v1407_v62  ;;  %v1711_v61 = vunpack.c.h.s8.bf16 %v1295_v57  ;;  %v1839_v62 = vunpack.c.h.s8.bf16 %v1359_v58 }
 0x309   : > { %2277 = vmatprep.subr.bf16.mxu1 %v1535_v63  ;;  %v1294_v63 = vld [vmem:[%s5239_s27 + $0x4e0] sm:$0xff] }
 0x30a   : > { %v1710_v1 = vunpack.c.h.s8.bf16 %v1294_v63 }
 0x30b   : > { %2239 = vmatpush1.bf16.msra.mxu0 %v1406_v2  ;;  %v1838_v2 = vunpack.c.h.s8.bf16 %v1358_v0 }
 0x30c   : > { %2278 = vmatpush1.bf16.msra.mxu1 %v1534_v34  ;;  %2240 = vmatprep.subr.bf16.mxu0 %v1399_v35  ;;  %v5475_v34 = vpop.f32.mrf.mxu0  ;;  %v5477_v35 = vpop.f32.mrf.mxu1 }
 0x30d   : > { %2279 = vmatprep.subr.bf16.mxu1 %v1527_v3  ;;  %v1703_v3 = vunpack.c.l.s8.bf16 %v1295_v57 }
 0x30f   : > { %2241 = vmatpush1.bf16.msra.mxu0 %v1398_v6  ;;  %v1351_v6 = vld [vmem:[%s5239_s27 + $0x6a8] sm:$0xff] }
 0x310   : > { %2280 = vmatpush1.bf16.msra.mxu1 %v1526_v7  ;;  %2242 = vmatprep.subr.bf16.mxu0 %v1519_v9  ;;  %v5481_v9 = vld [vmem:[#allocation2 + $0x30] sm:$0xff]  ;;  %v1815_v26 = vunpack.c.l.s8.bf16 %v1351_v6 }
 0x311   : > { %2281 = vmatprep.subr.bf16.mxu1 %v1647_v41  ;;  %v5484_v41 = vld [vmem:[#allocation2 + $0x18] sm:$0xff] }
 0x313   : > { %2243 = vmatpush2.bf16.msra.mxu0 %v1518_v12  ;;  %v1702_v12 = vunpack.c.l.s8.bf16 %v1294_v63 }
 0x314   : > { %2282 = vmatpush2.bf16.msra.mxu1 %v1646_v15  ;;  %2244 = vmatprep.subr.bf16.mxu0 %v1511_v11  ;;  %v1830_v15 = vunpack.c.l.s8.bf16 %v1358_v0  ;;  %v1695_v11 = vunpack.c.h.s8.bf16 %v1287_v5 }
 0x315   : > { %2283 = vmatprep.subr.bf16.mxu1 %v1639_v18  ;;  %v1823_v18 = vunpack.c.h.s8.bf16 %v1351_v6 }
 0x317   : > { %2245 = vmatpush2.bf16.msra.mxu0 %v1510_v21 }
 0x318   : > { %2284 = vmatpush2.bf16.msra.mxu1 %v1638_v22  ;;  %2246 = vmatprep.subr.bf16.mxu0 %v1503_v23  ;;  %v5492_v22 = vld [vmem:[#allocation2 + $0x20] sm:$0xff]  ;;  %v5495_v23 = vld [vmem:[#allocation2 + $0x38] sm:$0xff] }
 0x319   : > { %2285 = vmatprep.subr.bf16.mxu1 %v1631_v24  ;;  %v1822_v24 = vunpack.c.h.s8.bf16 %v1350_v20 }
 0x31b   : > { %2247 = vmatpush2.bf16.msra.mxu0 %v1502_v27  ;;  %v1279_v27 = vld [vmem:[%s5239_s27 + $0x468] sm:$0xff] }
 0x31c   : > { %2286 = vmatpush2.bf16.msra.mxu1 %v1630_v28  ;;  %2248 = vmatprep.subr.bf16.mxu0 %v1495_v29  ;;  %v1343_v28 = vld [vmem:[%s5239_s27 + $0x668] sm:$0xff]  ;;  %v1686_v29 = vunpack.c.l.s8.bf16 %v1286_v19  ;;  %v1679_v31 = vunpack.c.h.s8.bf16 %v1279_v27  ;;  %v1671_v38 = vunpack.c.l.s8.bf16 %v1279_v27  ;;  %v1374_v27 = vld [vmem:[%s5239_s27 + $0x760] sm:$0xff] }
 0x31d   : > { %2287 = vmatprep.subr.bf16.mxu1 %v1623_v30  ;;  %v1814_v30 = vunpack.c.l.s8.bf16 %v1350_v20  ;;  %v1807_v32 = vunpack.c.h.s8.bf16 %v1343_v28  ;;  %v1799_v39 = vunpack.c.l.s8.bf16 %v1343_v28 }
 0x31f   : > { %2249 = vmatpush2.bf16.msra.mxu0 %v1494_v33  ;;  %v1278_v33 = vld [vmem:[%s5239_s27 + $0x460] sm:$0xff] }
 0x320   : > { %2288 = vmatpush2.bf16.msra.mxu1 %v1622_v37  ;;  %2250 = vmatprep.subr.bf16.mxu0 %v1487_v16  ;;  %v1342_v37 = vld [vmem:[%s5239_s27 + $0x660] sm:$0xff]  ;;  %v1678_v16 = vunpack.c.h.s8.bf16 %v1278_v33 }
 0x321   : > { %2289 = vmatprep.subr.bf16.mxu1 %v1615_v17  ;;  %v1806_v17 = vunpack.c.h.s8.bf16 %v1342_v37 }
 0x323   : > { %2251 = vmatpush2.bf16.msra.mxu0 %v1486_v40  ;;  %v1271_v40 = vld [vmem:[%s5239_s27 + $0x428] sm:$0xff] }
 0x324   : > { %2290 = vmatpush2.bf16.msra.mxu1 %v1614_v14  ;;  %2252 = vmatprep.subr.bf16.mxu0 %v1479_v43  ;;  %v1335_v14 = vld [vmem:[%s5239_s27 + $0x628] sm:$0xff]  ;;  %v1670_v43 = vunpack.c.l.s8.bf16 %v1278_v33  ;;  %v1663_v45 = vunpack.c.h.s8.bf16 %v1271_v40  ;;  %v1655_v51 = vunpack.c.l.s8.bf16 %v1271_v40  ;;  %v1366_v40 = vld [vmem:[%s5239_s27 + $0x720] sm:$0xff] }
 0x325   : > { %2291 = vmatprep.subr.bf16.mxu1 %v1607_v44  ;;  %v1798_v44 = vunpack.c.l.s8.bf16 %v1342_v37  ;;  %v1791_v46 = vunpack.c.h.s8.bf16 %v1335_v14  ;;  %v1783_v52 = vunpack.c.l.s8.bf16 %v1335_v14  ;;  %v1367_v33 = vld [vmem:[%s5239_s27 + $0x728] sm:$0xff] }
 0x327   : > { %2253 = vmatpush2.bf16.msra.mxu0 %v1478_v47  ;;  %v1270_v47 = vld [vmem:[%s5239_s27 + $0x420] sm:$0xff] }
 0x328   : > { %2292 = vmatpush2.bf16.msra.mxu1 %v1606_v48  ;;  %2254 = vmatprep.subr.bf16.mxu0 %v1471_v49  ;;  %v1334_v48 = vld [vmem:[%s5239_s27 + $0x620] sm:$0xff]  ;;  %v1662_v49 = vunpack.c.h.s8.bf16 %v1270_v47 }
 0x329   : > { %2293 = vmatprep.subr.bf16.mxu1 %v1599_v50  ;;  %v1790_v50 = vunpack.c.h.s8.bf16 %v1334_v48 }
 0x32b   : > { %2255 = vmatpush2.bf16.msra.mxu0 %v1470_v53  ;;  %v1327_v53 = vld [vmem:[%s5239_s27 + $0x5e8] sm:$0xff] }
 0x32c   : > { %2294 = vmatpush2.bf16.msra.mxu1 %v1598_v54  ;;  %2256 = vmatprep.subr.bf16.mxu0 %v1463_v55  ;;  %v1391_v54 = vld [vmem:[%s5239_s27 + $0x7e8] sm:$0xff]  ;;  %v1654_v55 = vunpack.c.l.s8.bf16 %v1270_v47  ;;  %v1775_v57 = vunpack.c.h.s8.bf16 %v1327_v53  ;;  %v1767_v63 = vunpack.c.l.s8.bf16 %v1327_v53  ;;  %v1233_v47 = vld [vmem:[%s5239_s27 + $0x2f8] sm:$0xff]  ;;  %v1232_v53 = vld [vmem:[%s5239_s27 + $0x2f0] sm:$0xff] }
 0x32d   : > { %2295 = vmatprep.subr.bf16.mxu1 %v1591_v56  ;;  %v1782_v56 = vunpack.c.l.s8.bf16 %v1334_v48  ;;  %v1903_v58 = vunpack.c.h.s8.bf16 %v1391_v54  ;;  %v1895_v0 = vunpack.c.l.s8.bf16 %v1391_v54 }
 0x32f   : > { %2257 = vmatpush2.bf16.msra.mxu0 %v1462_v59  ;;  %v1326_v59 = vld [vmem:[%s5239_s27 + $0x5e0] sm:$0xff] }
 0x330   : > { %2296 = vmatpush2.bf16.msra.mxu1 %v1590_v60  ;;  %2304 = vmatprep.subr.bf16.mxu0 %v1711_v61  ;;  %v1390_v60 = vld [vmem:[%s5239_s27 + $0x7e0] sm:$0xff]  ;;  %v1774_v61 = vunpack.c.h.s8.bf16 %v1326_v59 }
 0x331   : > { %2343 = vmatprep.subr.bf16.mxu1 %v1839_v62  ;;  %v1902_v62 = vunpack.c.h.s8.bf16 %v1390_v60 }
 0x332   : > { %v2026_v7 = vpop.f32.mrf.mxu0  ;;  %2259 = vmatmul.mubr.f32.vlgmr.msra.gmra.mxu0 %v5481_v9 }
 0x333   : > { %2298 = vmatmul.mubr.f32.vlgmr.msra.gmra.mxu1 %v5484_v41  ;;  %v2065_v42 = vpop.f32.mrf.mxu1  ;;  %v2027_v10 = vadd.f32 %v2026_v7, %v5437_v36  ;;  %2305 = vmatpush1.bf16.msra.mxu0 %v1710_v1  ;;  %v1694_v36 = vunpack.c.h.s8.bf16 %v1286_v19  ;;  %v1319_v1 = vld [vmem:[%s5239_s27 + $0x5a8] sm:$0xff]  ;;  %v1318_v7 = vld [vmem:[%s5239_s27 + $0x5a0] sm:$0xff] }
 0x334   : > { %2344 = vmatpush1.bf16.msra.mxu1 %v1838_v2  ;;  %2306 = vmatprep.subr.bf16.mxu0 %v1703_v3  ;;  %v1383_v2 = vld [vmem:[%s5239_s27 + $0x7a8] sm:$0xff]  ;;  %v1766_v3 = vunpack.c.l.s8.bf16 %v1326_v59  ;;  %v1759_v5 = vunpack.c.h.s8.bf16 %v1319_v1  ;;  %v1750_v20 = vunpack.c.l.s8.bf16 %v1318_v7  ;;  %v1577_v59 = vunpack.c.l.s8.bf16 %v1233_v47 }
 0x335   : > { %2345 = vmatprep.subr.bf16.mxu1 %v1831_v4  ;;  %v5490_v21 = vadd.f32 %v2065_v42, %v2027_v10  ;;  %2336 = vmatprep.mubr.f32.mxu0 %v5492_v22  ;;  %v1894_v4 = vunpack.c.l.s8.bf16 %v1390_v60  ;;  %v1887_v6 = vunpack.c.h.s8.bf16 %v1383_v2  ;;  %v1382_v42 = vld [vmem:[%s5239_s27 + $0x7a0] sm:$0xff]  ;;  %v1758_v10 = vunpack.c.h.s8.bf16 %v1318_v7  ;;  %v1375_v19 = vld [vmem:[%s5239_s27 + $0x768] sm:$0xff]  ;;  %v1161_v60 = vld [vmem:[%s5239_s27 + $0xb8] sm:$0xff] }
 0x336   : > { %2375 = vmatprep.mubr.f32.mxu1 %v5495_v23  ;;  %v1160_v7 = vld [vmem:[%s5239_s27 + $0xb0] sm:$0xff] }
 0x337   : > { %2307 = vmatpush1.bf16.msra.mxu0 %v1702_v12  ;;  %v1886_v12 = vunpack.c.h.s8.bf16 %v1382_v42 }
 0x338   : > { %2346 = vmatpush1.bf16.msra.mxu1 %v1830_v15  ;;  %2308 = vmatprep.subr.bf16.mxu0 %v1695_v11  ;;  %v1751_v15 = vunpack.c.l.s8.bf16 %v1319_v1  ;;  %v1879_v11 = vunpack.c.l.s8.bf16 %v1383_v2  ;;  %v5535_v1 = vld [vmem:[#allocation2 + $0x28] sm:$0xff] }
 0x339   : > { %2347 = vmatprep.subr.bf16.mxu1 %v1823_v18  ;;  %v1311_v18 = vld [vmem:[%s5239_s27 + $0x568] sm:$0xff] }
 0x33b   : > { %2309 = vmatpush1.bf16.msra.mxu0 %v1694_v36  ;;  %v1878_v36 = vunpack.c.l.s8.bf16 %v1382_v42  ;;  %v1224_v42 = vld [vmem:[%s5239_s27 + $0x2b0] sm:$0xff] }
 0x33c   : > { %2348 = vmatpush1.bf16.msra.mxu1 %v1822_v24  ;;  %2310 = vmatprep.subr.bf16.mxu0 %v1687_v25  ;;  %v1743_v24 = vunpack.c.h.s8.bf16 %v1311_v18  ;;  %v1871_v25 = vunpack.c.h.s8.bf16 %v1375_v19 }
 0x33d   : > { %2349 = vmatprep.subr.bf16.mxu1 %v1815_v26  ;;  %v1310_v26 = vld [vmem:[%s5239_s27 + $0x560] sm:$0xff] }
 0x33e   : > { %v1742_v28 = vunpack.c.h.s8.bf16 %v1310_v26  ;;  %v1734_v37 = vunpack.c.l.s8.bf16 %v1310_v26 }
 0x33f   : > { %2311 = vmatpush1.bf16.msra.mxu0 %v1686_v29  ;;  %v1870_v29 = vunpack.c.h.s8.bf16 %v1374_v27 }
 0x340   : > { %2350 = vmatpush1.bf16.msra.mxu1 %v1814_v30  ;;  %2312 = vmatprep.subr.bf16.mxu0 %v1679_v31  ;;  %v1735_v30 = vunpack.c.l.s8.bf16 %v1311_v18  ;;  %v1863_v31 = vunpack.c.l.s8.bf16 %v1375_v19  ;;  %v1153_v18 = vld [vmem:[%s5239_s27 + $0x78] sm:$0xff] }
 0x341   : > { %2351 = vmatprep.subr.bf16.mxu1 %v1807_v32  ;;  %v1303_v32 = vld [vmem:[%s5239_s27 + $0x528] sm:$0xff]  ;;  %v1217_v19 = vld [vmem:[%s5239_s27 + $0x278] sm:$0xff] }
 0x343   : > { %2313 = vmatpush1.bf16.msra.mxu0 %v1678_v16  ;;  %v1862_v16 = vunpack.c.l.s8.bf16 %v1374_v27 }
 0x344   : > { %2352 = vmatpush1.bf16.msra.mxu1 %v1806_v17  ;;  %2314 = vmatprep.subr.bf16.mxu0 %v1671_v38  ;;  %v1727_v17 = vunpack.c.h.s8.bf16 %v1303_v32  ;;  %v1855_v38 = vunpack.c.h.s8.bf16 %v1367_v33 }
 0x345   : > { %2353 = vmatprep.subr.bf16.mxu1 %v1799_v39  ;;  %v1302_v39 = vld [vmem:[%s5239_s27 + $0x520] sm:$0xff] }
 0x346   : > { %v1726_v14 = vunpack.c.h.s8.bf16 %v1302_v39  ;;  %v1718_v48 = vunpack.c.l.s8.bf16 %v1302_v39 }
 0x347   : > { %2315 = vmatpush1.bf16.msra.mxu0 %v1670_v43  ;;  %v1854_v43 = vunpack.c.h.s8.bf16 %v1366_v40 }
 0x348   : > { %2354 = vmatpush1.bf16.msra.mxu1 %v1798_v44  ;;  %2316 = vmatprep.subr.bf16.mxu0 %v1663_v45  ;;  %v1719_v44 = vunpack.c.l.s8.bf16 %v1303_v32  ;;  %v1847_v45 = vunpack.c.l.s8.bf16 %v1367_v33 }
 0x349   : > { %2355 = vmatprep.subr.bf16.mxu1 %v1791_v46  ;;  %v1169_v46 = vld [vmem:[%s5239_s27 + $0xf8] sm:$0xff] }
 0x34b   : > { %2317 = vmatpush1.bf16.msra.mxu0 %v1662_v49  ;;  %v1846_v49 = vunpack.c.l.s8.bf16 %v1366_v40 }
 0x34c   : > { %2356 = vmatpush1.bf16.msra.mxu1 %v1790_v50  ;;  %2318 = vmatprep.subr.bf16.mxu0 %v1655_v51  ;;  %v1457_v50 = vunpack.c.h.s8.bf16 %v1169_v46  ;;  %v1585_v51 = vunpack.c.h.s8.bf16 %v1233_v47 }
 0x34d   : > { %2357 = vmatprep.subr.bf16.mxu1 %v1783_v52  ;;  %v1168_v52 = vld [vmem:[%s5239_s27 + $0xf0] sm:$0xff] }
 0x34e   : > { %v1456_v54 = vunpack.c.h.s8.bf16 %v1168_v52 }
 0x34f   : > { %2319 = vmatpush1.bf16.msra.mxu0 %v1654_v55  ;;  %v1584_v55 = vunpack.c.h.s8.bf16 %v1232_v53 }
 0x350   : > { %2358 = vmatpush1.bf16.msra.mxu1 %v1782_v56  ;;  %2320 = vmatprep.subr.bf16.mxu0 %v1775_v57  ;;  %v5526_v56 = vpop.f32.mrf.mxu0  ;;  %v5528_v57 = vpop.f32.mrf.mxu1 }
 0x351   : > { %2359 = vmatprep.subr.bf16.mxu1 %v1903_v58  ;;  %v1449_v58 = vunpack.c.l.s8.bf16 %v1169_v46 }
 0x353   : > { %2321 = vmatpush2.bf16.msra.mxu0 %v1774_v61  ;;  %v1225_v61 = vld [vmem:[%s5239_s27 + $0x2b8] sm:$0xff] }
 0x354   : > { %2360 = vmatpush2.bf16.msra.mxu1 %v1902_v62  ;;  %2322 = vmatprep.subr.bf16.mxu0 %v1767_v63 }
 0x355   : > { %2361 = vmatprep.subr.bf16.mxu1 %v1895_v0  ;;  %v5532_v0 = vld [vmem:[#allocation2 + $0x8] sm:$0xff] }
 0x357   : > { %2323 = vmatpush2.bf16.msra.mxu0 %v1766_v3  ;;  %v1448_v3 = vunpack.c.l.s8.bf16 %v1168_v52 }
 0x358   : > { %2362 = vmatpush2.bf16.msra.mxu1 %v1894_v4  ;;  %2324 = vmatprep.subr.bf16.mxu0 %v1759_v5  ;;  %v1576_v4 = vunpack.c.l.s8.bf16 %v1232_v53  ;;  %v1441_v5 = vunpack.c.h.s8.bf16 %v1161_v60 }
 0x359   : > { %2363 = vmatprep.subr.bf16.mxu1 %v1887_v6  ;;  %v1569_v6 = vunpack.c.h.s8.bf16 %v1225_v61 }
 0x35b   : > { %2325 = vmatpush2.bf16.msra.mxu0 %v1758_v10  ;;  %v1440_v10 = vunpack.c.h.s8.bf16 %v1160_v7 }
 0x35c   : > { %2364 = vmatpush2.bf16.msra.mxu1 %v1886_v12  ;;  %2326 = vmatprep.subr.bf16.mxu0 %v1751_v15  ;;  %v1568_v12 = vunpack.c.h.s8.bf16 %v1224_v42  ;;  %v1433_v15 = vunpack.c.l.s8.bf16 %v1161_v60 }
 0x35d   : > { %2365 = vmatprep.subr.bf16.mxu1 %v1879_v11  ;;  %v1561_v11 = vunpack.c.l.s8.bf16 %v1225_v61 }
 0x35f   : > { %2327 = vmatpush2.bf16.msra.mxu0 %v1750_v20  ;;  %v1432_v20 = vunpack.c.l.s8.bf16 %v1160_v7 }
 0x360   : > { %2366 = vmatpush2.bf16.msra.mxu1 %v1878_v36  ;;  %2328 = vmatprep.subr.bf16.mxu0 %v1743_v24  ;;  %v1560_v36 = vunpack.c.l.s8.bf16 %v1224_v42  ;;  %v1152_v24 = vld [vmem:[%s5239_s27 + $0x70] sm:$0xff] }
 0x361   : > { %2367 = vmatprep.subr.bf16.mxu1 %v1871_v25  ;;  %v1216_v25 = vld [vmem:[%s5239_s27 + $0x270] sm:$0xff]  ;;  %v1424_v26 = vunpack.c.h.s8.bf16 %v1152_v24  ;;  %v1416_v32 = vunpack.c.l.s8.bf16 %v1152_v24 }
 0x362   : > { %v1552_v27 = vunpack.c.h.s8.bf16 %v1216_v25  ;;  %v1544_v33 = vunpack.c.l.s8.bf16 %v1216_v25 }
 0x363   : > { %2329 = vmatpush2.bf16.msra.mxu0 %v1742_v28  ;;  %v1417_v28 = vunpack.c.l.s8.bf16 %v1153_v18 }
 0x364   : > { %2368 = vmatpush2.bf16.msra.mxu1 %v1870_v29  ;;  %2330 = vmatprep.subr.bf16.mxu0 %v1735_v30  ;;  %v1545_v29 = vunpack.c.l.s8.bf16 %v1217_v19  ;;  %v1145_v30 = vld [vmem:[%s5239_s27 + $0x38] sm:$0xff] }
 0x365   : > { %2369 = vmatprep.subr.bf16.mxu1 %v1863_v31  ;;  %v1209_v31 = vld [vmem:[%s5239_s27 + $0x238] sm:$0xff] }
 0x367   : > { %2331 = vmatpush2.bf16.msra.mxu0 %v1734_v37  ;;  %v1409_v37 = vunpack.c.h.s8.bf16 %v1145_v30 }
 0x368   : > { %2370 = vmatpush2.bf16.msra.mxu1 %v1862_v16  ;;  %2332 = vmatprep.subr.bf16.mxu0 %v1727_v17  ;;  %v1537_v16 = vunpack.c.h.s8.bf16 %v1209_v31  ;;  %v1144_v17 = vld [vmem:[%s5239_s27 + $0x30] sm:$0xff] }
 0x369   : > { %2371 = vmatprep.subr.bf16.mxu1 %v1855_v38  ;;  %v1208_v38 = vld [vmem:[%s5239_s27 + $0x230] sm:$0xff]  ;;  %v1408_v39 = vunpack.c.h.s8.bf16 %v1144_v17  ;;  %v1400_v46 = vunpack.c.l.s8.bf16 %v1144_v17 }
 0x36a   : > { %v1536_v40 = vunpack.c.h.s8.bf16 %v1208_v38  ;;  %v1528_v47 = vunpack.c.l.s8.bf16 %v1208_v38 }
 0x36b   : > { %2333 = vmatpush2.bf16.msra.mxu0 %v1726_v14  ;;  %v1401_v14 = vunpack.c.l.s8.bf16 %v1145_v30 }
 0x36c   : > { %2372 = vmatpush2.bf16.msra.mxu1 %v1854_v43  ;;  %2334 = vmatprep.subr.bf16.mxu0 %v1719_v44  ;;  %v1529_v43 = vunpack.c.l.s8.bf16 %v1209_v31  ;;  %v1201_v44 = vld [vmem:[%s5239_s27 + $0x1f8] sm:$0xff] }
 0x36d   : > { %2373 = vmatprep.subr.bf16.mxu1 %v1847_v45  ;;  %v1265_v45 = vld [vmem:[%s5239_s27 + $0x3f8] sm:$0xff] }
 0x36f   : > { %2335 = vmatpush2.bf16.msra.mxu0 %v1718_v48  ;;  %v1521_v48 = vunpack.c.h.s8.bf16 %v1201_v44 }
 0x370   : > { %2374 = vmatpush2.bf16.msra.mxu1 %v1846_v49  ;;  %2382 = vmatprep.subr.bf16.mxu0 %v1457_v50  ;;  %v1649_v49 = vunpack.c.h.s8.bf16 %v1265_v45  ;;  %v1200_v50 = vld [vmem:[%s5239_s27 + $0x1f0] sm:$0xff] }
 0x371   : > { %2421 = vmatprep.subr.bf16.mxu1 %v1585_v51  ;;  %v1264_v51 = vld [vmem:[%s5239_s27 + $0x3f0] sm:$0xff]  ;;  %v1520_v52 = vunpack.c.h.s8.bf16 %v1200_v50  ;;  %v1512_v60 = vunpack.c.l.s8.bf16 %v1200_v50 }
 0x372   : > { %v2104_v62 = vpop.f32.mrf.mxu0  ;;  %2337 = vmatmul.mubr.f32.vlgmr.msra.gmra.mxu0 %v5532_v0  ;;  %v1648_v53 = vunpack.c.h.s8.bf16 %v1264_v51  ;;  %v1640_v61 = vunpack.c.l.s8.bf16 %v1264_v51 }
 0x373   : > { %v2143_v63 = vpop.f32.mrf.mxu1  ;;  %2376 = vmatmul.mubr.f32.vlgmr.msra.gmra.mxu1 %v5535_v1  ;;  %2383 = vmatpush1.bf16.msra.mxu0 %v1456_v54  ;;  %v1513_v54 = vunpack.c.l.s8.bf16 %v1201_v44 }
 0x374   : > { %v5538_v2 = vadd.f32 %v2143_v63, %v2104_v62  ;;  %2422 = vmatpush1.bf16.msra.mxu1 %v1584_v55  ;;  %2384 = vmatprep.subr.bf16.mxu0 %v1449_v58  ;;  %v1641_v55 = vunpack.c.l.s8.bf16 %v1265_v45  ;;  %v1193_v58 = vld [vmem:[%s5239_s27 + $0x1b8] sm:$0xff]  ;;  %v5572_v50 = vpop.f32.mrf.mxu0 }
 0x375   : > { %2423 = vmatprep.subr.bf16.mxu1 %v1577_v59  ;;  %2414 = vmatprep.mubr.f32.mxu0 %v5441_v8  ;;  %v1425_v8 = vunpack.c.h.s8.bf16 %v1153_v18  ;;  %v1257_v59 = vld [vmem:[%s5239_s27 + $0x3b8] sm:$0xff]  ;;  %v1505_v62 = vunpack.c.h.s8.bf16 %v1193_v58  ;;  %v1497_v7 = vunpack.c.l.s8.bf16 %v1193_v58  ;;  %v5574_v51 = vpop.f32.mrf.mxu1 }
 0x376   : > { %2453 = vmatprep.mubr.f32.mxu1 %v5444_v13  ;;  %v1553_v13 = vunpack.c.h.s8.bf16 %v1217_v19  ;;  %v1633_v63 = vunpack.c.h.s8.bf16 %v1257_v59  ;;  %v1625_v42 = vunpack.c.l.s8.bf16 %v1257_v59 }
 0x377   : > { %2385 = vmatpush1.bf16.msra.mxu0 %v1448_v3  ;;  %v1192_v3 = vld [vmem:[%s5239_s27 + $0x1b0] sm:$0xff] }
 0x378   : > { %2424 = vmatpush1.bf16.msra.mxu1 %v1576_v4  ;;  %2386 = vmatprep.subr.bf16.mxu0 %v1441_v5  ;;  %v1256_v4 = vld [vmem:[%s5239_s27 + $0x3b0] sm:$0xff]  ;;  %v1504_v5 = vunpack.c.h.s8.bf16 %v1192_v3 }
 0x379   : > { %2425 = vmatprep.subr.bf16.mxu1 %v1569_v6  ;;  %v1632_v6 = vunpack.c.h.s8.bf16 %v1256_v4 }
 0x37b   : > { %2387 = vmatpush1.bf16.msra.mxu0 %v1440_v10  ;;  %v1185_v10 = vld [vmem:[%s5239_s27 + $0x178] sm:$0xff] }
 0x37c   : > { %2426 = vmatpush1.bf16.msra.mxu1 %v1568_v12  ;;  %2388 = vmatprep.subr.bf16.mxu0 %v1433_v15  ;;  %v1249_v12 = vld [vmem:[%s5239_s27 + $0x378] sm:$0xff]  ;;  %v1496_v15 = vunpack.c.l.s8.bf16 %v1192_v3  ;;  %v1489_v18 = vunpack.c.h.s8.bf16 %v1185_v10  ;;  %v1481_v24 = vunpack.c.l.s8.bf16 %v1185_v10 }
 0x37d   : > { %2427 = vmatprep.subr.bf16.mxu1 %v1561_v11  ;;  %v1624_v11 = vunpack.c.l.s8.bf16 %v1256_v4  ;;  %v1617_v19 = vunpack.c.h.s8.bf16 %v1249_v12  ;;  %v1609_v25 = vunpack.c.l.s8.bf16 %v1249_v12  ;;  %v1288_v4 = vld [vmem:[%s5239_s27 + $0x4b0] sm:$0xff]  ;;  %v1345_v10 = vld [vmem:[%s5239_s27 + $0x678] sm:$0xff] }
 0x37e   : > { %v1688_v12 = vunpack.c.l.s8.bf16 %v1288_v4 }
 0x37f   : > { %2389 = vmatpush1.bf16.msra.mxu0 %v1432_v20  ;;  %v1184_v20 = vld [vmem:[%s5239_s27 + $0x170] sm:$0xff] }
 0x380   : > { %2428 = vmatpush1.bf16.msra.mxu1 %v1560_v36  ;;  %2390 = vmatprep.subr.bf16.mxu0 %v1425_v8  ;;  %v1248_v36 = vld [vmem:[%s5239_s27 + $0x370] sm:$0xff]  ;;  %v1488_v8 = vunpack.c.h.s8.bf16 %v1184_v20 }
 0x381   : > { %2429 = vmatprep.subr.bf16.mxu1 %v1553_v13  ;;  %v1616_v13 = vunpack.c.h.s8.bf16 %v1248_v36 }
 0x383   : > { %2391 = vmatpush1.bf16.msra.mxu0 %v1424_v26  ;;  %v1177_v26 = vld [vmem:[%s5239_s27 + $0x138] sm:$0xff] }
 0x384   : > { %2430 = vmatpush1.bf16.msra.mxu1 %v1552_v27  ;;  %2392 = vmatprep.subr.bf16.mxu0 %v1417_v28  ;;  %v1241_v27 = vld [vmem:[%s5239_s27 + $0x338] sm:$0xff]  ;;  %v1480_v28 = vunpack.c.l.s8.bf16 %v1184_v20  ;;  %v1473_v30 = vunpack.c.h.s8.bf16 %v1177_v26  ;;  %v1465_v17 = vunpack.c.l.s8.bf16 %v1177_v26 }
 0x385   : > { %2431 = vmatprep.subr.bf16.mxu1 %v1545_v29  ;;  %v1608_v29 = vunpack.c.l.s8.bf16 %v1248_v36  ;;  %v1601_v31 = vunpack.c.h.s8.bf16 %v1241_v27  ;;  %v1593_v38 = vunpack.c.l.s8.bf16 %v1241_v27 }
 0x387   : > { %2393 = vmatpush1.bf16.msra.mxu0 %v1416_v32  ;;  %v1176_v32 = vld [vmem:[%s5239_s27 + $0x130] sm:$0xff] }
 0x388   : > { %2432 = vmatpush1.bf16.msra.mxu1 %v1544_v33  ;;  %2394 = vmatprep.subr.bf16.mxu0 %v1409_v37  ;;  %v1240_v33 = vld [vmem:[%s5239_s27 + $0x330] sm:$0xff]  ;;  %v1472_v37 = vunpack.c.h.s8.bf16 %v1176_v32 }
 0x389   : > { %2433 = vmatprep.subr.bf16.mxu1 %v1537_v16  ;;  %v1600_v16 = vunpack.c.h.s8.bf16 %v1240_v33 }
 0x38b   : > { %2395 = vmatpush1.bf16.msra.mxu0 %v1408_v39  ;;  %v1297_v39 = vld [vmem:[%s5239_s27 + $0x4f8] sm:$0xff] }
 0x38c   : > { %2434 = vmatpush1.bf16.msra.mxu1 %v1536_v40  ;;  %2396 = vmatprep.subr.bf16.mxu0 %v1401_v14  ;;  %v1361_v40 = vld [vmem:[%s5239_s27 + $0x6f8] sm:$0xff]  ;;  %v1464_v14 = vunpack.c.l.s8.bf16 %v1176_v32  ;;  %v1713_v44 = vunpack.c.h.s8.bf16 %v1297_v39 }
 0x38d   : > { %2435 = vmatprep.subr.bf16.mxu1 %v1529_v43  ;;  %v1592_v43 = vunpack.c.l.s8.bf16 %v1240_v33  ;;  %v1841_v45 = vunpack.c.h.s8.bf16 %v1361_v40 }
 0x38f   : > { %2397 = vmatpush1.bf16.msra.mxu0 %v1400_v46  ;;  %v1296_v46 = vld [vmem:[%s5239_s27 + $0x4f0] sm:$0xff] }
 0x390   : > { %2436 = vmatpush1.bf16.msra.mxu1 %v1528_v47  ;;  %2398 = vmatprep.subr.bf16.mxu0 %v1521_v48  ;;  %v1360_v47 = vld [vmem:[%s5239_s27 + $0x6f0] sm:$0xff]  ;;  %v1712_v48 = vunpack.c.h.s8.bf16 %v1296_v46 }
 0x391   : > { %2437 = vmatprep.subr.bf16.mxu1 %v1649_v49  ;;  %v1840_v49 = vunpack.c.h.s8.bf16 %v1360_v47 }
 0x393   : > { %2399 = vmatpush2.bf16.msra.mxu0 %v1520_v52  ;;  %v1705_v52 = vunpack.c.l.s8.bf16 %v1297_v39 }
 0x394   : > { %2438 = vmatpush2.bf16.msra.mxu1 %v1648_v53  ;;  %2400 = vmatprep.subr.bf16.mxu0 %v1513_v54  ;;  %v1833_v53 = vunpack.c.l.s8.bf16 %v1361_v40  ;;  %v1289_v54 = vld [vmem:[%s5239_s27 + $0x4b8] sm:$0xff] }
 0x395   : > { %2439 = vmatprep.subr.bf16.mxu1 %v1641_v55  ;;  %v1353_v55 = vld [vmem:[%s5239_s27 + $0x6b8] sm:$0xff] }
 0x396   : > { %v1825_v3 = vunpack.c.h.s8.bf16 %v1353_v55 }
 0x397   : > { %2401 = vmatpush2.bf16.msra.mxu0 %v1512_v60 }
 0x398   : > { %2440 = vmatpush2.bf16.msra.mxu1 %v1640_v61  ;;  %2402 = vmatprep.subr.bf16.mxu0 %v1505_v62  ;;  %v1704_v61 = vunpack.c.l.s8.bf16 %v1296_v46  ;;  %v1832_v62 = vunpack.c.l.s8.bf16 %v1360_v47 }
 0x399   : > { %2441 = vmatprep.subr.bf16.mxu1 %v1633_v63  ;;  %v1697_v63 = vunpack.c.h.s8.bf16 %v1289_v54 }
 0x39b   : > { %2403 = vmatpush2.bf16.msra.mxu0 %v1504_v5  ;;  %v1352_v5 = vld [vmem:[%s5239_s27 + $0x6b0] sm:$0xff] }
 0x39c   : > { %2442 = vmatpush2.bf16.msra.mxu1 %v1632_v6  ;;  %2404 = vmatprep.subr.bf16.mxu0 %v1497_v7  ;;  %v1817_v7 = vunpack.c.l.s8.bf16 %v1353_v55 }
 0x39d   : > { %2443 = vmatprep.subr.bf16.mxu1 %v1625_v42  ;;  %v1281_v42 = vld [vmem:[%s5239_s27 + $0x478] sm:$0xff] }
 0x39e   : > { %v1673_v36 = vunpack.c.l.s8.bf16 %v1281_v42 }
 0x39f   : > { %2405 = vmatpush2.bf16.msra.mxu0 %v1496_v15  ;;  %v1816_v15 = vunpack.c.l.s8.bf16 %v1352_v5 }
 0x3a0   : > { %2444 = vmatpush2.bf16.msra.mxu1 %v1624_v11  ;;  %2406 = vmatprep.subr.bf16.mxu0 %v1489_v18  ;;  %v1280_v11 = vld [vmem:[%s5239_s27 + $0x470] sm:$0xff] }
 0x3a1   : > { %2445 = vmatprep.subr.bf16.mxu1 %v1617_v19  ;;  %v1344_v18 = vld [vmem:[%s5239_s27 + $0x670] sm:$0xff]  ;;  %v1680_v19 = vunpack.c.h.s8.bf16 %v1280_v11 }
 0x3a2   : > { %v1808_v20 = vunpack.c.h.s8.bf16 %v1344_v18  ;;  %v1800_v26 = vunpack.c.l.s8.bf16 %v1344_v18 }
 0x3a3   : > { %2407 = vmatpush2.bf16.msra.mxu0 %v1488_v8  ;;  %v1801_v8 = vunpack.c.l.s8.bf16 %v1345_v10 }
 0x3a4   : > { %2446 = vmatpush2.bf16.msra.mxu1 %v1616_v13  ;;  %2408 = vmatprep.subr.bf16.mxu0 %v1481_v24  ;;  %v1273_v13 = vld [vmem:[%s5239_s27 + $0x438] sm:$0xff] }
 0x3a5   : > { %2447 = vmatprep.subr.bf16.mxu1 %v1609_v25  ;;  %v1337_v24 = vld [vmem:[%s5239_s27 + $0x638] sm:$0xff]  ;;  %v1672_v25 = vunpack.c.l.s8.bf16 %v1280_v11  ;;  %v1665_v27 = vunpack.c.h.s8.bf16 %v1273_v13  ;;  %v1657_v33 = vunpack.c.l.s8.bf16 %v1273_v13  ;;  %v1376_v11 = vld [vmem:[%s5239_s27 + $0x770] sm:$0xff] }
 0x3a7   : > { %2409 = vmatpush2.bf16.msra.mxu0 %v1480_v28  ;;  %v1793_v28 = vunpack.c.h.s8.bf16 %v1337_v24 }
 0x3a8   : > { %2448 = vmatpush2.bf16.msra.mxu1 %v1608_v29  ;;  %2410 = vmatprep.subr.bf16.mxu0 %v1473_v30  ;;  %v1272_v29 = vld [vmem:[%s5239_s27 + $0x430] sm:$0xff] }
 0x3a9   : > { %2449 = vmatprep.subr.bf16.mxu1 %v1601_v31  ;;  %v1336_v30 = vld [vmem:[%s5239_s27 + $0x630] sm:$0xff]  ;;  %v1664_v31 = vunpack.c.h.s8.bf16 %v1272_v29 }
 0x3aa   : > { %v1792_v32 = vunpack.c.h.s8.bf16 %v1336_v30  ;;  %v1784_v39 = vunpack.c.l.s8.bf16 %v1336_v30  ;;  %v1864_v30 = vunpack.c.l.s8.bf16 %v1376_v11 }
 0x3ab   : > { %2411 = vmatpush2.bf16.msra.mxu0 %v1472_v37  ;;  %v1785_v37 = vunpack.c.l.s8.bf16 %v1337_v24 }
 0x3ac   : > { %2450 = vmatpush2.bf16.msra.mxu1 %v1600_v16  ;;  %2412 = vmatprep.subr.bf16.mxu0 %v1465_v17  ;;  %v1329_v16 = vld [vmem:[%s5239_s27 + $0x5f8] sm:$0xff] }
 0x3ad   : > { %2451 = vmatprep.subr.bf16.mxu1 %v1593_v38  ;;  %v1393_v17 = vld [vmem:[%s5239_s27 + $0x7f8] sm:$0xff]  ;;  %v1656_v38 = vunpack.c.l.s8.bf16 %v1272_v29  ;;  %v1777_v40 = vunpack.c.h.s8.bf16 %v1329_v16  ;;  %v1769_v47 = vunpack.c.l.s8.bf16 %v1329_v16 }
 0x3af   : > { %2413 = vmatpush2.bf16.msra.mxu0 %v1464_v14  ;;  %v1905_v14 = vunpack.c.h.s8.bf16 %v1393_v17 }
 0x3b0   : > { %2452 = vmatpush2.bf16.msra.mxu1 %v1592_v43  ;;  %2460 = vmatprep.subr.bf16.mxu0 %v1713_v44  ;;  %v1328_v43 = vld [vmem:[%s5239_s27 + $0x5f0] sm:$0xff] }
 0x3b1   : > { %2499 = vmatprep.subr.bf16.mxu1 %v1841_v45  ;;  %v1392_v44 = vld [vmem:[%s5239_s27 + $0x7f0] sm:$0xff]  ;;  %v1776_v45 = vunpack.c.h.s8.bf16 %v1328_v43 }
 0x3b2   : > { %v2182_v58 = vpop.f32.mrf.mxu0  ;;  %2415 = vmatmul.mubr.f32.vlgmr.msra.gmra.mxu0 %v5481_v9  ;;  %v1696_v9 = vunpack.c.h.s8.bf16 %v1288_v4  ;;  %v1904_v46 = vunpack.c.h.s8.bf16 %v1392_v44 }
 0x3b3   : > { %2454 = vmatmul.mubr.f32.vlgmr.msra.gmra.mxu1 %v5484_v41  ;;  %v2221_v59 = vpop.f32.mrf.mxu1  ;;  %v2183_v60 = vadd.f32 %v2182_v58, %v5538_v2  ;;  %2461 = vmatpush1.bf16.msra.mxu0 %v1712_v48  ;;  %v1824_v41 = vunpack.c.h.s8.bf16 %v1352_v5  ;;  %v1689_v2 = vunpack.c.l.s8.bf16 %v1289_v54  ;;  %v1897_v48 = vunpack.c.l.s8.bf16 %v1393_v17  ;;  %v1313_v5 = vld [vmem:[%s5239_s27 + $0x578] sm:$0xff] }
 0x3b4   : > { %2500 = vmatpush1.bf16.msra.mxu1 %v1840_v49  ;;  %2462 = vmatprep.subr.bf16.mxu0 %v1705_v52  ;;  %v1321_v49 = vld [vmem:[%s5239_s27 + $0x5b8] sm:$0xff]  ;;  %v1896_v54 = vunpack.c.l.s8.bf16 %v1392_v44 }
 0x3b5   : > { %2501 = vmatprep.subr.bf16.mxu1 %v1833_v53  ;;  %v5583_v6 = vadd.f32 %v2221_v59, %v2183_v60  ;;  %2492 = vmatprep.mubr.f32.mxu0 %v5492_v22  ;;  %v1681_v22 = vunpack.c.h.s8.bf16 %v1281_v42  ;;  %v1385_v52 = vld [vmem:[%s5239_s27 + $0x7b8] sm:$0xff]  ;;  %v1768_v53 = vunpack.c.l.s8.bf16 %v1328_v43  ;;  %v1761_v55 = vunpack.c.h.s8.bf16 %v1321_v49  ;;  %v1320_v59 = vld [vmem:[%s5239_s27 + $0x5b0] sm:$0xff] }
 0x3b6   : > { %2531 = vmatprep.mubr.f32.mxu1 %v5495_v23  ;;  %v1809_v23 = vunpack.c.h.s8.bf16 %v1345_v10  ;;  %v1889_v58 = vunpack.c.h.s8.bf16 %v1385_v52  ;;  %v1384_v60 = vld [vmem:[%s5239_s27 + $0x7b0] sm:$0xff]  ;;  %v1881_v4 = vunpack.c.l.s8.bf16 %v1385_v52  ;;  %v1752_v42 = vunpack.c.l.s8.bf16 %v1320_v59 }
 0x3b7   : > { %2463 = vmatpush1.bf16.msra.mxu0 %v1704_v61  ;;  %v2540_v61 = vlaneseq  ;;  %v1880_v10 = vunpack.c.l.s8.bf16 %v1384_v60 }
 0x3b8   : > { %2502 = vmatpush1.bf16.msra.mxu1 %v1832_v62  ;;  %2464 = vmatprep.subr.bf16.mxu0 %v1697_v63  ;;  %v1760_v62 = vunpack.c.h.s8.bf16 %v1320_v59  ;;  %v1888_v63 = vunpack.c.h.s8.bf16 %v1384_v60  ;;  %v2734_v59 = vld [vmem:[%s5253_s12 + $0x2c0] sm:$0xff] }
 0x3b9   : > { %2503 = vmatprep.subr.bf16.mxu1 %v1825_v3  ;;  %v1753_v3 = vunpack.c.l.s8.bf16 %v1321_v49 }
 0x3bb   : > { %2465 = vmatpush1.bf16.msra.mxu0 %v1696_v9  ;;  %v1377_v9 = vld [vmem:[%s5239_s27 + $0x778] sm:$0xff] }
 0x3bc   : > { %2504 = vmatpush1.bf16.msra.mxu1 %v1824_v41  ;;  %2466 = vmatprep.subr.bf16.mxu0 %v1689_v2  ;;  %v1990_v41 = vadd.f32 %v5477_v35, %v5475_v34  ;;  %v5607_v2 = vshrl.u32 %v2540_v61, 7 }
 0x3bd   : > { %2505 = vmatprep.subr.bf16.mxu1 %v1817_v7  ;;  %v2184_v7 = vpop.f32.mrf.mxu0 }
 0x3be   : > { %v2029_v18 = vadd.f32 %v5526_v56, %v1990_v41  ;;  %v5615_v34 = vsub.s32 1, %v5607_v2  ;;  %v1737_v56 = vunpack.c.l.s8.bf16 %v1313_v5  ;;  %v2727_v41 = vld [vmem:[%s5253_s12 + $0x288] sm:$0xff] }
 0x3bf   : > { %2467 = vmatpush1.bf16.msra.mxu0 %v1688_v12  ;;  %v2146_v12 = vadd.f32 %v5574_v51, %v5572_v50  ;;  %v1872_v51 = vunpack.c.h.s8.bf16 %v1376_v11  ;;  %v3063_v11 = vunpack.c.l.s8.bf16 %v2727_v41 }
 0x3c0   : > { %2506 = vmatpush1.bf16.msra.mxu1 %v1816_v15  ;;  %2468 = vmatprep.subr.bf16.mxu0 %v1681_v22  ;;  %v1745_v15 = vunpack.c.h.s8.bf16 %v1313_v5  ;;  %v1873_v22 = vunpack.c.h.s8.bf16 %v1377_v9  ;;  %v2068_v13 = vadd.f32 %v5528_v57, %v2029_v18  ;;  %v2663_v5 = vld [vmem:[%s5253_s12 + $0x88] sm:$0xff] }
 0x3c1   : > { %2507 = vmatprep.subr.bf16.mxu1 %v1809_v23  ;;  %v1312_v23 = vld [vmem:[%s5239_s27 + $0x570] sm:$0xff]  ;;  %v2185_v35 = vadd.f32 %v2184_v7, %v2146_v12  ;;  %v2662_v12 = vld [vmem:[%s5253_s12 + $0x80] sm:$0xff]  ;;  %v2655_v18 = vld [vmem:[%s5253_s12 + $0x48] sm:$0xff] }
 0x3c2   : > { %v1744_v50 = vunpack.c.h.s8.bf16 %v1312_v23  ;;  %v1736_v29 = vunpack.c.l.s8.bf16 %v1312_v23  ;;  %v2935_v23 = vunpack.c.l.s8.bf16 %v2663_v5 }
 0x3c3   : > { %2469 = vmatpush1.bf16.msra.mxu0 %v1680_v19  ;;  %v5618_v19 = vsub.s32 3, %v5607_v2 }
 0x3c4   : > { %2508 = vmatpush1.bf16.msra.mxu1 %v1808_v20  ;;  %2470 = vmatprep.subr.bf16.mxu0 %v1673_v36  ;;  %v2223_v20 = vpop.f32.mrf.mxu1  ;;  %v5622_v36 = vld [vmem:[%s443_s18] sm:$0xff] }
 0x3c5   : > { %2509 = vmatprep.subr.bf16.mxu1 %v1801_v8  ;;  %v1865_v8 = vunpack.c.l.s8.bf16 %v1377_v9  ;;  %v2547_v24 = vrot.slane %v5622_v36, %v5615_v34 }
 0x3c7   : > { %2471 = vmatpush1.bf16.msra.mxu0 %v1672_v25  ;;  %v1305_v25 = vld [vmem:[%s5239_s27 + $0x538] sm:$0xff]  ;;  %v2581_v16 = vmul.f32 %v2547_v24, %v2068_v13  ;;  %v2718_v13 = vld [vmem:[%s5253_s12 + $0x240] sm:$0xff] }
 0x3c8   : > { %2510 = vmatpush1.bf16.msra.mxu1 %v1800_v26  ;;  %2472 = vmatprep.subr.bf16.mxu0 %v1665_v27  ;;  %v1369_v26 = vld [vmem:[%s5239_s27 + $0x738] sm:$0xff]  ;;  %v2224_v27 = vadd.f32 %v2223_v20, %v2185_v35  ;;  %v1729_v57 = vunpack.c.h.s8.bf16 %v1305_v25  ;;  %v1721_v43 = vunpack.c.l.s8.bf16 %v1305_v25  ;;  %v2719_v35 = vld [vmem:[%s5253_s12 + $0x248] sm:$0xff]  ;;  %v2934_v20 = vunpack.c.l.s8.bf16 %v2662_v12 }
 0x3c9   : > { %2511 = vmatprep.subr.bf16.mxu1 %v1793_v28  ;;  %v2555_v28 = vrot.slane %v5622_v36, %v5618_v19  ;;  %v1849_v44 = vunpack.c.l.s8.bf16 %v1369_v26  ;;  %v3054_v25 = vunpack.c.h.s8.bf16 %v2718_v13 }
 0x3cb   : > { %2473 = vmatpush1.bf16.msra.mxu0 %v1664_v31  ;;  %v5633_v31 = vld [vmem:[%s452_s28] sm:$0xff] }
 0x3cc   : > { %2512 = vmatpush1.bf16.msra.mxu1 %v1792_v32  ;;  %2474 = vmatprep.subr.bf16.mxu0 %v1657_v33  ;;  %v1857_v32 = vunpack.c.h.s8.bf16 %v1369_v26  ;;  %v1304_v33 = vld [vmem:[%s5239_s27 + $0x530] sm:$0xff]  ;;  %v2597_v17 = vrot.slane %v5633_v31, %v5615_v34  ;;  %v2919_v26 = vunpack.c.l.s8.bf16 %v2655_v18 }
 0x3cd   : > { %2513 = vmatprep.subr.bf16.mxu1 %v1785_v37  ;;  %v1368_v37 = vld [vmem:[%s5239_s27 + $0x730] sm:$0xff]  ;;  %v1720_v49 = vunpack.c.l.s8.bf16 %v1304_v33 }
 0x3ce   : > { %v1848_v52 = vunpack.c.l.s8.bf16 %v1368_v37 }
 0x3cf   : > { %2475 = vmatpush1.bf16.msra.mxu0 %v1656_v38  ;;  %v2583_v38 = vmul.f32 %v2555_v28, %v2224_v27  ;;  %v3047_v27 = vunpack.c.l.s8.bf16 %v2719_v35  ;;  %v2647_v28 = vld [vmem:[%s5253_s12 + $0x8] sm:$0xff] }
 0x3d0   : > { %2514 = vmatpush1.bf16.msra.mxu1 %v1784_v39  ;;  %2476 = vmatprep.subr.bf16.mxu0 %v1777_v40  ;;  %v2605_v39 = vrot.slane %v5633_v31, %v5618_v19  ;;  %v1728_v40 = vunpack.c.h.s8.bf16 %v1304_v33  ;;  %v2646_v33 = vld [vmem:[%s5253_s12] sm:$0xff] }
 0x3d1   : > { %2515 = vmatprep.subr.bf16.mxu1 %v1905_v14  ;;  %v1856_v14 = vunpack.c.h.s8.bf16 %v1368_v37 }
 0x3d3   : > { %2477 = vmatpush2.bf16.msra.mxu0 %v1776_v45  ;;  %v2631_v45 = vadd.f32 %v2597_v17, %v2581_v16  ;;  %v2710_v16 = vld [vmem:[%s5253_s12 + $0x200] sm:$0xff]  ;;  %v2910_v17 = vunpack.c.h.s8.bf16 %v2646_v33 }
 0x3d4   : > { %2516 = vmatpush2.bf16.msra.mxu1 %v1904_v46  ;;  %2478 = vmatprep.subr.bf16.mxu0 %v1769_v47  ;;  %v2671_v46 = vld [vmem:[%s5253_s12 + $0xc8] sm:$0xff] }
 0x3d5   : > { %2517 = vmatprep.subr.bf16.mxu1 %v1897_v48  ;;  %v2735_v47 = vld [vmem:[%s5253_s12 + $0x2c8] sm:$0xff]  ;;  %v2633_v48 = vadd.f32 %v2605_v39, %v2583_v38  ;;  %v3038_v38 = vunpack.c.h.s8.bf16 %v2710_v16  ;;  %v2903_v39 = vunpack.c.l.s8.bf16 %v2647_v28 }
 0x3d7   : > { %2479 = vmatpush2.bf16.msra.mxu0 %v1768_v53  ;;  %v2959_v53 = vunpack.c.h.s8.bf16 %v2671_v46  ;;  %v2641_v60 = vmax.f32 %v2633_v48, 0.0 }
 0x3d8   : > { %2518 = vmatpush2.bf16.msra.mxu1 %v1896_v54  ;;  %2480 = vmatprep.subr.bf16.mxu0 %v1761_v55  ;;  %v3087_v54 = vunpack.c.h.s8.bf16 %v2735_v47  ;;  %v2670_v55 = vld [vmem:[%s5253_s12 + $0xc0] sm:$0xff] }
 0x3d9   : > { %2519 = vmatprep.subr.bf16.mxu1 %v1889_v58  ;;  %v2639_v58 = vmax.f32 %v2631_v45, 0.0  ;;  %v2958_v61 = vunpack.c.h.s8.bf16 %v2670_v55  ;;  %v5648_v9 = vpack.c.bf16 %v2641_v60, %v2641_v60  ;;  %v2950_v7 = vunpack.c.l.s8.bf16 %v2670_v55 }
 0x3da   : > { %v3030_v45 = vunpack.c.l.s8.bf16 %v2710_v16 }
 0x3db   : > { %2481 = vmatpush2.bf16.msra.mxu0 %v1760_v62  ;;  %v3086_v62 = vunpack.c.h.s8.bf16 %v2734_v59 }
 0x3dc   : > { %2520 = vmatpush2.bf16.msra.mxu1 %v1888_v63  ;;  %2482 = vmatprep.subr.bf16.mxu0 %v1753_v3  ;;  %v5645_v63 = vpack.c.bf16 %v2639_v58, %v2639_v58  ;;  %v2951_v3 = vunpack.c.l.s8.bf16 %v2671_v46  ;;  %v2695_v58 = vld [vmem:[%s5253_s12 + $0x188] sm:$0xff] }
 0x3dd   : > { %2521 = vmatprep.subr.bf16.mxu1 %v1881_v4  ;;  %v3079_v4 = vunpack.c.l.s8.bf16 %v2735_v47  ;;  %v2702_v47 = vld [vmem:[%s5253_s12 + $0x1c0] sm:$0xff] }
 0x3de   : > { %v3014_v60 = vunpack.c.l.s8.bf16 %v2702_v47 }
 0x3df   : > { %2483 = vmatpush2.bf16.msra.mxu0 %v1752_v42  ;;  %v3078_v42 = vunpack.c.l.s8.bf16 %v2734_v59  ;;  %v2759_v59 = vld [vmem:[%s5253_s12 + $0x388] sm:$0xff] }
 0x3e0   : > { %2522 = vmatpush2.bf16.msra.mxu1 %v1880_v10  ;;  %2484 = vmatprep.subr.bf16.mxu0 %v1745_v15  ;;  %v2943_v10 = vunpack.c.h.s8.bf16 %v2663_v5  ;;  %v3071_v15 = vunpack.c.h.s8.bf16 %v2727_v41  ;;  %v2758_v5 = vld [vmem:[%s5253_s12 + $0x380] sm:$0xff] }
 0x3e1   : > { %2523 = vmatprep.subr.bf16.mxu1 %v1873_v22  ;;  %v2726_v22 = vld [vmem:[%s5253_s12 + $0x280] sm:$0xff] }
 0x3e3   : > { %2485 = vmatpush2.bf16.msra.mxu0 %v1744_v50  ;;  %v3062_v50 = vunpack.c.l.s8.bf16 %v2726_v22 }
 0x3e4   : > { %2524 = vmatpush2.bf16.msra.mxu1 %v1872_v51  ;;  %2486 = vmatprep.subr.bf16.mxu0 %v1737_v56  ;;  %v2927_v51 = vunpack.c.h.s8.bf16 %v2655_v18  ;;  %v2654_v56 = vld [vmem:[%s5253_s12 + $0x40] sm:$0xff]  ;;  %v5680_v18 = vsub.s32 2, %v5607_v2 }
 0x3e5   : > { %2525 = vmatprep.subr.bf16.mxu1 %v1865_v8  ;;  %v3055_v8 = vunpack.c.h.s8.bf16 %v2719_v35  ;;  %v2926_v24 = vunpack.c.h.s8.bf16 %v2654_v56 }
 0x3e7   : > { %2487 = vmatpush2.bf16.msra.mxu0 %v1736_v29  ;;  %v2711_v29 = vld [vmem:[%s5253_s12 + $0x208] sm:$0xff] }
 0x3e8   : > { %2526 = vmatpush2.bf16.msra.mxu1 %v1864_v30  ;;  %2488 = vmatprep.subr.bf16.mxu0 %v1729_v57  ;;  %v2918_v30 = vunpack.c.l.s8.bf16 %v2654_v56  ;;  %v3046_v57 = vunpack.c.l.s8.bf16 %v2718_v13  ;;  %v3039_v37 = vunpack.c.h.s8.bf16 %v2711_v29  ;;  %v2551_v13 = vrot.slane %v5622_v36, %v5680_v18 }
 0x3e9   : > { %2527 = vmatprep.subr.bf16.mxu1 %v1857_v32  ;;  %v2911_v32 = vunpack.c.h.s8.bf16 %v2647_v28 }
 0x3eb   : > { %2489 = vmatpush2.bf16.msra.mxu0 %v1728_v40  ;;  %v3031_v40 = vunpack.c.l.s8.bf16 %v2711_v29 }
 0x3ec   : > { %2528 = vmatpush2.bf16.msra.mxu1 %v1856_v14  ;;  %2490 = vmatprep.subr.bf16.mxu0 %v1721_v43  ;;  %v2703_v14 = vld [vmem:[%s5253_s12 + $0x1c8] sm:$0xff] }
 0x3ed   : > { %2529 = vmatprep.subr.bf16.mxu1 %v1849_v44  ;;  %v2767_v43 = vld [vmem:[%s5253_s12 + $0x3c8] sm:$0xff]  ;;  %v2902_v44 = vunpack.c.l.s8.bf16 %v2646_v33  ;;  %v3023_v46 = vunpack.c.h.s8.bf16 %v2703_v14  ;;  %v2582_v33 = vmul.f32 %v2551_v13, %v5583_v6  ;;  %v2854_v13 = vld [vmem:[%s5253_s12 + $0x680] sm:$0xff] }
 0x3ee   : > { %v3151_v48 = vunpack.c.h.s8.bf16 %v2767_v43  ;;  %v3143_v55 = vunpack.c.l.s8.bf16 %v2767_v43  ;;  %v2799_v6 = vld [vmem:[%s5253_s12 + $0x4c8] sm:$0xff] }
 0x3ef   : > { %2491 = vmatpush2.bf16.msra.mxu0 %v1720_v49  ;;  %v2766_v49 = vld [vmem:[%s5253_s12 + $0x3c0] sm:$0xff] }
 0x3f0   : > { %2530 = vmatpush2.bf16.msra.mxu1 %v1848_v52  ;;  %3430 = vmatprep.subr.bf16.mxu0 %v2959_v53  ;;  %v3022_v52 = vunpack.c.h.s8.bf16 %v2702_v47  ;;  %v3150_v53 = vunpack.c.h.s8.bf16 %v2766_v49 }
 0x3f1   : > { %3471 = vmatprep.subr.bf16.mxu1 %v3087_v54  ;;  %v3015_v54 = vunpack.c.l.s8.bf16 %v2703_v14 }
 0x3f2   : > { %2493 = vmatmul.mubr.f32.vlgmr.msra.gmra.mxu0 %v5532_v0  ;;  %v2942_v0 = vunpack.c.h.s8.bf16 %v2662_v12  ;;  %v2687_v12 = vld [vmem:[%s5253_s12 + $0x148] sm:$0xff]  ;;  %v5699_v47 = vpop.f32.mrf.mxu0 }
 0x3f3   : > { %2532 = vmatmul.mubr.f32.vlgmr.msra.gmra.mxu1 %v5535_v1  ;;  %3431 = vmatpush1.bf16.msra.mxu0 %v2958_v61  ;;  %v3070_v1 = vunpack.c.h.s8.bf16 %v2726_v22  ;;  %v3142_v61 = vunpack.c.l.s8.bf16 %v2766_v49 }
 0x3f4   : > { %3462 = vmatprep.mubr.bf16.mxu0 %v5645_v63  ;;  %3472 = vmatpush1.bf16.msra.mxu1 %v3086_v62  ;;  %v3007_v62 = vunpack.c.h.s8.bf16 %v2695_v58 }
 0x3f5   : > { %3503 = vmatprep.mubr.bf16.mxu1 %v5648_v9  ;;  %3432 = vmatprep.subr.bf16.mxu0 %v2951_v3  ;;  %v2694_v3 = vld [vmem:[%s5253_s12 + $0x180] sm:$0xff] }
 0x3f6   : > { %3473 = vmatprep.subr.bf16.mxu1 %v3079_v4  ;;  %v3135_v4 = vunpack.c.h.s8.bf16 %v2759_v59  ;;  %v3006_v41 = vunpack.c.h.s8.bf16 %v2694_v3  ;;  %v2998_v22 = vunpack.c.l.s8.bf16 %v2694_v3  ;;  %v3207_v3 = vunpack.c.l.s8.bf16 %v2799_v6 }
 0x3f7   : > { %3433 = vmatpush1.bf16.msra.mxu0 %v2950_v7  ;;  %v3134_v7 = vunpack.c.h.s8.bf16 %v2758_v5 }
 0x3f8   : > { %3474 = vmatpush1.bf16.msra.mxu1 %v3078_v42  ;;  %3434 = vmatprep.subr.bf16.mxu0 %v2943_v10  ;;  %v2999_v42 = vunpack.c.l.s8.bf16 %v2695_v58  ;;  %v3127_v10 = vunpack.c.l.s8.bf16 %v2759_v59  ;;  %v2862_v58 = vld [vmem:[%s5253_s12 + $0x6c0] sm:$0xff] }
 0x3f9   : > { %3475 = vmatprep.subr.bf16.mxu1 %v3071_v15  ;;  %v2751_v15 = vld [vmem:[%s5253_s12 + $0x348] sm:$0xff] }
 0x3fa   : > { %v3119_v35 = vunpack.c.h.s8.bf16 %v2751_v15 }
 0x3fb   : > { %3435 = vmatpush1.bf16.msra.mxu0 %v2942_v0  ;;  %v5676_v0 = vsub.s32 0, %v5607_v2 }
 0x3fc   : > { %3476 = vmatpush1.bf16.msra.mxu1 %v3070_v1  ;;  %3436 = vmatprep.subr.bf16.mxu0 %v2935_v23  ;;  %v3126_v1 = vunpack.c.l.s8.bf16 %v2758_v5  ;;  %v2991_v23 = vunpack.c.h.s8.bf16 %v2687_v12 }
 0x3fd   : > { %3477 = vmatprep.subr.bf16.mxu1 %v3063_v11  ;;  %v2686_v11 = vld [vmem:[%s5253_s12 + $0x140] sm:$0xff]  ;;  %v2593_v29 = vrot.slane %v5633_v31, %v5676_v0 }
 0x3ff   : > { %3437 = vmatpush1.bf16.msra.mxu0 %v2934_v20  ;;  %v2750_v20 = vld [vmem:[%s5253_s12 + $0x340] sm:$0xff] }
 0x400   : > { %3478 = vmatpush1.bf16.msra.mxu1 %v3062_v50  ;;  %3438 = vmatprep.subr.bf16.mxu0 %v2927_v51  ;;  %v2990_v50 = vunpack.c.h.s8.bf16 %v2686_v11  ;;  %v2543_v51 = vrot.slane %v5622_v36, %v5676_v0  ;;  %v3118_v56 = vunpack.c.h.s8.bf16 %v2750_v20 }
 0x401   : > { %3479 = vmatprep.subr.bf16.mxu1 %v3055_v8  ;;  %v2983_v8 = vunpack.c.l.s8.bf16 %v2687_v12 }
 0x402   : > { %v2580_v28 = vmul.f32 %v2543_v51, %v5490_v21 }
 0x403   : > { %3439 = vmatpush1.bf16.msra.mxu0 %v2926_v24  ;;  %v3111_v24 = vunpack.c.l.s8.bf16 %v2751_v15  ;;  %v2855_v15 = vld [vmem:[%s5253_s12 + $0x688] sm:$0xff] }
 0x404   : > { %3480 = vmatpush1.bf16.msra.mxu1 %v3054_v25  ;;  %3440 = vmatprep.subr.bf16.mxu0 %v2919_v26  ;;  %v2679_v25 = vld [vmem:[%s5253_s12 + $0x108] sm:$0xff] }
 0x405   : > { %3481 = vmatprep.subr.bf16.mxu1 %v3047_v27  ;;  %v2743_v26 = vld [vmem:[%s5253_s12 + $0x308] sm:$0xff]  ;;  %v2982_v27 = vunpack.c.l.s8.bf16 %v2686_v11 }
 0x406   : > { %v3103_v16 = vunpack.c.h.s8.bf16 %v2743_v26  ;;  %v3095_v43 = vunpack.c.l.s8.bf16 %v2743_v26 }
 0x407   : > { %3441 = vmatpush1.bf16.msra.mxu0 %v2918_v30  ;;  %v3110_v30 = vunpack.c.l.s8.bf16 %v2750_v20  ;;  %v2790_v20 = vld [vmem:[%s5253_s12 + $0x480] sm:$0xff] }
 0x408   : > { %3482 = vmatpush1.bf16.msra.mxu1 %v3046_v57  ;;  %3442 = vmatprep.subr.bf16.mxu0 %v2911_v32  ;;  %v2975_v57 = vunpack.c.h.s8.bf16 %v2679_v25  ;;  %v2678_v32 = vld [vmem:[%s5253_s12 + $0x100] sm:$0xff]  ;;  %v3198_v26 = vunpack.c.h.s8.bf16 %v2790_v20 }
 0x409   : > { %3483 = vmatprep.subr.bf16.mxu1 %v3039_v37  ;;  %v2601_v37 = vrot.slane %v5633_v31, %v5680_v18  ;;  %v2974_v21 = vunpack.c.h.s8.bf16 %v2678_v32 }
 0x40b   : > { %3443 = vmatpush1.bf16.msra.mxu0 %v2910_v17  ;;  %v2742_v17 = vld [vmem:[%s5253_s12 + $0x300] sm:$0xff]  ;;  %v2632_v14 = vadd.f32 %v2601_v37, %v2582_v33  ;;  %v3190_v37 = vunpack.c.l.s8.bf16 %v2790_v20 }
 0x40c   : > { %3484 = vmatpush1.bf16.msra.mxu1 %v3038_v38  ;;  %3444 = vmatprep.subr.bf16.mxu0 %v2903_v39  ;;  %v2630_v38 = vadd.f32 %v2593_v29, %v2580_v28  ;;  %v3102_v39 = vunpack.c.h.s8.bf16 %v2742_v17  ;;  %v3094_v49 = vunpack.c.l.s8.bf16 %v2742_v17  ;;  %v3326_v28 = vunpack.c.h.s8.bf16 %v2854_v13  ;;  %v2782_v17 = vld [vmem:[%s5253_s12 + $0x440] sm:$0xff] }
 0x40d   : > { %3485 = vmatprep.subr.bf16.mxu1 %v3031_v40  ;;  %v2967_v40 = vunpack.c.l.s8.bf16 %v2679_v25 }
 0x40f   : > { %3445 = vmatpush1.bf16.msra.mxu0 %v2902_v44  ;;  %v2863_v44 = vld [vmem:[%s5253_s12 + $0x6c8] sm:$0xff] }
 0x410   : > { %3486 = vmatpush1.bf16.msra.mxu1 %v3030_v45  ;;  %3446 = vmatprep.subr.bf16.mxu0 %v3023_v46  ;;  %v2966_v45 = vunpack.c.l.s8.bf16 %v2678_v32  ;;  %v2638_v46 = vmax.f32 %v2630_v38, 0.0  ;;  %v2847_v32 = vld [vmem:[%s5253_s12 + $0x648] sm:$0xff] }
 0x411   : > { %3487 = vmatprep.subr.bf16.mxu1 %v3151_v48  ;;  %v5701_v48 = vpop.f32.mrf.mxu1 }
 0x413   : > { %3447 = vmatpush2.bf16.msra.mxu0 %v3022_v52  ;;  %v3215_v52 = vunpack.c.h.s8.bf16 %v2799_v6 }
 0x414   : > { %3488 = vmatpush2.bf16.msra.mxu1 %v3150_v53  ;;  %3448 = vmatprep.subr.bf16.mxu0 %v3015_v54  ;;  %v2798_v53 = vld [vmem:[%s5253_s12 + $0x4c0] sm:$0xff]  ;;  %v2640_v54 = vmax.f32 %v2632_v14, 0.0 }
 0x415   : > { %3489 = vmatprep.subr.bf16.mxu1 %v3143_v55  ;;  %v3343_v55 = vunpack.c.h.s8.bf16 %v2863_v44  ;;  %v3214_v59 = vunpack.c.h.s8.bf16 %v2798_v53 }
 0x416   : > { %v5707_v5 = vpack.c.bf16 %v2640_v54, %v2640_v54  ;;  %v2774_v54 = vld [vmem:[%s5253_s12 + $0x400] sm:$0xff] }
 0x417   : > { %3449 = vmatpush2.bf16.msra.mxu0 %v3014_v60  ;;  %v5705_v60 = vpack.c.bf16 %v2638_v46, %v2638_v46  ;;  %v3303_v46 = vunpack.c.l.s8.bf16 %v2847_v32 }
 0x418   : > { %3490 = vmatpush2.bf16.msra.mxu1 %v3142_v61  ;;  %3450 = vmatprep.subr.bf16.mxu0 %v3007_v62  ;;  %v2262_v61 = vpop.f32.mrf.mxu0  ;;  %v2301_v62 = vpop.f32.mrf.mxu1 }
 0x419   : > { %3491 = vmatprep.subr.bf16.mxu1 %v3135_v4  ;;  %v3342_v4 = vunpack.c.h.s8.bf16 %v2862_v58 }
 0x41b   : > { %3451 = vmatpush2.bf16.msra.mxu0 %v3006_v41  ;;  %v5710_v41 = vsub.s32 5, %v5607_v2 }
 0x41c   : > { %3492 = vmatpush2.bf16.msra.mxu1 %v3134_v7  ;;  %3452 = vmatprep.subr.bf16.mxu0 %v2999_v42  ;;  %v2791_v7 = vld [vmem:[%s5253_s12 + $0x488] sm:$0xff]  ;;  %v3335_v42 = vunpack.c.l.s8.bf16 %v2863_v44 }
 0x41d   : > { %3493 = vmatprep.subr.bf16.mxu1 %v3127_v10  ;;  %v2613_v25 = vrot.slane %v5633_v31, %v5710_v41 }
 0x41f   : > { %3453 = vmatpush2.bf16.msra.mxu0 %v2998_v22  ;;  %v2302_v22 = vadd.f32 %v2301_v62, %v2262_v61  ;;  %v3166_v61 = vunpack.c.h.s8.bf16 %v2774_v54 }
 0x420   : > { %3494 = vmatpush2.bf16.msra.mxu1 %v3126_v1  ;;  %3454 = vmatprep.subr.bf16.mxu0 %v2991_v23  ;;  %v3206_v1 = vunpack.c.l.s8.bf16 %v2798_v53 }
 0x421   : > { %3495 = vmatprep.subr.bf16.mxu1 %v3119_v35  ;;  %v3199_v35 = vunpack.c.h.s8.bf16 %v2791_v7 }
 0x423   : > { %3455 = vmatpush2.bf16.msra.mxu0 %v2990_v50  ;;  %v3334_v50 = vunpack.c.l.s8.bf16 %v2862_v58 }
 0x424   : > { %3496 = vmatpush2.bf16.msra.mxu1 %v3118_v56  ;;  %3456 = vmatprep.subr.bf16.mxu0 %v2983_v8  ;;  %v2563_v56 = vrot.slane %v5622_v36, %v5710_v41  ;;  %v3327_v8 = vunpack.c.h.s8.bf16 %v2855_v15 }
 0x425   : > { %3497 = vmatprep.subr.bf16.mxu1 %v3111_v24 }
 0x427   : > { %3457 = vmatpush2.bf16.msra.mxu0 %v2982_v27  ;;  %v3191_v27 = vunpack.c.l.s8.bf16 %v2791_v7 }
 0x428   : > { %3498 = vmatpush2.bf16.msra.mxu1 %v3110_v30  ;;  %3458 = vmatprep.subr.bf16.mxu0 %v2975_v57  ;;  %v2783_v30 = vld [vmem:[%s5253_s12 + $0x448] sm:$0xff]  ;;  %v3319_v57 = vunpack.c.l.s8.bf16 %v2855_v15  ;;  %v3158_v15 = vunpack.c.l.s8.bf16 %v2774_v54 }
 0x429   : > { %3499 = vmatprep.subr.bf16.mxu1 %v3103_v16  ;;  %v3183_v16 = vunpack.c.h.s8.bf16 %v2783_v30  ;;  %v3175_v6 = vunpack.c.l.s8.bf16 %v2783_v30  ;;  %v2871_v54 = vld [vmem:[%s5253_s12 + $0x708] sm:$0xff] }
 0x42b   : > { %3459 = vmatpush2.bf16.msra.mxu0 %v2974_v21  ;;  %v3318_v21 = vunpack.c.l.s8.bf16 %v2854_v13  ;;  %v2887_v13 = vld [vmem:[%s5253_s12 + $0x788] sm:$0xff] }
 0x42c   : > { %3500 = vmatpush2.bf16.msra.mxu1 %v3102_v39  ;;  %3460 = vmatprep.subr.bf16.mxu0 %v2967_v40  ;;  %v3311_v39 = vunpack.c.h.s8.bf16 %v2847_v32  ;;  %v2846_v40 = vld [vmem:[%s5253_s12 + $0x640] sm:$0xff] }
 0x42d   : > { %3501 = vmatprep.subr.bf16.mxu1 %v3095_v43  ;;  %v3182_v43 = vunpack.c.h.s8.bf16 %v2782_v17  ;;  %v3310_v44 = vunpack.c.h.s8.bf16 %v2846_v40 }
 0x42f   : > { %3461 = vmatpush2.bf16.msra.mxu0 %v2966_v45  ;;  %v2775_v45 = vld [vmem:[%s5253_s12 + $0x408] sm:$0xff] }
 0x430   : > { %3502 = vmatpush2.bf16.msra.mxu1 %v3094_v49  ;;  %3512 = vmatprep.subr.bf16.mxu0 %v3215_v52  ;;  %v2839_v49 = vld [vmem:[%s5253_s12 + $0x608] sm:$0xff]  ;;  %v3174_v52 = vunpack.c.l.s8.bf16 %v2782_v17  ;;  %v3167_v53 = vunpack.c.h.s8.bf16 %v2775_v45  ;;  %v3159_v62 = vunpack.c.l.s8.bf16 %v2775_v45  ;;  %v2878_v45 = vld [vmem:[%s5253_s12 + $0x740] sm:$0xff] }
 0x431   : > { %3553 = vmatprep.subr.bf16.mxu1 %v3343_v55  ;;  %v3302_v55 = vunpack.c.l.s8.bf16 %v2846_v40  ;;  %v3295_v58 = vunpack.c.h.s8.bf16 %v2839_v49  ;;  %v3287_v7 = vunpack.c.l.s8.bf16 %v2839_v49  ;;  %v2879_v17 = vld [vmem:[%s5253_s12 + $0x748] sm:$0xff]  ;;  %v3374_v49 = vunpack.c.h.s8.bf16 %v2878_v45 }
 0x432   : > { %v5713_v10 = vpop.f32.mrf.mxu0  ;;  %3463 = vmatmul.mubr.bf16.vlgmr.msra.gmra.mxu0 %v5705_v60 }
 0x433   : > { %v5716_v12 = vpop.f32.mrf.mxu1  ;;  %3504 = vmatmul.mubr.bf16.vlgmr.msra.gmra.mxu1 %v5707_v5  ;;  %3513 = vmatpush1.bf16.msra.mxu0 %v3214_v59  ;;  %v2838_v59 = vld [vmem:[%s5253_s12 + $0x600] sm:$0xff] }
 0x434   : > { %v2340_v23 = vpop.f32.mrf.mxu0  ;;  %3514 = vmatprep.subr.bf16.mxu0 %v3207_v3  ;;  %3554 = vmatpush1.bf16.msra.mxu1 %v3342_v4  ;;  %v3294_v3 = vunpack.c.h.s8.bf16 %v2838_v59  ;;  %v2831_v4 = vld [vmem:[%s5253_s12 + $0x5c8] sm:$0xff] }
 0x435   : > { %v2379_v11 = vpop.f32.mrf.mxu1  ;;  %v2341_v51 = vadd.f32 %v2340_v23, %v2302_v22  ;;  %3555 = vmatprep.subr.bf16.mxu1 %v3335_v42  ;;  %v2895_v42 = vld [vmem:[%s5253_s12 + $0x7c8] sm:$0xff]  ;;  %v3279_v22 = vunpack.c.h.s8.bf16 %v2831_v4  ;;  %v3286_v23 = vunpack.c.l.s8.bf16 %v2838_v59 }
 0x437   : > { %v2380_v24 = vadd.f32 %v2379_v11, %v2341_v51  ;;  %3515 = vmatpush1.bf16.msra.mxu0 %v3206_v1  ;;  %v2830_v1 = vld [vmem:[%s5253_s12 + $0x5c0] sm:$0xff]  ;;  %v3407_v11 = vunpack.c.h.s8.bf16 %v2895_v42 }
 0x438   : > { %3516 = vmatprep.subr.bf16.mxu0 %v3199_v35  ;;  %3556 = vmatpush1.bf16.msra.mxu1 %v3334_v50  ;;  %v2894_v35 = vld [vmem:[%s5253_s12 + $0x7c0] sm:$0xff]  ;;  %v3278_v20 = vunpack.c.h.s8.bf16 %v2830_v1  ;;  %v3271_v50 = vunpack.c.l.s8.bf16 %v2831_v4 }
 0x439   : > { %v2585_v29 = vmul.f32 %v2563_v56, %v2380_v24  ;;  %3557 = vmatprep.subr.bf16.mxu1 %v3327_v8  ;;  %v3406_v51 = vunpack.c.h.s8.bf16 %v2894_v35  ;;  %v2823_v56 = vld [vmem:[%s5253_s12 + $0x588] sm:$0xff]  ;;  %v3399_v8 = vunpack.c.l.s8.bf16 %v2895_v42  ;;  %v3270_v24 = vunpack.c.l.s8.bf16 %v2830_v1  ;;  %v5766_v1 = vld [vmem:[%s5253_s12 + $0x2d8] sm:$0xff] }
 0x43b   : > { %v2635_v33 = vadd.f32 %v2613_v25, %v2585_v29  ;;  %3517 = vmatpush1.bf16.msra.mxu0 %v3198_v26  ;;  %v3263_v25 = vunpack.c.h.s8.bf16 %v2823_v56  ;;  %v2822_v26 = vld [vmem:[%s5253_s12 + $0x580] sm:$0xff] }
 0x43c   : > { %3518 = vmatprep.subr.bf16.mxu0 %v3191_v27  ;;  %3558 = vmatpush1.bf16.msra.mxu1 %v3326_v28  ;;  %v3398_v27 = vunpack.c.l.s8.bf16 %v2894_v35  ;;  %v3391_v28 = vunpack.c.h.s8.bf16 %v2887_v13  ;;  %v2886_v29 = vld [vmem:[%s5253_s12 + $0x780] sm:$0xff]  ;;  %v3262_v30 = vunpack.c.h.s8.bf16 %v2822_v26 }
 0x43d   : > { %v2643_v38 = vmax.f32 %v2635_v33, 0.0  ;;  %3559 = vmatprep.subr.bf16.mxu1 %v3319_v57  ;;  %v3255_v57 = vunpack.c.l.s8.bf16 %v2823_v56  ;;  %v3390_v32 = vunpack.c.h.s8.bf16 %v2886_v29  ;;  %v2815_v33 = vld [vmem:[%s5253_s12 + $0x548] sm:$0xff] }
 0x43e   : > { %v3247_v40 = vunpack.c.h.s8.bf16 %v2815_v33 }
 0x43f   : > { %v5730_v14 = vpack.c.bf16 %v2643_v38, %v2643_v38  ;;  %3519 = vmatpush1.bf16.msra.mxu0 %v3190_v37  ;;  %v3383_v37 = vunpack.c.l.s8.bf16 %v2887_v13 }
 0x440   : > { %3520 = vmatprep.subr.bf16.mxu0 %v3183_v16  ;;  %3560 = vmatpush1.bf16.msra.mxu1 %v3318_v21  ;;  %v2300_v16 = vadd.f32 %v5701_v48, %v5699_v47  ;;  %v3254_v21 = vunpack.c.l.s8.bf16 %v2822_v26 }
 0x441   : > { %3544 = vmatprep.mubr.bf16.mxu0 %v5730_v14  ;;  %3561 = vmatprep.subr.bf16.mxu1 %v3311_v39  ;;  %v5751_v39 = vsub.s32 4, %v5607_v2 }
 0x442   : > { %v2339_v38 = vadd.f32 %v5713_v10, %v2300_v16 }
 0x443   : > { %3521 = vmatpush1.bf16.msra.mxu0 %v3182_v43  ;;  %v2814_v43 = vld [vmem:[%s5253_s12 + $0x540] sm:$0xff]  ;;  %v2559_v10 = vrot.slane %v5622_v36, %v5751_v39  ;;  %v2609_v59 = vrot.slane %v5633_v31, %v5751_v39  ;;  %v3366_v36 = vunpack.c.l.s8.bf16 %v2878_v45  ;;  %v3351_v31 = vunpack.c.l.s8.bf16 %v2871_v54 }
 0x444   : > { %3522 = vmatprep.subr.bf16.mxu0 %v3175_v6  ;;  %3562 = vmatpush1.bf16.msra.mxu1 %v3310_v44  ;;  %v3382_v6 = vunpack.c.l.s8.bf16 %v2886_v29  ;;  %v3375_v44 = vunpack.c.h.s8.bf16 %v2879_v17  ;;  %v3246_v47 = vunpack.c.h.s8.bf16 %v2814_v43  ;;  %v2378_v48 = vadd.f32 %v5716_v12, %v2339_v38 }
 0x445   : > { %3563 = vmatprep.subr.bf16.mxu1 %v3303_v46  ;;  %v3239_v46 = vunpack.c.l.s8.bf16 %v2815_v33  ;;  %v2656_v33 = vld [vmem:[%s5253_s12 + $0x50] sm:$0xff] }
 0x447   : > { %3523 = vmatpush1.bf16.msra.mxu0 %v3174_v52  ;;  %v2807_v52 = vld [vmem:[%s5253_s12 + $0x508] sm:$0xff] }
 0x448   : > { %3524 = vmatprep.subr.bf16.mxu0 %v3167_v53  ;;  %3564 = vmatpush1.bf16.msra.mxu1 %v3302_v55  ;;  %v3367_v53 = vunpack.c.l.s8.bf16 %v2879_v17  ;;  %v3238_v55 = vunpack.c.l.s8.bf16 %v2814_v43  ;;  %v3231_v12 = vunpack.c.h.s8.bf16 %v2807_v52  ;;  %v3223_v42 = vunpack.c.l.s8.bf16 %v2807_v52  ;;  %v2649_v17 = vld [vmem:[%s5253_s12 + $0x18] sm:$0xff] }
 0x449   : > { %3565 = vmatprep.subr.bf16.mxu1 %v3295_v58  ;;  %v2584_v58 = vmul.f32 %v2559_v10, %v2378_v48  ;;  %v2913_v38 = vunpack.c.h.s8.bf16 %v2649_v17  ;;  %v2704_v48 = vld [vmem:[%s5253_s12 + $0x1d0] sm:$0xff] }
 0x44a   : > { %v3024_v10 = vunpack.c.h.s8.bf16 %v2704_v48  ;;  %v3016_v52 = vunpack.c.l.s8.bf16 %v2704_v48 }
 0x44b   : > { %3525 = vmatpush1.bf16.msra.mxu0 %v3166_v61  ;;  %v2806_v61 = vld [vmem:[%s5253_s12 + $0x500] sm:$0xff] }
 0x44c   : > { %3526 = vmatprep.subr.bf16.mxu0 %v3159_v62  ;;  %3566 = vmatpush1.bf16.msra.mxu1 %v3294_v3  ;;  %v3359_v62 = vunpack.c.h.s8.bf16 %v2871_v54  ;;  %v2870_v3 = vld [vmem:[%s5253_s12 + $0x700] sm:$0xff]  ;;  %v3230_v4 = vunpack.c.h.s8.bf16 %v2806_v61  ;;  %v2696_v54 = vld [vmem:[%s5253_s12 + $0x190] sm:$0xff] }
 0x44d   : > { %3567 = vmatprep.subr.bf16.mxu1 %v3287_v7  ;;  %v2634_v7 = vadd.f32 %v2609_v59, %v2584_v58  ;;  %v2689_v59 = vld [vmem:[%s5253_s12 + $0x158] sm:$0xff] }
 0x44f   : > { %3527 = vmatpush1.bf16.msra.mxu0 %v3158_v15  ;;  %v3358_v15 = vunpack.c.h.s8.bf16 %v2870_v3 }
 0x450   : > { %3528 = vmatprep.subr.bf16.mxu0 %v3279_v22  ;;  %3568 = vmatpush1.bf16.msra.mxu1 %v3286_v23  ;;  %v2673_v22 = vld [vmem:[%s5253_s12 + $0xd8] sm:$0xff]  ;;  %v3222_v23 = vunpack.c.l.s8.bf16 %v2806_v61  ;;  %v2993_v61 = vunpack.c.h.s8.bf16 %v2689_v59 }
 0x451   : > { %3569 = vmatprep.subr.bf16.mxu1 %v3407_v11  ;;  %v2642_v11 = vmax.f32 %v2634_v7, 0.0  ;;  %v2961_v35 = vunpack.c.h.s8.bf16 %v2673_v22  ;;  %v2953_v13 = vunpack.c.l.s8.bf16 %v2673_v22 }
 0x453   : > { %3529 = vmatpush2.bf16.msra.mxu0 %v3278_v20  ;;  %v2672_v20 = vld [vmem:[%s5253_s12 + $0xd0] sm:$0xff] }
 0x454   : > { %3530 = vmatprep.subr.bf16.mxu0 %v3271_v50  ;;  %3570 = vmatpush2.bf16.msra.mxu1 %v3406_v51  ;;  %v3350_v50 = vunpack.c.l.s8.bf16 %v2870_v3  ;;  %v3089_v51 = vunpack.c.h.s8.bf16 %v5766_v1  ;;  %v2960_v56 = vunpack.c.h.s8.bf16 %v2672_v20  ;;  %v2985_v3 = vunpack.c.l.s8.bf16 %v2689_v59 }
 0x455   : > { %3571 = vmatprep.subr.bf16.mxu1 %v3399_v8  ;;  %v5770_v8 = vpack.c.bf16 %v2642_v11, %v2642_v11 }
 0x457   : > { %3531 = vmatpush2.bf16.msra.mxu0 %v3270_v24  ;;  %v2665_v24 = vld [vmem:[%s5253_s12 + $0x98] sm:$0xff] }
 0x458   : > { %3532 = vmatprep.subr.bf16.mxu0 %v3263_v25  ;;  %3572 = vmatpush2.bf16.msra.mxu1 %v3398_v27  ;;  %v2952_v25 = vunpack.c.l.s8.bf16 %v2672_v20  ;;  %v2945_v26 = vunpack.c.h.s8.bf16 %v2665_v24  ;;  %v2664_v27 = vld [vmem:[%s5253_s12 + $0x90] sm:$0xff]  ;;  %v2937_v29 = vunpack.c.l.s8.bf16 %v2665_v24 }
 0x459   : > { %3573 = vmatprep.subr.bf16.mxu1 %v3391_v28  ;;  %v2944_v28 = vunpack.c.h.s8.bf16 %v2664_v27 }
 0x45b   : > { %3533 = vmatpush2.bf16.msra.mxu0 %v3262_v30  ;;  %v2657_v30 = vld [vmem:[%s5253_s12 + $0x58] sm:$0xff] }
 0x45c   : > { %3534 = vmatprep.subr.bf16.mxu0 %v3255_v57  ;;  %3574 = vmatpush2.bf16.msra.mxu1 %v3390_v32  ;;  %v2936_v57 = vunpack.c.l.s8.bf16 %v2664_v27  ;;  %v2929_v32 = vunpack.c.h.s8.bf16 %v2657_v30  ;;  %v2921_v16 = vunpack.c.l.s8.bf16 %v2657_v30 }
 0x45d   : > { %3575 = vmatprep.subr.bf16.mxu1 %v3383_v37  ;;  %v2928_v37 = vunpack.c.h.s8.bf16 %v2656_v33 }
 0x45f   : > { %3535 = vmatpush2.bf16.msra.mxu0 %v3254_v21  ;;  %v2920_v21 = vunpack.c.l.s8.bf16 %v2656_v33 }
 0x460   : > { %3536 = vmatprep.subr.bf16.mxu0 %v3247_v40  ;;  %3576 = vmatpush2.bf16.msra.mxu1 %v3382_v6  ;;  %v2648_v40 = vld [vmem:[%s5253_s12 + $0x10] sm:$0xff]  ;;  %v2905_v6 = vunpack.c.l.s8.bf16 %v2649_v17 }
 0x461   : > { %3577 = vmatprep.subr.bf16.mxu1 %v3375_v44  ;;  %v2912_v43 = vunpack.c.h.s8.bf16 %v2648_v40  ;;  %v2705_v44 = vld [vmem:[%s5253_s12 + $0x1d8] sm:$0xff]  ;;  %v2904_v45 = vunpack.c.l.s8.bf16 %v2648_v40 }
 0x463   : > { %3537 = vmatpush2.bf16.msra.mxu0 %v3246_v47  ;;  %v3025_v47 = vunpack.c.h.s8.bf16 %v2705_v44 }
 0x464   : > { %3538 = vmatprep.subr.bf16.mxu0 %v3239_v46  ;;  %3578 = vmatpush2.bf16.msra.mxu1 %v3374_v49  ;;  %v3017_v46 = vunpack.c.l.s8.bf16 %v2705_v44  ;;  %v2697_v49 = vld [vmem:[%s5253_s12 + $0x198] sm:$0xff] }
 0x465   : > { %3579 = vmatprep.subr.bf16.mxu1 %v3367_v53  ;;  %v3009_v53 = vunpack.c.h.s8.bf16 %v2697_v49  ;;  %v3001_v58 = vunpack.c.l.s8.bf16 %v2697_v49 }
 0x467   : > { %3539 = vmatpush2.bf16.msra.mxu0 %v3238_v55  ;;  %v3008_v55 = vunpack.c.h.s8.bf16 %v2696_v54 }
 0x468   : > { %3540 = vmatprep.subr.bf16.mxu0 %v3231_v12  ;;  %3580 = vmatpush2.bf16.msra.mxu1 %v3366_v36  ;;  %v3000_v12 = vunpack.c.l.s8.bf16 %v2696_v54  ;;  %v2688_v36 = vld [vmem:[%s5253_s12 + $0x150] sm:$0xff] }
 0x469   : > { %3581 = vmatprep.subr.bf16.mxu1 %v3359_v62  ;;  %v2992_v62 = vunpack.c.h.s8.bf16 %v2688_v36  ;;  %v2984_v7 = vunpack.c.l.s8.bf16 %v2688_v36 }
 0x46b   : > { %3541 = vmatpush2.bf16.msra.mxu0 %v3230_v4  ;;  %v2681_v4 = vld [vmem:[%s5253_s12 + $0x118] sm:$0xff] }
 0x46c   : > { %3542 = vmatprep.subr.bf16.mxu0 %v3223_v42  ;;  %3582 = vmatpush2.bf16.msra.mxu1 %v3358_v15  ;;  %v2977_v42 = vunpack.c.h.s8.bf16 %v2681_v4  ;;  %v2680_v15 = vld [vmem:[%s5253_s12 + $0x110] sm:$0xff] }
 0x46d   : > { %3583 = vmatprep.subr.bf16.mxu1 %v3351_v31  ;;  %v2976_v22 = vunpack.c.h.s8.bf16 %v2680_v15  ;;  %v2969_v31 = vunpack.c.l.s8.bf16 %v2681_v4  ;;  %v2968_v11 = vunpack.c.l.s8.bf16 %v2680_v15 }
 0x46f   : > { %3543 = vmatpush2.bf16.msra.mxu0 %v3222_v23  ;;  %v2801_v23 = vld [vmem:[%s5253_s12 + $0x4d8] sm:$0xff] }
 0x470   : > { %3594 = vmatprep.subr.bf16.mxu0 %v2961_v35  ;;  %3584 = vmatpush2.bf16.msra.mxu1 %v3350_v50  ;;  %v3217_v50 = vunpack.c.h.s8.bf16 %v2801_v23 }
 0x471   : > { %3635 = vmatprep.subr.bf16.mxu1 %v3089_v51  ;;  %v2800_v51 = vld [vmem:[%s5253_s12 + $0x4d0] sm:$0xff] }
 0x472   : > { %3545 = vmatmul.mubr.bf16.vlgmr.msra.gmra.mxu0 %v5770_v8  ;;  %v2416_v35 = vpop.f32.mrf.mxu0  ;;  %v3208_v17 = vunpack.c.l.s8.bf16 %v2800_v51 }
 0x473   : > { %3595 = vmatpush1.bf16.msra.mxu0 %v2960_v56  ;;  %3626 = vmatprep.mubr.bf16.mxu0 %v5645_v63  ;;  %v2455_v20 = vpop.f32.mrf.mxu1  ;;  %v5791_v56 = vsub.s32 6, %v5607_v2 }
 0x474   : > { %3596 = vmatprep.subr.bf16.mxu0 %v2953_v13  ;;  %v3216_v13 = vunpack.c.h.s8.bf16 %v2800_v51  ;;  %v2418_v24 = vpop.f32.mrf.mxu0  ;;  %v2456_v27 = vadd.f32 %v2455_v20, %v2416_v35  ;;  %v2728_v51 = vld [vmem:[%s5253_s12 + $0x290] sm:$0xff] }
 0x477   : > { %3597 = vmatpush1.bf16.msra.mxu0 %v2952_v25  ;;  %v2457_v25 = vpop.f32.mrf.mxu1 }
 0x478   : > { %3598 = vmatprep.subr.bf16.mxu0 %v2945_v26  ;;  %v3209_v26 = vunpack.c.l.s8.bf16 %v2801_v23  ;;  %v2729_v23 = vld [vmem:[%s5253_s12 + $0x298] sm:$0xff] }
 0x47b   : > { %3599 = vmatpush1.bf16.msra.mxu0 %v2944_v28  ;;  %v5794_v28 = vsub.s32 7, %v5607_v2 }
 0x47c   : > { %3600 = vmatprep.subr.bf16.mxu0 %v2937_v29  ;;  %v2793_v29 = vld [vmem:[%s5253_s12 + $0x498] sm:$0xff] }
 0x47d   : > { %v3201_v2 = vunpack.c.h.s8.bf16 %v2793_v29 }
 0x47f   : > { %3601 = vmatpush1.bf16.msra.mxu0 %v2936_v57 }
 0x480   : > { %3602 = vmatprep.subr.bf16.mxu0 %v2929_v32  ;;  %v2458_v32 = vadd.f32 %v2457_v25, %v2418_v24  ;;  %v3072_v24 = vunpack.c.h.s8.bf16 %v2728_v51 }
 0x483   : > { %3603 = vmatpush1.bf16.msra.mxu0 %v2928_v37  ;;  %v4605_v37 = vld [vmem:[%s443_s18] sm:$0xff] }
 0x484   : > { %3604 = vmatprep.subr.bf16.mxu0 %v2921_v16  ;;  %v2567_v16 = vrot.slane %v4605_v37, %v5791_v56 }
 0x487   : > { %3605 = vmatpush1.bf16.msra.mxu0 %v2920_v21 }
 0x488   : > { %3606 = vmatprep.subr.bf16.mxu0 %v2913_v38  ;;  %v2792_v38 = vld [vmem:[%s5253_s12 + $0x490] sm:$0xff] }
 0x489   : > { %v3200_v49 = vunpack.c.h.s8.bf16 %v2792_v38  ;;  %v3192_v59 = vunpack.c.l.s8.bf16 %v2792_v38 }
 0x48b   : > { %3607 = vmatpush1.bf16.msra.mxu0 %v2912_v43  ;;  %v4606_v43 = vld [vmem:[%s452_s28] sm:$0xff] }
 0x48c   : > { %3608 = vmatprep.subr.bf16.mxu0 %v2905_v6  ;;  %v2617_v6 = vrot.slane %v4606_v43, %v5791_v56 }
 0x48f   : > { %3609 = vmatpush1.bf16.msra.mxu0 %v2904_v45  ;;  %v2571_v45 = vrot.slane %v4605_v37, %v5794_v28  ;;  %v2720_v37 = vld [vmem:[%s5253_s12 + $0x250] sm:$0xff] }
 0x490   : > { %3610 = vmatprep.subr.bf16.mxu0 %v3025_v47 }
 0x493   : > { %3611 = vmatpush2.bf16.msra.mxu0 %v3024_v10 }
 0x494   : > { %3612 = vmatprep.subr.bf16.mxu0 %v3017_v46  ;;  %v2621_v46 = vrot.slane %v4606_v43, %v5794_v28  ;;  %v2713_v43 = vld [vmem:[%s5253_s12 + $0x218] sm:$0xff] }
 0x497   : > { %3613 = vmatpush2.bf16.msra.mxu0 %v3016_v52  ;;  %v3193_v52 = vunpack.c.l.s8.bf16 %v2793_v29  ;;  %v2721_v29 = vld [vmem:[%s5253_s12 + $0x258] sm:$0xff] }
 0x498   : > { %3614 = vmatprep.subr.bf16.mxu0 %v3009_v53  ;;  %v3049_v38 = vunpack.c.l.s8.bf16 %v2721_v29 }
 0x49b   : > { %3615 = vmatpush2.bf16.msra.mxu0 %v3008_v55  ;;  %v2785_v55 = vld [vmem:[%s5253_s12 + $0x458] sm:$0xff] }
 0x49c   : > { %3616 = vmatprep.subr.bf16.mxu0 %v3001_v58  ;;  %v3185_v36 = vunpack.c.h.s8.bf16 %v2785_v55 }
 0x49f   : > { %3617 = vmatpush2.bf16.msra.mxu0 %v3000_v12 }
 0x4a0   : > { %3618 = vmatprep.subr.bf16.mxu0 %v2993_v61  ;;  %v2736_v61 = vld [vmem:[%s5253_s12 + $0x2d0] sm:$0xff] }
 0x4a1   : > { %v3080_v35 = vunpack.c.l.s8.bf16 %v2736_v61 }
 0x4a3   : > { %3619 = vmatpush2.bf16.msra.mxu0 %v2992_v62 }
 0x4a4   : > { %3620 = vmatprep.subr.bf16.mxu0 %v2985_v3  ;;  %v2784_v3 = vld [vmem:[%s5253_s12 + $0x450] sm:$0xff] }
 0x4a5   : > { %v3184_v15 = vunpack.c.h.s8.bf16 %v2784_v3  ;;  %v3176_v20 = vunpack.c.l.s8.bf16 %v2784_v3  ;;  %v2816_v3 = vld [vmem:[%s5253_s12 + $0x550] sm:$0xff] }
 0x4a7   : > { %3621 = vmatpush2.bf16.msra.mxu0 %v2984_v7  ;;  %v3088_v7 = vunpack.c.h.s8.bf16 %v2736_v61 }
 0x4a8   : > { %3622 = vmatprep.subr.bf16.mxu0 %v2977_v42 }
 0x4ab   : > { %3623 = vmatpush2.bf16.msra.mxu0 %v2976_v22  ;;  %v3081_v22 = vunpack.c.l.s8.bf16 %v5766_v1 }
 0x4ac   : > { %3624 = vmatprep.subr.bf16.mxu0 %v2969_v31  ;;  %v3177_v31 = vunpack.c.l.s8.bf16 %v2785_v55  ;;  %v2769_v55 = vld [vmem:[%s5253_s12 + $0x3d8] sm:$0xff] }
 0x4ad   : > { %v3153_v61 = vunpack.c.h.s8.bf16 %v2769_v55 }
 0x4af   : > { %3625 = vmatpush2.bf16.msra.mxu0 %v2968_v11  ;;  %v2777_v11 = vld [vmem:[%s5253_s12 + $0x418] sm:$0xff] }
 0x4b0   : > { %3676 = vmatprep.subr.bf16.mxu0 %v3217_v50  ;;  %v3073_v50 = vunpack.c.h.s8.bf16 %v2729_v23  ;;  %v3169_v1 = vunpack.c.h.s8.bf16 %v2777_v11 }
 0x4b2   : > { %v2494_v30 = vpop.f32.mrf.mxu0  ;;  %3627 = vmatmul.mubr.bf16.vlgmr.msra.gmra.mxu0 %v5705_v60 }
 0x4b3   : > { %v2533_v57 = vpop.f32.mrf.mxu1  ;;  %v2495_v33 = vadd.f32 %v2494_v30, %v2456_v27  ;;  %3677 = vmatpush1.bf16.msra.mxu0 %v3216_v13  ;;  %3708 = vmatprep.mubr.bf16.mxu0 %v5730_v14  ;;  %v2776_v13 = vld [vmem:[%s5253_s12 + $0x410] sm:$0xff]  ;;  %v3161_v27 = vunpack.c.l.s8.bf16 %v2777_v11  ;;  %v2833_v30 = vld [vmem:[%s5253_s12 + $0x5d8] sm:$0xff] }
 0x4b4   : > { %v2496_v21 = vpop.f32.mrf.mxu0  ;;  %3678 = vmatprep.subr.bf16.mxu0 %v3209_v26  ;;  %v3168_v25 = vunpack.c.h.s8.bf16 %v2776_v13  ;;  %v3065_v26 = vunpack.c.l.s8.bf16 %v2729_v23  ;;  %v2761_v23 = vld [vmem:[%s5253_s12 + $0x398] sm:$0xff] }
 0x4b5   : > { %v2534_v40 = vadd.f32 %v2533_v57, %v2495_v33  ;;  %v2497_v44 = vadd.f32 %v2496_v21, %v2458_v32  ;;  %v2535_v47 = vpop.f32.mrf.mxu1  ;;  %v3064_v57 = vunpack.c.l.s8.bf16 %v2728_v51  ;;  %v3160_v32 = vunpack.c.l.s8.bf16 %v2776_v13  ;;  %v2809_v11 = vld [vmem:[%s5253_s12 + $0x518] sm:$0xff]  ;;  %v2760_v51 = vld [vmem:[%s5253_s12 + $0x390] sm:$0xff] }
 0x4b6   : > { %v3057_v33 = vunpack.c.h.s8.bf16 %v2721_v29  ;;  %v3056_v21 = vunpack.c.h.s8.bf16 %v2720_v37  ;;  %v2808_v13 = vld [vmem:[%s5253_s12 + $0x510] sm:$0xff]  ;;  %v2753_v29 = vld [vmem:[%s5253_s12 + $0x358] sm:$0xff] }
 0x4b7   : > { %v2586_v48 = vmul.f32 %v2567_v16, %v2534_v40  ;;  %v2536_v10 = vadd.f32 %v2535_v47, %v2497_v44  ;;  %3679 = vmatpush1.bf16.msra.mxu0 %v3208_v17  ;;  %v3281_v16 = vunpack.c.h.s8.bf16 %v2833_v30  ;;  %v2832_v17 = vld [vmem:[%s5253_s12 + $0x5d0] sm:$0xff]  ;;  %v3273_v40 = vunpack.c.l.s8.bf16 %v2833_v30  ;;  %v2675_v30 = vld [vmem:[%s5253_s12 + $0xe8] sm:$0xff] }
 0x4b8   : > { %3680 = vmatprep.subr.bf16.mxu0 %v3201_v2  ;;  %v3280_v2 = vunpack.c.h.s8.bf16 %v2832_v17  ;;  %v3048_v44 = vunpack.c.l.s8.bf16 %v2720_v37  ;;  %v3041_v47 = vunpack.c.h.s8.bf16 %v2713_v43  ;;  %v2752_v37 = vld [vmem:[%s5253_s12 + $0x350] sm:$0xff] }
 0x4b9   : > { %v2636_v53 = vadd.f32 %v2617_v6, %v2586_v48  ;;  %v2587_v54 = vmul.f32 %v2571_v45, %v2536_v10  ;;  %v2825_v6 = vld [vmem:[%s5253_s12 + $0x598] sm:$0xff]  ;;  %v3272_v45 = vunpack.c.l.s8.bf16 %v2832_v17  ;;  %v2712_v48 = vld [vmem:[%s5253_s12 + $0x210] sm:$0xff]  ;;  %v2674_v17 = vld [vmem:[%s5253_s12 + $0xe0] sm:$0xff] }
 0x4ba   : > { %v3265_v10 = vunpack.c.h.s8.bf16 %v2825_v6 }
 0x4bb   : > { %v2637_v58 = vadd.f32 %v2621_v46, %v2587_v54  ;;  %3681 = vmatpush1.bf16.msra.mxu0 %v3200_v49  ;;  %v2644_v12 = vmax.f32 %v2636_v53, 0.0  ;;  %v2824_v46 = vld [vmem:[%s5253_s12 + $0x590] sm:$0xff]  ;;  %v3040_v49 = vunpack.c.h.s8.bf16 %v2712_v48  ;;  %v3033_v53 = vunpack.c.l.s8.bf16 %v2713_v43  ;;  %v2745_v43 = vld [vmem:[%s5253_s12 + $0x318] sm:$0xff] }
 0x4bc   : > { %3682 = vmatprep.subr.bf16.mxu0 %v3193_v52  ;;  %v3264_v52 = vunpack.c.h.s8.bf16 %v2824_v46  ;;  %v3257_v54 = vunpack.c.l.s8.bf16 %v2825_v6 }
 0x4bd   : > { %v2645_v62 = vmax.f32 %v2637_v58, 0.0  ;;  %v5813_v42 = vpack.c.bf16 %v2644_v12, %v2644_v12  ;;  %v2817_v58 = vld [vmem:[%s5253_s12 + $0x558] sm:$0xff]  ;;  %v3256_v12 = vunpack.c.l.s8.bf16 %v2824_v46  ;;  %v2954_v46 = vunpack.c.l.s8.bf16 %v2674_v17 }
 0x4bf   : > { %v5811_v4 = vpack.c.bf16 %v2645_v62, %v2645_v62  ;;  %3683 = vmatpush1.bf16.msra.mxu0 %v3192_v59  ;;  %v3032_v59 = vunpack.c.l.s8.bf16 %v2712_v48  ;;  %v3249_v62 = vunpack.c.h.s8.bf16 %v2817_v58 }
 0x4c0   : > { %3684 = vmatprep.subr.bf16.mxu0 %v3185_v36  ;;  %v2768_v36 = vld [vmem:[%s5253_s12 + $0x3d0] sm:$0xff] }
 0x4c1   : > { %3585 = vmatprep.mubr.bf16.mxu1 %v5811_v4 }
 0x4c2   : > { %3586 = vmatmul.mubr.bf16.vlgmr.msra.gmra.mxu1 %v5813_v42 }
 0x4c3   : > { %3636 = vmatpush1.bf16.msra.mxu1 %v3088_v7  ;;  %3667 = vmatprep.mubr.bf16.mxu1 %v5648_v9  ;;  %v3152_v7 = vunpack.c.h.s8.bf16 %v2768_v36 }
 0x4c4   : > { %3685 = vmatpush1.bf16.msra.mxu0 %v3184_v15  ;;  %3637 = vmatprep.subr.bf16.mxu1 %v3081_v22  ;;  %v3248_v15 = vunpack.c.h.s8.bf16 %v2816_v3  ;;  %v3145_v22 = vunpack.c.l.s8.bf16 %v2769_v55  ;;  %v2666_v55 = vld [vmem:[%s5253_s12 + $0xa0] sm:$0xff] }
 0x4c5   : > { %3686 = vmatprep.subr.bf16.mxu0 %v3177_v31  ;;  %v3241_v31 = vunpack.c.l.s8.bf16 %v2817_v58 }
 0x4c7   : > { %3638 = vmatpush1.bf16.msra.mxu1 %v3080_v35  ;;  %v3144_v35 = vunpack.c.l.s8.bf16 %v2768_v36 }
 0x4c8   : > { %3687 = vmatpush1.bf16.msra.mxu0 %v3176_v20  ;;  %3639 = vmatprep.subr.bf16.mxu1 %v3073_v50  ;;  %v3240_v20 = vunpack.c.l.s8.bf16 %v2816_v3  ;;  %v3137_v50 = vunpack.c.h.s8.bf16 %v2761_v23  ;;  %v3097_v3 = vunpack.c.l.s8.bf16 %v2745_v43 }
 0x4c9   : > { %3688 = vmatprep.subr.bf16.mxu0 %v3169_v1  ;;  %v3233_v1 = vunpack.c.h.s8.bf16 %v2809_v11 }
 0x4cb   : > { %3640 = vmatpush1.bf16.msra.mxu1 %v3072_v24  ;;  %v3136_v24 = vunpack.c.h.s8.bf16 %v2760_v51 }
 0x4cc   : > { %3689 = vmatpush1.bf16.msra.mxu0 %v3168_v25  ;;  %3641 = vmatprep.subr.bf16.mxu1 %v3065_v26  ;;  %v3232_v25 = vunpack.c.h.s8.bf16 %v2808_v13  ;;  %v3129_v26 = vunpack.c.l.s8.bf16 %v2761_v23 }
 0x4cd   : > { %3690 = vmatprep.subr.bf16.mxu0 %v3161_v27  ;;  %v3225_v27 = vunpack.c.l.s8.bf16 %v2809_v11  ;;  %v2938_v11 = vunpack.c.l.s8.bf16 %v2666_v55 }
 0x4cf   : > { %3642 = vmatpush1.bf16.msra.mxu1 %v3064_v57  ;;  %v3128_v57 = vunpack.c.l.s8.bf16 %v2760_v51  ;;  %v2658_v51 = vld [vmem:[%s5253_s12 + $0x60] sm:$0xff] }
 0x4d0   : > { %3691 = vmatpush1.bf16.msra.mxu0 %v3160_v32  ;;  %3643 = vmatprep.subr.bf16.mxu1 %v3057_v33  ;;  %v3224_v32 = vunpack.c.l.s8.bf16 %v2808_v13  ;;  %v3121_v33 = vunpack.c.h.s8.bf16 %v2753_v29  ;;  %v2930_v13 = vunpack.c.h.s8.bf16 %v2658_v51 }
 0x4d1   : > { %3692 = vmatprep.subr.bf16.mxu0 %v3281_v16  ;;  %v2963_v16 = vunpack.c.h.s8.bf16 %v2675_v30 }
 0x4d3   : > { %3644 = vmatpush1.bf16.msra.mxu1 %v3056_v21  ;;  %v3120_v21 = vunpack.c.h.s8.bf16 %v2752_v37 }
 0x4d4   : > { %3693 = vmatpush2.bf16.msra.mxu0 %v3280_v2  ;;  %3645 = vmatprep.subr.bf16.mxu1 %v3049_v38  ;;  %v2962_v2 = vunpack.c.h.s8.bf16 %v2674_v17  ;;  %v3113_v38 = vunpack.c.l.s8.bf16 %v2753_v29 }
 0x4d5   : > { %3694 = vmatprep.subr.bf16.mxu0 %v3273_v40  ;;  %v2955_v40 = vunpack.c.l.s8.bf16 %v2675_v30  ;;  %v2922_v30 = vunpack.c.l.s8.bf16 %v2658_v51  ;;  %v2896_v51 = vld [vmem:[%s5253_s12 + $0x7d0] sm:$0xff] }
 0x4d7   : > { %3646 = vmatpush1.bf16.msra.mxu1 %v3048_v44  ;;  %v2667_v44 = vld [vmem:[%s5253_s12 + $0xa8] sm:$0xff] }
 0x4d8   : > { %3695 = vmatpush2.bf16.msra.mxu0 %v3272_v45  ;;  %3647 = vmatprep.subr.bf16.mxu1 %v3041_v47  ;;  %v3112_v47 = vunpack.c.l.s8.bf16 %v2752_v37  ;;  %v2650_v37 = vld [vmem:[%s5253_s12 + $0x20] sm:$0xff] }
 0x4d9   : > { %3696 = vmatprep.subr.bf16.mxu0 %v3265_v10  ;;  %v2914_v17 = vunpack.c.h.s8.bf16 %v2650_v37 }
 0x4db   : > { %3648 = vmatpush1.bf16.msra.mxu1 %v3040_v49  ;;  %v3105_v49 = vunpack.c.h.s8.bf16 %v2745_v43 }
 0x4dc   : > { %3697 = vmatpush2.bf16.msra.mxu0 %v3264_v52  ;;  %3649 = vmatprep.subr.bf16.mxu1 %v3033_v53  ;;  %v2744_v52 = vld [vmem:[%s5253_s12 + $0x310] sm:$0xff] }
 0x4dd   : > { %3698 = vmatprep.subr.bf16.mxu0 %v3257_v54  ;;  %v2947_v54 = vunpack.c.h.s8.bf16 %v2667_v44  ;;  %v3096_v23 = vunpack.c.l.s8.bf16 %v2744_v52 }
 0x4df   : > { %3650 = vmatpush1.bf16.msra.mxu1 %v3032_v59 }
 0x4e0   : > { %3699 = vmatpush2.bf16.msra.mxu0 %v3256_v12  ;;  %3651 = vmatprep.subr.bf16.mxu1 %v3153_v61  ;;  %v3104_v61 = vunpack.c.h.s8.bf16 %v2744_v52 }
 0x4e1   : > { %3700 = vmatprep.subr.bf16.mxu0 %v3249_v62  ;;  %v2946_v62 = vunpack.c.h.s8.bf16 %v2666_v55  ;;  %v2699_v55 = vld [vmem:[%s5253_s12 + $0x1a8] sm:$0xff] }
 0x4e3   : > { %3652 = vmatpush2.bf16.msra.mxu1 %v3152_v7 }
 0x4e4   : > { %3701 = vmatpush2.bf16.msra.mxu0 %v3248_v15  ;;  %3653 = vmatprep.subr.bf16.mxu1 %v3145_v22  ;;  %v2939_v15 = vunpack.c.l.s8.bf16 %v2667_v44  ;;  %v2865_v22 = vld [vmem:[%s5253_s12 + $0x6d8] sm:$0xff] }
 0x4e5   : > { %3702 = vmatprep.subr.bf16.mxu0 %v3241_v31  ;;  %v2659_v31 = vld [vmem:[%s5253_s12 + $0x68] sm:$0xff] }
 0x4e7   : > { %3654 = vmatpush2.bf16.msra.mxu1 %v3144_v35  ;;  %v3345_v35 = vunpack.c.h.s8.bf16 %v2865_v22 }
 0x4e8   : > { %3703 = vmatpush2.bf16.msra.mxu0 %v3240_v20  ;;  %3655 = vmatprep.subr.bf16.mxu1 %v3137_v50  ;;  %v2864_v20 = vld [vmem:[%s5253_s12 + $0x6d0] sm:$0xff]  ;;  %v2931_v50 = vunpack.c.h.s8.bf16 %v2659_v31 }
 0x4e9   : > { %3704 = vmatprep.subr.bf16.mxu0 %v3233_v1  ;;  %v3344_v1 = vunpack.c.h.s8.bf16 %v2864_v20  ;;  %v3336_v29 = vunpack.c.l.s8.bf16 %v2864_v20 }
 0x4eb   : > { %3656 = vmatpush2.bf16.msra.mxu1 %v3136_v24  ;;  %v3337_v24 = vunpack.c.l.s8.bf16 %v2865_v22 }
 0x4ec   : > { %3705 = vmatpush2.bf16.msra.mxu0 %v3232_v25  ;;  %3657 = vmatprep.subr.bf16.mxu1 %v3129_v26  ;;  %v2923_v25 = vunpack.c.l.s8.bf16 %v2659_v31  ;;  %v2857_v26 = vld [vmem:[%s5253_s12 + $0x698] sm:$0xff]  ;;  %v3003_v31 = vunpack.c.l.s8.bf16 %v2699_v55 }
 0x4ed   : > { %3706 = vmatprep.subr.bf16.mxu0 %v3225_v27  ;;  %v2651_v27 = vld [vmem:[%s5253_s12 + $0x28] sm:$0xff] }
 0x4ef   : > { %3658 = vmatpush2.bf16.msra.mxu1 %v3128_v57  ;;  %v3329_v57 = vunpack.c.h.s8.bf16 %v2857_v26 }
 0x4f0   : > { %3707 = vmatpush2.bf16.msra.mxu0 %v3224_v32  ;;  %3659 = vmatprep.subr.bf16.mxu1 %v3121_v33  ;;  %v2856_v32 = vld [vmem:[%s5253_s12 + $0x690] sm:$0xff]  ;;  %v2915_v33 = vunpack.c.h.s8.bf16 %v2651_v27 }
 0x4f1   : > { %3758 = vmatprep.subr.bf16.mxu0 %v2963_v16  ;;  %v3328_v16 = vunpack.c.h.s8.bf16 %v2856_v32  ;;  %v3320_v43 = vunpack.c.l.s8.bf16 %v2856_v32 }
 0x4f2   : > { %v3464_v6 = vpop.f32.mrf.mxu0 }
 0x4f3   : > { %v3505_v45 = vpop.f32.mrf.mxu1  ;;  %3660 = vmatpush2.bf16.msra.mxu1 %v3120_v21  ;;  %3709 = vmatmul.mubr.bf16.vlgmr.msra.gmra.mxu0 %v5770_v8  ;;  %v3321_v21 = vunpack.c.l.s8.bf16 %v2857_v26 }
 0x4f4   : > { %v5846_v48 = vadd.f32 %v3505_v45, %v3464_v6  ;;  %3759 = vmatpush1.bf16.msra.mxu0 %v2962_v2  ;;  %3790 = vmatprep.mubr.bf16.mxu0 %v5645_v63  ;;  %v3466_v10 = vpop.f32.mrf.mxu0  ;;  %v2907_v2 = vunpack.c.l.s8.bf16 %v2651_v27  ;;  %v2906_v6 = vunpack.c.l.s8.bf16 %v2650_v37  ;;  %v2848_v45 = vld [vmem:[%s5253_s12 + $0x650] sm:$0xff] }
 0x4f5   : > { %v3507_v53 = vpop.f32.mrf.mxu1  ;;  %3661 = vmatprep.subr.bf16.mxu1 %v3113_v38  ;;  %3760 = vmatprep.subr.bf16.mxu0 %v2955_v40  ;;  %v2849_v38 = vld [vmem:[%s5253_s12 + $0x658] sm:$0xff]  ;;  %v2707_v40 = vld [vmem:[%s5253_s12 + $0x1e8] sm:$0xff]  ;;  %v2888_v37 = vld [vmem:[%s5253_s12 + $0x790] sm:$0xff] }
 0x4f6   : > { %v5851_v58 = vadd.f32 %v3507_v53, %v3466_v10  ;;  %v3468_v59 = vpop.f32.mrf.mxu0  ;;  %v3313_v44 = vunpack.c.h.s8.bf16 %v2849_v38  ;;  %v2706_v10 = vld [vmem:[%s5253_s12 + $0x1e0] sm:$0xff]  ;;  %v3305_v52 = vunpack.c.l.s8.bf16 %v2849_v38  ;;  %v3019_v53 = vunpack.c.l.s8.bf16 %v2707_v40 }
 0x4f7   : > { %v3509_v12 = vpop.f32.mrf.mxu1  ;;  %3662 = vmatpush2.bf16.msra.mxu1 %v3112_v47  ;;  %v3027_v47 = vunpack.c.h.s8.bf16 %v2707_v40  ;;  %v3304_v59 = vunpack.c.l.s8.bf16 %v2848_v45 }
 0x4f8   : > { %3761 = vmatpush1.bf16.msra.mxu0 %v2954_v46  ;;  %v3469_v36 = vpop.f32.mrf.mxu0  ;;  %3663 = vmatprep.subr.bf16.mxu1 %v3105_v49  ;;  %v3312_v46 = vunpack.c.h.s8.bf16 %v2848_v45  ;;  %v3026_v49 = vunpack.c.h.s8.bf16 %v2706_v10  ;;  %v3018_v12 = vunpack.c.l.s8.bf16 %v2706_v10  ;;  %v2880_v10 = vld [vmem:[%s5253_s12 + $0x750] sm:$0xff] }
 0x4f9   : > { %v3510_v7 = vpop.f32.mrf.mxu1  ;;  %3762 = vmatprep.subr.bf16.mxu0 %v2947_v54  ;;  %v2841_v54 = vld [vmem:[%s5253_s12 + $0x618] sm:$0xff]  ;;  %v2840_v36 = vld [vmem:[%s5253_s12 + $0x610] sm:$0xff] }
 0x4fa   : > { %v3296_v7 = vunpack.c.h.s8.bf16 %v2840_v36  ;;  %v3289_v22 = vunpack.c.l.s8.bf16 %v2841_v54 }
 0x4fb   : > { %3664 = vmatpush2.bf16.msra.mxu1 %v3104_v61  ;;  %v3297_v61 = vunpack.c.h.s8.bf16 %v2841_v54 }
 0x4fc   : > { %3763 = vmatpush1.bf16.msra.mxu0 %v2946_v62  ;;  %3665 = vmatprep.subr.bf16.mxu1 %v3097_v3  ;;  %v3011_v62 = vunpack.c.h.s8.bf16 %v2699_v55  ;;  %v2698_v3 = vld [vmem:[%s5253_s12 + $0x1a0] sm:$0xff] }
 0x4fd   : > { %3764 = vmatprep.subr.bf16.mxu0 %v2939_v15  ;;  %v3010_v15 = vunpack.c.h.s8.bf16 %v2698_v3  ;;  %v3002_v20 = vunpack.c.l.s8.bf16 %v2698_v3 }
 0x4ff   : > { %3666 = vmatpush2.bf16.msra.mxu1 %v3096_v23  ;;  %v2897_v23 = vld [vmem:[%s5253_s12 + $0x7d8] sm:$0xff] }
 0x500   : > { %3765 = vmatpush1.bf16.msra.mxu0 %v2938_v11  ;;  %3717 = vmatprep.subr.bf16.mxu1 %v3345_v35  ;;  %v2691_v11 = vld [vmem:[%s5253_s12 + $0x168] sm:$0xff]  ;;  %v3288_v35 = vunpack.c.l.s8.bf16 %v2840_v36  ;;  %v3401_v26 = vunpack.c.l.s8.bf16 %v2897_v23 }
 0x501   : > { %3766 = vmatprep.subr.bf16.mxu0 %v2931_v50  ;;  %v3409_v50 = vunpack.c.h.s8.bf16 %v2897_v23  ;;  %v2987_v27 = vunpack.c.l.s8.bf16 %v2691_v11  ;;  %v2794_v23 = vld [vmem:[%s5253_s12 + $0x4a0] sm:$0xff] }
 0x502   : > { %3668 = vmatmul.mubr.bf16.vlgmr.msra.gmra.mxu1 %v5707_v5 }
 0x503   : > { %3718 = vmatpush1.bf16.msra.mxu1 %v3344_v1  ;;  %3749 = vmatprep.mubr.bf16.mxu1 %v5811_v4  ;;  %v2995_v1 = vunpack.c.h.s8.bf16 %v2691_v11 }
 0x504   : > { %3767 = vmatpush1.bf16.msra.mxu0 %v2930_v13  ;;  %3719 = vmatprep.subr.bf16.mxu1 %v3337_v24  ;;  %v2690_v13 = vld [vmem:[%s5253_s12 + $0x160] sm:$0xff]  ;;  %v3408_v24 = vunpack.c.h.s8.bf16 %v2896_v51 }
 0x505   : > { %3768 = vmatprep.subr.bf16.mxu0 %v2923_v25  ;;  %v2994_v25 = vunpack.c.h.s8.bf16 %v2690_v13  ;;  %v2986_v32 = vunpack.c.l.s8.bf16 %v2690_v13  ;;  %v2739_v13 = vld [vmem:[%s5253_s12 + $0x2e8] sm:$0xff] }
 0x507   : > { %3720 = vmatpush1.bf16.msra.mxu1 %v3336_v29  ;;  %v2889_v29 = vld [vmem:[%s5253_s12 + $0x798] sm:$0xff] }
 0x508   : > { %3769 = vmatpush1.bf16.msra.mxu0 %v2922_v30  ;;  %3721 = vmatprep.subr.bf16.mxu1 %v3329_v57  ;;  %v2683_v30 = vld [vmem:[%s5253_s12 + $0x128] sm:$0xff]  ;;  %v3400_v57 = vunpack.c.l.s8.bf16 %v2896_v51  ;;  %v3385_v38 = vunpack.c.l.s8.bf16 %v2889_v29 }
 0x509   : > { %3770 = vmatprep.subr.bf16.mxu0 %v2915_v33  ;;  %v3393_v33 = vunpack.c.h.s8.bf16 %v2889_v29  ;;  %v2971_v40 = vunpack.c.l.s8.bf16 %v2683_v30 }
 0x50b   : > { %3722 = vmatpush1.bf16.msra.mxu1 %v3328_v16  ;;  %v2979_v16 = vunpack.c.h.s8.bf16 %v2683_v30  ;;  %v2786_v30 = vld [vmem:[%s5253_s12 + $0x460] sm:$0xff] }
 0x50c   : > { %3771 = vmatpush1.bf16.msra.mxu0 %v2914_v17  ;;  %3723 = vmatprep.subr.bf16.mxu1 %v3321_v21  ;;  %v2682_v17 = vld [vmem:[%s5253_s12 + $0x120] sm:$0xff]  ;;  %v3392_v21 = vunpack.c.h.s8.bf16 %v2888_v37 }
 0x50d   : > { %3772 = vmatprep.subr.bf16.mxu0 %v2907_v2  ;;  %v2978_v2 = vunpack.c.h.s8.bf16 %v2682_v17  ;;  %v2970_v45 = vunpack.c.l.s8.bf16 %v2682_v17  ;;  %v2779_v17 = vld [vmem:[%s5253_s12 + $0x428] sm:$0xff] }
 0x50f   : > { %3724 = vmatpush1.bf16.msra.mxu1 %v3320_v43  ;;  %v2881_v43 = vld [vmem:[%s5253_s12 + $0x758] sm:$0xff] }
 0x510   : > { %3773 = vmatpush1.bf16.msra.mxu0 %v2906_v6  ;;  %3725 = vmatprep.subr.bf16.mxu1 %v3313_v44  ;;  %v2803_v6 = vld [vmem:[%s5253_s12 + $0x4e8] sm:$0xff]  ;;  %v3384_v44 = vunpack.c.l.s8.bf16 %v2888_v37  ;;  %v3369_v54 = vunpack.c.l.s8.bf16 %v2881_v43 }
 0x511   : > { %3774 = vmatprep.subr.bf16.mxu0 %v3027_v47  ;;  %v3377_v47 = vunpack.c.h.s8.bf16 %v2881_v43  ;;  %v3211_v55 = vunpack.c.l.s8.bf16 %v2803_v6  ;;  %v3171_v43 = vunpack.c.h.s8.bf16 %v2779_v17 }
 0x513   : > { %3726 = vmatpush1.bf16.msra.mxu1 %v3312_v46  ;;  %v3219_v46 = vunpack.c.h.s8.bf16 %v2803_v6  ;;  %v2778_v6 = vld [vmem:[%s5253_s12 + $0x420] sm:$0xff] }
 0x514   : > { %3775 = vmatpush2.bf16.msra.mxu0 %v3026_v49  ;;  %3727 = vmatprep.subr.bf16.mxu1 %v3305_v52  ;;  %v2802_v49 = vld [vmem:[%s5253_s12 + $0x4e0] sm:$0xff]  ;;  %v3376_v52 = vunpack.c.h.s8.bf16 %v2880_v10 }
 0x515   : > { %3776 = vmatprep.subr.bf16.mxu0 %v3019_v53  ;;  %v3218_v53 = vunpack.c.h.s8.bf16 %v2802_v49 }
 0x517   : > { %3728 = vmatpush1.bf16.msra.mxu1 %v3304_v59  ;;  %v2873_v59 = vld [vmem:[%s5253_s12 + $0x718] sm:$0xff] }
 0x518   : > { %3777 = vmatpush2.bf16.msra.mxu0 %v3018_v12  ;;  %3729 = vmatprep.subr.bf16.mxu1 %v3297_v61  ;;  %v2795_v61 = vld [vmem:[%s5253_s12 + $0x4a8] sm:$0xff]  ;;  %v3353_v51 = vunpack.c.l.s8.bf16 %v2873_v59 }
 0x519   : > { %3778 = vmatprep.subr.bf16.mxu0 %v3011_v62  ;;  %v3368_v62 = vunpack.c.l.s8.bf16 %v2880_v10  ;;  %v3163_v10 = vunpack.c.l.s8.bf16 %v2779_v17 }
 0x51b   : > { %3730 = vmatpush1.bf16.msra.mxu1 %v3296_v7  ;;  %v3210_v7 = vunpack.c.l.s8.bf16 %v2802_v49  ;;  %v2835_v49 = vld [vmem:[%s5253_s12 + $0x5e8] sm:$0xff] }
 0x51c   : > { %3779 = vmatpush2.bf16.msra.mxu0 %v3010_v15  ;;  %3731 = vmatprep.subr.bf16.mxu1 %v3289_v22  ;;  %v3361_v15 = vunpack.c.h.s8.bf16 %v2873_v59  ;;  %v2872_v22 = vld [vmem:[%s5253_s12 + $0x710] sm:$0xff]  ;;  %v3283_v59 = vunpack.c.h.s8.bf16 %v2835_v49 }
 0x51d   : > { %3780 = vmatprep.subr.bf16.mxu0 %v3003_v31 }
 0x51f   : > { %3732 = vmatpush1.bf16.msra.mxu1 %v3288_v35  ;;  %v3360_v35 = vunpack.c.h.s8.bf16 %v2872_v22 }
 0x520   : > { %3781 = vmatpush2.bf16.msra.mxu0 %v3002_v20  ;;  %3733 = vmatprep.subr.bf16.mxu1 %v3409_v50  ;;  %v3202_v50 = vunpack.c.h.s8.bf16 %v2794_v23 }
 0x521   : > { %3782 = vmatprep.subr.bf16.mxu0 %v2995_v1  ;;  %v3195_v1 = vunpack.c.l.s8.bf16 %v2795_v61 }
 0x523   : > { %3734 = vmatpush2.bf16.msra.mxu1 %v3408_v24  ;;  %v3352_v24 = vunpack.c.l.s8.bf16 %v2872_v22  ;;  %v2827_v22 = vld [vmem:[%s5253_s12 + $0x5a8] sm:$0xff] }
 0x524   : > { %3783 = vmatpush2.bf16.msra.mxu0 %v2994_v25  ;;  %3735 = vmatprep.subr.bf16.mxu1 %v3401_v26  ;;  %v3194_v25 = vunpack.c.l.s8.bf16 %v2794_v23  ;;  %v3091_v26 = vunpack.c.h.s8.bf16 %v2739_v13 }
 0x525   : > { %3784 = vmatprep.subr.bf16.mxu0 %v2987_v27  ;;  %v2738_v27 = vld [vmem:[%s5253_s12 + $0x2e0] sm:$0xff] }
 0x527   : > { %3736 = vmatpush2.bf16.msra.mxu1 %v3400_v57  ;;  %v3090_v57 = vunpack.c.h.s8.bf16 %v2738_v27 }
 0x528   : > { %3785 = vmatpush2.bf16.msra.mxu0 %v2986_v32  ;;  %3737 = vmatprep.subr.bf16.mxu1 %v3393_v33  ;;  %v3186_v32 = vunpack.c.h.s8.bf16 %v2786_v30  ;;  %v3083_v33 = vunpack.c.l.s8.bf16 %v2739_v13 }
 0x529   : > { %3786 = vmatprep.subr.bf16.mxu0 %v2979_v16  ;;  %v2731_v16 = vld [vmem:[%s5253_s12 + $0x2a8] sm:$0xff] }
 0x52b   : > { %3738 = vmatpush2.bf16.msra.mxu1 %v3392_v21  ;;  %v3082_v21 = vunpack.c.l.s8.bf16 %v2738_v27 }
 0x52c   : > { %3787 = vmatpush2.bf16.msra.mxu0 %v2978_v2  ;;  %3739 = vmatprep.subr.bf16.mxu1 %v3385_v38  ;;  %v3178_v2 = vunpack.c.l.s8.bf16 %v2786_v30  ;;  %v3075_v38 = vunpack.c.h.s8.bf16 %v2731_v16  ;;  %v2770_v30 = vld [vmem:[%s5253_s12 + $0x3e0] sm:$0xff] }
 0x52d   : > { %3788 = vmatprep.subr.bf16.mxu0 %v2971_v40  ;;  %v2730_v40 = vld [vmem:[%s5253_s12 + $0x2a0] sm:$0xff] }
 0x52f   : > { %3740 = vmatpush2.bf16.msra.mxu1 %v3384_v44  ;;  %v3074_v44 = vunpack.c.h.s8.bf16 %v2730_v40 }
 0x530   : > { %3789 = vmatpush2.bf16.msra.mxu0 %v2970_v45  ;;  %3741 = vmatprep.subr.bf16.mxu1 %v3377_v47  ;;  %v3170_v45 = vunpack.c.h.s8.bf16 %v2778_v6  ;;  %v3067_v47 = vunpack.c.l.s8.bf16 %v2731_v16 }
 0x531   : > { %3840 = vmatprep.subr.bf16.mxu0 %v3219_v46  ;;  %v2723_v46 = vld [vmem:[%s5253_s12 + $0x268] sm:$0xff] }
 0x532   : > { %v3546_v12 = vpop.f32.mrf.mxu0 }
 0x533   : > { %v5886_v36 = vadd.f32 %v3546_v12, %v5846_v48  ;;  %3742 = vmatpush2.bf16.msra.mxu1 %v3376_v52  ;;  %3791 = vmatmul.mubr.bf16.vlgmr.msra.gmra.mxu0 %v5705_v60  ;;  %v3203_v48 = vunpack.c.h.s8.bf16 %v2795_v61  ;;  %v3066_v52 = vunpack.c.l.s8.bf16 %v2730_v40  ;;  %v2834_v12 = vld [vmem:[%s5253_s12 + $0x5e0] sm:$0xff] }
 0x534   : > { %3841 = vmatpush1.bf16.msra.mxu0 %v3218_v53  ;;  %3872 = vmatprep.mubr.bf16.mxu0 %v5730_v14  ;;  %v3548_v3 = vpop.f32.mrf.mxu0  ;;  %v3162_v53 = vunpack.c.l.s8.bf16 %v2778_v6  ;;  %v3274_v23 = vunpack.c.l.s8.bf16 %v2834_v12  ;;  %v2762_v6 = vld [vmem:[%s5253_s12 + $0x3a0] sm:$0xff] }
 0x535   : > { %v5892_v31 = vadd.f32 %v3548_v3, %v5851_v58  ;;  %3743 = vmatprep.subr.bf16.mxu1 %v3369_v54  ;;  %3842 = vmatprep.subr.bf16.mxu0 %v3211_v55  ;;  %v2787_v58 = vld [vmem:[%s5253_s12 + $0x468] sm:$0xff]  ;;  %v3059_v54 = vunpack.c.h.s8.bf16 %v2723_v46  ;;  %v2722_v55 = vld [vmem:[%s5253_s12 + $0x260] sm:$0xff]  ;;  %v3051_v3 = vunpack.c.l.s8.bf16 %v2723_v46 }
 0x536   : > { %v3550_v11 = vpop.f32.mrf.mxu0  ;;  %v3187_v29 = vunpack.c.h.s8.bf16 %v2787_v58  ;;  %v3179_v37 = vunpack.c.l.s8.bf16 %v2787_v58  ;;  %v3058_v61 = vunpack.c.h.s8.bf16 %v2722_v55  ;;  %v3259_v58 = vunpack.c.l.s8.bf16 %v2827_v22 }
 0x537   : > { %3744 = vmatpush2.bf16.msra.mxu1 %v3368_v62  ;;  %v3282_v62 = vunpack.c.h.s8.bf16 %v2834_v12  ;;  %v2754_v12 = vld [vmem:[%s5253_s12 + $0x360] sm:$0xff] }
 0x538   : > { %3843 = vmatpush1.bf16.msra.mxu0 %v3210_v7  ;;  %v3551_v20 = vpop.f32.mrf.mxu0  ;;  %3745 = vmatprep.subr.bf16.mxu1 %v3361_v15  ;;  %v3275_v7 = vunpack.c.l.s8.bf16 %v2835_v49  ;;  %v2715_v15 = vld [vmem:[%s5253_s12 + $0x228] sm:$0xff] }
 0x539   : > { %3844 = vmatprep.subr.bf16.mxu0 %v3203_v48  ;;  %v3050_v48 = vunpack.c.l.s8.bf16 %v2722_v55  ;;  %v3043_v11 = vunpack.c.h.s8.bf16 %v2715_v15  ;;  %v3267_v20 = vunpack.c.h.s8.bf16 %v2827_v22  ;;  %v3035_v13 = vunpack.c.l.s8.bf16 %v2715_v15 }
 0x53b   : > { %3746 = vmatpush2.bf16.msra.mxu1 %v3360_v35  ;;  %v2714_v35 = vld [vmem:[%s5253_s12 + $0x220] sm:$0xff] }
 0x53c   : > { %3845 = vmatpush1.bf16.msra.mxu0 %v3202_v50  ;;  %3747 = vmatprep.subr.bf16.mxu1 %v3353_v51  ;;  %v2826_v50 = vld [vmem:[%s5253_s12 + $0x5a0] sm:$0xff]  ;;  %v3042_v51 = vunpack.c.h.s8.bf16 %v2714_v35 }
 0x53d   : > { %3846 = vmatprep.subr.bf16.mxu0 %v3195_v1  ;;  %v3266_v1 = vunpack.c.h.s8.bf16 %v2826_v50  ;;  %v3258_v27 = vunpack.c.l.s8.bf16 %v2826_v50 }
 0x53f   : > { %3748 = vmatpush2.bf16.msra.mxu1 %v3352_v24  ;;  %v2771_v24 = vld [vmem:[%s5253_s12 + $0x3e8] sm:$0xff] }
 0x540   : > { %3847 = vmatpush1.bf16.msra.mxu0 %v3194_v25  ;;  %3799 = vmatprep.subr.bf16.mxu1 %v3091_v26  ;;  %v2819_v25 = vld [vmem:[%s5253_s12 + $0x568] sm:$0xff]  ;;  %v3034_v26 = vunpack.c.l.s8.bf16 %v2714_v35  ;;  %v3147_v16 = vunpack.c.l.s8.bf16 %v2771_v24  ;;  %v3114_v35 = vunpack.c.l.s8.bf16 %v2754_v12 }
 0x541   : > { %3848 = vmatprep.subr.bf16.mxu0 %v3187_v29  ;;  %v3155_v29 = vunpack.c.h.s8.bf16 %v2771_v24  ;;  %v3243_v17 = vunpack.c.l.s8.bf16 %v2819_v25 }
 0x542   : > { %3750 = vmatmul.mubr.bf16.vlgmr.msra.gmra.mxu1 %v5813_v42 }
 0x543   : > { %3800 = vmatpush1.bf16.msra.mxu1 %v3090_v57  ;;  %3831 = vmatprep.mubr.bf16.mxu1 %v5648_v9  ;;  %v3251_v57 = vunpack.c.h.s8.bf16 %v2819_v25 }
 0x544   : > { %3849 = vmatpush1.bf16.msra.mxu0 %v3186_v32  ;;  %3801 = vmatprep.subr.bf16.mxu1 %v3083_v33  ;;  %v2818_v32 = vld [vmem:[%s5253_s12 + $0x560] sm:$0xff]  ;;  %v3154_v33 = vunpack.c.h.s8.bf16 %v2770_v30 }
 0x545   : > { %3850 = vmatprep.subr.bf16.mxu0 %v3179_v37  ;;  %v3250_v37 = vunpack.c.h.s8.bf16 %v2818_v32  ;;  %v3242_v40 = vunpack.c.l.s8.bf16 %v2818_v32 }
 0x547   : > { %3802 = vmatpush1.bf16.msra.mxu1 %v3082_v21  ;;  %v2763_v21 = vld [vmem:[%s5253_s12 + $0x3a8] sm:$0xff] }
 0x548   : > { %3851 = vmatpush1.bf16.msra.mxu0 %v3178_v2  ;;  %3803 = vmatprep.subr.bf16.mxu1 %v3075_v38  ;;  %v2811_v2 = vld [vmem:[%s5253_s12 + $0x528] sm:$0xff]  ;;  %v3146_v38 = vunpack.c.l.s8.bf16 %v2770_v30  ;;  %v3131_v46 = vunpack.c.l.s8.bf16 %v2763_v21 }
 0x549   : > { %3852 = vmatprep.subr.bf16.mxu0 %v3171_v43  ;;  %v3139_v43 = vunpack.c.h.s8.bf16 %v2763_v21  ;;  %v3227_v49 = vunpack.c.l.s8.bf16 %v2811_v2  ;;  %v2867_v30 = vld [vmem:[%s5253_s12 + $0x6e8] sm:$0xff]  ;;  %v2660_v21 = vld [vmem:[%s5253_s12 + $0x70] sm:$0xff] }
 0x54b   : > { %3804 = vmatpush1.bf16.msra.mxu1 %v3074_v44  ;;  %v3235_v44 = vunpack.c.h.s8.bf16 %v2811_v2 }
 0x54c   : > { %3853 = vmatpush1.bf16.msra.mxu0 %v3170_v45  ;;  %3805 = vmatprep.subr.bf16.mxu1 %v3067_v47  ;;  %v2810_v45 = vld [vmem:[%s5253_s12 + $0x520] sm:$0xff]  ;;  %v3138_v47 = vunpack.c.h.s8.bf16 %v2762_v6 }
 0x54d   : > { %3854 = vmatprep.subr.bf16.mxu0 %v3163_v10  ;;  %v3234_v10 = vunpack.c.h.s8.bf16 %v2810_v45  ;;  %v3226_v55 = vunpack.c.l.s8.bf16 %v2810_v45 }
 0x54f   : > { %3806 = vmatpush1.bf16.msra.mxu1 %v3066_v52  ;;  %v2755_v52 = vld [vmem:[%s5253_s12 + $0x368] sm:$0xff] }
 0x550   : > { %3855 = vmatpush1.bf16.msra.mxu0 %v3162_v53  ;;  %3807 = vmatprep.subr.bf16.mxu1 %v3059_v54  ;;  %v2677_v53 = vld [vmem:[%s5253_s12 + $0xf8] sm:$0xff]  ;;  %v3130_v54 = vunpack.c.l.s8.bf16 %v2762_v6  ;;  %v3115_v15 = vunpack.c.l.s8.bf16 %v2755_v52  ;;  %v2859_v6 = vld [vmem:[%s5253_s12 + $0x6a8] sm:$0xff] }
 0x551   : > { %3856 = vmatprep.subr.bf16.mxu0 %v3283_v59  ;;  %v3123_v59 = vunpack.c.h.s8.bf16 %v2755_v52  ;;  %v2957_v22 = vunpack.c.l.s8.bf16 %v2677_v53 }
 0x553   : > { %3808 = vmatpush1.bf16.msra.mxu1 %v3058_v61  ;;  %v2965_v61 = vunpack.c.h.s8.bf16 %v2677_v53  ;;  %v2924_v53 = vunpack.c.l.s8.bf16 %v2660_v21 }
 0x554   : > { %3857 = vmatpush2.bf16.msra.mxu0 %v3282_v62  ;;  %3809 = vmatprep.subr.bf16.mxu1 %v3051_v3  ;;  %v2676_v62 = vld [vmem:[%s5253_s12 + $0xf0] sm:$0xff]  ;;  %v3122_v3 = vunpack.c.h.s8.bf16 %v2754_v12 }
 0x555   : > { %3858 = vmatprep.subr.bf16.mxu0 %v3275_v7  ;;  %v2964_v7 = vunpack.c.h.s8.bf16 %v2676_v62  ;;  %v2956_v50 = vunpack.c.l.s8.bf16 %v2676_v62  ;;  %v2652_v62 = vld [vmem:[%s5253_s12 + $0x30] sm:$0xff] }
 0x557   : > { %3810 = vmatpush1.bf16.msra.mxu1 %v3050_v48  ;;  %v2747_v48 = vld [vmem:[%s5253_s12 + $0x328] sm:$0xff] }
 0x558   : > { %3859 = vmatpush2.bf16.msra.mxu0 %v3274_v23  ;;  %3811 = vmatprep.subr.bf16.mxu1 %v3043_v11  ;;  %v2669_v11 = vld [vmem:[%s5253_s12 + $0xb8] sm:$0xff] }
 0x559   : > { %3860 = vmatprep.subr.bf16.mxu0 %v3267_v20 }
 0x55b   : > { %3812 = vmatpush1.bf16.msra.mxu1 %v3042_v51  ;;  %v3107_v51 = vunpack.c.h.s8.bf16 %v2747_v48 }
 0x55c   : > { %3861 = vmatpush2.bf16.msra.mxu0 %v3266_v1  ;;  %3813 = vmatprep.subr.bf16.mxu1 %v3035_v13  ;;  %v2746_v1 = vld [vmem:[%s5253_s12 + $0x320] sm:$0xff]  ;;  %v2949_v13 = vunpack.c.h.s8.bf16 %v2669_v11 }
 0x55d   : > { %3862 = vmatprep.subr.bf16.mxu0 %v3259_v58  ;;  %v2668_v58 = vld [vmem:[%s5253_s12 + $0xb0] sm:$0xff]  ;;  %v3106_v25 = vunpack.c.h.s8.bf16 %v2746_v1  ;;  %v3098_v32 = vunpack.c.l.s8.bf16 %v2746_v1 }
 0x55f   : > { %3814 = vmatpush1.bf16.msra.mxu1 %v3034_v26 }
 0x560   : > { %3863 = vmatpush2.bf16.msra.mxu0 %v3258_v27  ;;  %3815 = vmatprep.subr.bf16.mxu1 %v3155_v29  ;;  %v3099_v27 = vunpack.c.l.s8.bf16 %v2747_v48  ;;  %v2941_v29 = vunpack.c.l.s8.bf16 %v2669_v11  ;;  %v3323_v48 = vunpack.c.l.s8.bf16 %v2859_v6  ;;  %v2851_v11 = vld [vmem:[%s5253_s12 + $0x668] sm:$0xff] }
 0x561   : > { %3864 = vmatprep.subr.bf16.mxu0 %v3251_v57  ;;  %v2661_v57 = vld [vmem:[%s5253_s12 + $0x78] sm:$0xff]  ;;  %v3315_v1 = vunpack.c.h.s8.bf16 %v2851_v11 }
 0x563   : > { %3816 = vmatpush2.bf16.msra.mxu1 %v3154_v33  ;;  %v2940_v33 = vunpack.c.l.s8.bf16 %v2668_v58 }
 0x564   : > { %3865 = vmatpush2.bf16.msra.mxu0 %v3250_v37  ;;  %3817 = vmatprep.subr.bf16.mxu1 %v3147_v16  ;;  %v3347_v37 = vunpack.c.h.s8.bf16 %v2867_v30  ;;  %v2866_v16 = vld [vmem:[%s5253_s12 + $0x6e0] sm:$0xff] }
 0x565   : > { %3866 = vmatprep.subr.bf16.mxu0 %v3243_v17  ;;  %v2933_v17 = vunpack.c.h.s8.bf16 %v2661_v57  ;;  %v3346_v2 = vunpack.c.h.s8.bf16 %v2866_v16 }
 0x567   : > { %3818 = vmatpush2.bf16.msra.mxu1 %v3146_v38  ;;  %v2932_v38 = vunpack.c.h.s8.bf16 %v2660_v21 }
 0x568   : > { %3867 = vmatpush2.bf16.msra.mxu0 %v3242_v40  ;;  %3819 = vmatprep.subr.bf16.mxu1 %v3139_v43  ;;  %v3339_v40 = vunpack.c.l.s8.bf16 %v2867_v30  ;;  %v2925_v43 = vunpack.c.l.s8.bf16 %v2661_v57  ;;  %v2701_v30 = vld [vmem:[%s5253_s12 + $0x1b8] sm:$0xff] }
 0x569   : > { %3868 = vmatprep.subr.bf16.mxu0 %v3235_v44  ;;  %v3414_v44 = vld [vmem:[#allocation3] sm:$0xff] }
 0x56b   : > { %3820 = vmatpush2.bf16.msra.mxu1 %v3138_v47  ;;  %v2653_v47 = vld [vmem:[%s5253_s12 + $0x38] sm:$0xff] }
 0x56c   : > { %3869 = vmatpush2.bf16.msra.mxu0 %v3234_v10  ;;  %3821 = vmatprep.subr.bf16.mxu1 %v3131_v46  ;;  %v3338_v46 = vunpack.c.l.s8.bf16 %v2866_v16  ;;  %v3013_v16 = vunpack.c.h.s8.bf16 %v2701_v30 }
 0x56d   : > { %3870 = vmatprep.subr.bf16.mxu0 %v3227_v49  ;;  %v3415_v49 = vld [vmem:[#allocation3 + $0x18] sm:$0xff] }
 0x56f   : > { %3822 = vmatpush2.bf16.msra.mxu1 %v3130_v54  ;;  %v3331_v54 = vunpack.c.h.s8.bf16 %v2859_v6  ;;  %v2693_v6 = vld [vmem:[%s5253_s12 + $0x178] sm:$0xff] }
 0x570   : > { %3871 = vmatpush2.bf16.msra.mxu0 %v3226_v55  ;;  %3823 = vmatprep.subr.bf16.mxu1 %v3123_v59  ;;  %v2858_v55 = vld [vmem:[%s5253_s12 + $0x6a0] sm:$0xff] }
 0x571   : > { %3922 = vmatprep.subr.bf16.mxu0 %v2965_v61  ;;  %v2917_v61 = vunpack.c.h.s8.bf16 %v2653_v47 }
 0x572   : > { %v5926_v23 = vpop.f32.mrf.mxu0 }
 0x573   : > { %3824 = vmatpush2.bf16.msra.mxu1 %v3122_v3  ;;  %3873 = vmatmul.mubr.bf16.vlgmr.msra.gmra.mxu0 %v5770_v8 }
 0x574   : > { %3923 = vmatpush1.bf16.msra.mxu0 %v2964_v7  ;;  %3954 = vmatprep.mubr.bf16.mxu0 %v5645_v63  ;;  %v5931_v20 = vpop.f32.mrf.mxu0  ;;  %v2948_v63 = vunpack.c.h.s8.bf16 %v2668_v58  ;;  %v3330_v7 = vunpack.c.h.s8.bf16 %v2858_v55 }
 0x575   : > { %3825 = vmatprep.subr.bf16.mxu1 %v3115_v15  ;;  %3924 = vmatprep.subr.bf16.mxu0 %v2957_v22  ;;  %v2916_v22 = vunpack.c.h.s8.bf16 %v2652_v62 }
 0x576   : > { %v3632_v24 = vpop.f32.mrf.mxu0 }
 0x577   : > { %3826 = vmatpush2.bf16.msra.mxu1 %v3114_v35  ;;  %v2709_v35 = vld [vmem:[%s5253_s12 + $0x1f8] sm:$0xff]  ;;  %v2708_v24 = vld [vmem:[%s5253_s12 + $0x1f0] sm:$0xff] }
 0x578   : > { %3925 = vmatpush1.bf16.msra.mxu0 %v2956_v50  ;;  %v3633_v26 = vpop.f32.mrf.mxu0  ;;  %3827 = vmatprep.subr.bf16.mxu1 %v3107_v51  ;;  %v3322_v50 = vunpack.c.l.s8.bf16 %v2858_v55  ;;  %v2908_v51 = vunpack.c.l.s8.bf16 %v2652_v62  ;;  %v3029_v58 = vunpack.c.h.s8.bf16 %v2709_v35  ;;  %v2989_v55 = vunpack.c.l.s8.bf16 %v2693_v6 }
 0x579   : > { %3926 = vmatprep.subr.bf16.mxu0 %v2949_v13  ;;  %v2850_v13 = vld [vmem:[%s5253_s12 + $0x660] sm:$0xff]  ;;  %v3028_v26 = vunpack.c.h.s8.bf16 %v2708_v24 }
 0x57a   : > { %v3306_v57 = vunpack.c.l.s8.bf16 %v2850_v13 }
 0x57b   : > { %3828 = vmatpush2.bf16.msra.mxu1 %v3106_v25  ;;  %v3314_v25 = vunpack.c.h.s8.bf16 %v2850_v13 }
 0x57c   : > { %3927 = vmatpush1.bf16.msra.mxu0 %v2948_v63  ;;  %3829 = vmatprep.subr.bf16.mxu1 %v3099_v27  ;;  %v3307_v63 = vunpack.c.l.s8.bf16 %v2851_v11  ;;  %v3021_v27 = vunpack.c.l.s8.bf16 %v2709_v35  ;;  %v2883_v35 = vld [vmem:[%s5253_s12 + $0x768] sm:$0xff] }
 0x57d   : > { %3928 = vmatprep.subr.bf16.mxu0 %v2941_v29  ;;  %v2843_v29 = vld [vmem:[%s5253_s12 + $0x628] sm:$0xff]  ;;  %v3379_v13 = vunpack.c.h.s8.bf16 %v2883_v35 }
 0x57f   : > { %3830 = vmatpush2.bf16.msra.mxu1 %v3098_v32  ;;  %v3020_v32 = vunpack.c.l.s8.bf16 %v2708_v24 }
 0x580   : > { %3929 = vmatpush1.bf16.msra.mxu0 %v2940_v33  ;;  %3881 = vmatprep.subr.bf16.mxu1 %v3347_v37  ;;  %v3299_v33 = vunpack.c.h.s8.bf16 %v2843_v29  ;;  %v2842_v37 = vld [vmem:[%s5253_s12 + $0x620] sm:$0xff] }
 0x581   : > { %3930 = vmatprep.subr.bf16.mxu0 %v2933_v17  ;;  %v2700_v17 = vld [vmem:[%s5253_s12 + $0x1b0] sm:$0xff]  ;;  %v3298_v21 = vunpack.c.h.s8.bf16 %v2842_v37 }
 0x582   : > { %3832 = vmatmul.mubr.bf16.vlgmr.msra.gmra.mxu1 %v5707_v5  ;;  %v3587_v45 = vpop.f32.mrf.mxu1 }
 0x583   : > { %v3588_v10 = vadd.f32 %v3587_v45, %v5886_v36  ;;  %3882 = vmatpush1.bf16.msra.mxu1 %v3346_v2  ;;  %3913 = vmatprep.mubr.bf16.mxu1 %v5811_v4  ;;  %v3012_v2 = vunpack.c.h.s8.bf16 %v2700_v17  ;;  %v3004_v45 = vunpack.c.l.s8.bf16 %v2700_v17  ;;  %v2874_v17 = vld [vmem:[%s5253_s12 + $0x720] sm:$0xff] }
 0x584   : > { %3931 = vmatpush1.bf16.msra.mxu0 %v2932_v38  ;;  %v3589_v52 = vpop.f32.mrf.mxu1  ;;  %3883 = vmatprep.subr.bf16.mxu1 %v3339_v40  ;;  %v3291_v38 = vunpack.c.l.s8.bf16 %v2843_v29  ;;  %v3005_v40 = vunpack.c.l.s8.bf16 %v2701_v30  ;;  %v2875_v30 = vld [vmem:[%s5253_s12 + $0x728] sm:$0xff] }
 0x585   : > { %v4086_v59 = vadd.f32 %v3588_v10, %v3414_v44  ;;  %v3590_v12 = vadd.f32 %v3589_v52, %v5892_v31  ;;  %3932 = vmatprep.subr.bf16.mxu0 %v2925_v43  ;;  %v2909_v31 = vunpack.c.l.s8.bf16 %v2653_v47  ;;  %v2899_v43 = vld [vmem:[%s5253_s12 + $0x7e8] sm:$0xff]  ;;  %v3290_v44 = vunpack.c.l.s8.bf16 %v2842_v37  ;;  %v2898_v10 = vld [vmem:[%s5253_s12 + $0x7e0] sm:$0xff] }
 0x586   : > { %v3591_v36 = vpop.f32.mrf.mxu1  ;;  %v3411_v47 = vunpack.c.h.s8.bf16 %v2899_v43  ;;  %v3410_v52 = vunpack.c.h.s8.bf16 %v2898_v10 }
 0x587   : > { %4094 = vst [vmem:[#allocation3] sm:$0xff] %v4086_v59  ;;  %v4087_v3 = vadd.f32 %v3590_v12, %v3415_v49  ;;  %3884 = vmatpush1.bf16.msra.mxu1 %v3338_v46  ;;  %v2997_v46 = vunpack.c.h.s8.bf16 %v2693_v6  ;;  %v2692_v49 = vld [vmem:[%s5253_s12 + $0x170] sm:$0xff]  ;;  %v2891_v59 = vld [vmem:[%s5253_s12 + $0x7a8] sm:$0xff]  ;;  %v2685_v12 = vld [vmem:[%s5253_s12 + $0x138] sm:$0xff] }
 0x588   : > { %3933 = vmatpush1.bf16.msra.mxu0 %v2924_v53  ;;  %v3592_v15 = vpop.f32.mrf.mxu1  ;;  %3885 = vmatprep.subr.bf16.mxu1 %v3331_v54  ;;  %v2996_v53 = vunpack.c.h.s8.bf16 %v2692_v49  ;;  %v3403_v54 = vunpack.c.l.s8.bf16 %v2899_v43  ;;  %v2988_v62 = vunpack.c.l.s8.bf16 %v2692_v49  ;;  %v3395_v36 = vunpack.c.h.s8.bf16 %v2891_v59 }
 0x589   : > { %4095 = vst [vmem:[#allocation3 + $0x18] sm:$0xff] %v4087_v3  ;;  %3934 = vmatprep.subr.bf16.mxu0 %v2917_v61  ;;  %v3402_v61 = vunpack.c.l.s8.bf16 %v2898_v10  ;;  %v2890_v3 = vld [vmem:[%s5253_s12 + $0x7a0] sm:$0xff]  ;;  %v2684_v15 = vld [vmem:[%s5253_s12 + $0x130] sm:$0xff]  ;;  %v2973_v11 = vunpack.c.l.s8.bf16 %v2685_v12  ;;  %v3362_v43 = vunpack.c.h.s8.bf16 %v2874_v17  ;;  %v3354_v10 = vunpack.c.l.s8.bf16 %v2874_v17 }
 0x58b   : > { %3886 = vmatpush1.bf16.msra.mxu1 %v3330_v7  ;;  %v2981_v7 = vunpack.c.h.s8.bf16 %v2685_v12 }
 0x58c   : > { %3935 = vmatpush1.bf16.msra.mxu0 %v2916_v22  ;;  %3887 = vmatprep.subr.bf16.mxu1 %v3323_v48  ;;  %v3394_v22 = vunpack.c.h.s8.bf16 %v2890_v3  ;;  %v2980_v48 = vunpack.c.h.s8.bf16 %v2684_v15 }
 0x58d   : > { %3936 = vmatprep.subr.bf16.mxu0 %v2909_v31  ;;  %v3387_v31 = vunpack.c.l.s8.bf16 %v2891_v59 }
 0x58f   : > { %3888 = vmatpush1.bf16.msra.mxu1 %v3322_v50  ;;  %v2805_v50 = vld [vmem:[%s5253_s12 + $0x4f8] sm:$0xff] }
 0x590   : > { %3937 = vmatpush1.bf16.msra.mxu0 %v2908_v51  ;;  %3889 = vmatprep.subr.bf16.mxu1 %v3315_v1  ;;  %v3386_v51 = vunpack.c.l.s8.bf16 %v2890_v3  ;;  %v2972_v1 = vunpack.c.l.s8.bf16 %v2684_v15  ;;  %v3221_v24 = vunpack.c.h.s8.bf16 %v2805_v50  ;;  %v3213_v29 = vunpack.c.l.s8.bf16 %v2805_v50  ;;  %v2781_v3 = vld [vmem:[%s5253_s12 + $0x438] sm:$0xff] }
 0x591   : > { %3938 = vmatprep.subr.bf16.mxu0 %v3029_v58  ;;  %v2882_v58 = vld [vmem:[%s5253_s12 + $0x760] sm:$0xff] }
 0x593   : > { %3890 = vmatpush1.bf16.msra.mxu1 %v3314_v25  ;;  %v2804_v25 = vld [vmem:[%s5253_s12 + $0x4f0] sm:$0xff] }
 0x594   : > { %3939 = vmatpush2.bf16.msra.mxu0 %v3028_v26  ;;  %3891 = vmatprep.subr.bf16.mxu1 %v3307_v63  ;;  %v3378_v26 = vunpack.c.h.s8.bf16 %v2882_v58  ;;  %v3220_v63 = vunpack.c.h.s8.bf16 %v2804_v25  ;;  %v3212_v37 = vunpack.c.l.s8.bf16 %v2804_v25  ;;  %v2837_v25 = vld [vmem:[%s5253_s12 + $0x5f8] sm:$0xff] }
 0x595   : > { %3940 = vmatprep.subr.bf16.mxu0 %v3021_v27  ;;  %v3371_v27 = vunpack.c.l.s8.bf16 %v2883_v35  ;;  %v2780_v35 = vld [vmem:[%s5253_s12 + $0x430] sm:$0xff]  ;;  %v3277_v17 = vunpack.c.l.s8.bf16 %v2837_v25 }
 0x597   : > { %3892 = vmatpush1.bf16.msra.mxu1 %v3306_v57  ;;  %v2797_v57 = vld [vmem:[%s5253_s12 + $0x4b8] sm:$0xff] }
 0x598   : > { %3941 = vmatpush2.bf16.msra.mxu0 %v3020_v32  ;;  %3893 = vmatprep.subr.bf16.mxu1 %v3299_v33  ;;  %v3370_v33 = vunpack.c.l.s8.bf16 %v2882_v58  ;;  %v3165_v58 = vunpack.c.l.s8.bf16 %v2781_v3 }
 0x599   : > { %3942 = vmatprep.subr.bf16.mxu0 %v3013_v16  ;;  %v3363_v16 = vunpack.c.h.s8.bf16 %v2875_v30 }
 0x59b   : > { %3894 = vmatpush1.bf16.msra.mxu1 %v3298_v21 }
 0x59c   : > { %3943 = vmatpush2.bf16.msra.mxu0 %v3012_v2  ;;  %3895 = vmatprep.subr.bf16.mxu1 %v3291_v38  ;;  %v3205_v2 = vunpack.c.h.s8.bf16 %v2797_v57  ;;  %v2796_v38 = vld [vmem:[%s5253_s12 + $0x4b0] sm:$0xff] }
 0x59d   : > { %3944 = vmatprep.subr.bf16.mxu0 %v3005_v40 }
 0x59f   : > { %3896 = vmatpush1.bf16.msra.mxu1 %v3290_v44  ;;  %v3197_v44 = vunpack.c.l.s8.bf16 %v2797_v57  ;;  %v2836_v57 = vld [vmem:[%s5253_s12 + $0x5f0] sm:$0xff] }
 0x5a0   : > { %3945 = vmatpush2.bf16.msra.mxu0 %v3004_v45  ;;  %3897 = vmatprep.subr.bf16.mxu1 %v3411_v47  ;;  %v2741_v45 = vld [vmem:[%s5253_s12 + $0x2f8] sm:$0xff] }
 0x5a1   : > { %3946 = vmatprep.subr.bf16.mxu0 %v2997_v46  ;;  %v2789_v47 = vld [vmem:[%s5253_s12 + $0x478] sm:$0xff]  ;;  %v3196_v46 = vunpack.c.l.s8.bf16 %v2796_v38  ;;  %v3093_v49 = vunpack.c.h.s8.bf16 %v2741_v45  ;;  %v3085_v12 = vunpack.c.l.s8.bf16 %v2741_v45 }
 0x5a3   : > { %3898 = vmatpush2.bf16.msra.mxu1 %v3410_v52  ;;  %v2740_v52 = vld [vmem:[%s5253_s12 + $0x2f0] sm:$0xff] }
 0x5a4   : > { %3947 = vmatpush2.bf16.msra.mxu0 %v2996_v53  ;;  %3899 = vmatprep.subr.bf16.mxu1 %v3403_v54  ;;  %v3189_v53 = vunpack.c.h.s8.bf16 %v2789_v47  ;;  %v2788_v54 = vld [vmem:[%s5253_s12 + $0x470] sm:$0xff] }
 0x5a5   : > { %3948 = vmatprep.subr.bf16.mxu0 %v2989_v55  ;;  %v3092_v55 = vunpack.c.h.s8.bf16 %v2740_v52  ;;  %v3188_v59 = vunpack.c.h.s8.bf16 %v2788_v54 }
 0x5a7   : > { %3900 = vmatpush2.bf16.msra.mxu1 %v3402_v61  ;;  %v3181_v61 = vunpack.c.l.s8.bf16 %v2789_v47 }
 0x5a8   : > { %3949 = vmatpush2.bf16.msra.mxu0 %v2988_v62  ;;  %3901 = vmatprep.subr.bf16.mxu1 %v3395_v36  ;;  %v2733_v62 = vld [vmem:[%s5253_s12 + $0x2b8] sm:$0xff] }
 0x5a9   : > { %3950 = vmatprep.subr.bf16.mxu0 %v2981_v7  ;;  %v3084_v7 = vunpack.c.l.s8.bf16 %v2740_v52  ;;  %v2821_v52 = vld [vmem:[%s5253_s12 + $0x578] sm:$0xff] }
 0x5ab   : > { %3902 = vmatpush2.bf16.msra.mxu1 %v3394_v22  ;;  %v3180_v22 = vunpack.c.l.s8.bf16 %v2788_v54 }
 0x5ac   : > { %3951 = vmatpush2.bf16.msra.mxu0 %v2980_v48  ;;  %3903 = vmatprep.subr.bf16.mxu1 %v3387_v31  ;;  %v3077_v48 = vunpack.c.h.s8.bf16 %v2733_v62  ;;  %v2732_v31 = vld [vmem:[%s5253_s12 + $0x2b0] sm:$0xff] }
 0x5ad   : > { %3952 = vmatprep.subr.bf16.mxu0 %v2973_v11  ;;  %v3173_v11 = vunpack.c.h.s8.bf16 %v2781_v3 }
 0x5af   : > { %3904 = vmatpush2.bf16.msra.mxu1 %v3386_v51  ;;  %v3076_v51 = vunpack.c.h.s8.bf16 %v2732_v31 }
 0x5b0   : > { %3953 = vmatpush2.bf16.msra.mxu0 %v2972_v1  ;;  %3905 = vmatprep.subr.bf16.mxu1 %v3379_v13  ;;  %v3069_v13 = vunpack.c.l.s8.bf16 %v2733_v62 }
 0x5b1   : > { %4004 = vmatprep.subr.bf16.mxu0 %v3221_v24  ;;  %v2725_v24 = vld [vmem:[%s5253_s12 + $0x278] sm:$0xff] }
 0x5b3   : > { %v5969_v32 = vpop.f32.mrf.mxu0  ;;  %3906 = vmatpush2.bf16.msra.mxu1 %v3378_v26  ;;  %3955 = vmatmul.mubr.bf16.vlgmr.msra.gmra.mxu0 %v5705_v60  ;;  %v3204_v60 = vunpack.c.h.s8.bf16 %v2796_v38  ;;  %v3068_v26 = vunpack.c.l.s8.bf16 %v2732_v31  ;;  %v2829_v38 = vld [vmem:[%s5253_s12 + $0x5b8] sm:$0xff] }
 0x5b4   : > { %4005 = vmatpush1.bf16.msra.mxu0 %v3220_v63  ;;  %4036 = vmatprep.mubr.bf16.mxu0 %v5730_v14  ;;  %v3355_v14 = vunpack.c.l.s8.bf16 %v2875_v30  ;;  %v3164_v63 = vunpack.c.l.s8.bf16 %v2780_v35  ;;  %v3285_v30 = vunpack.c.h.s8.bf16 %v2837_v25  ;;  %v2813_v31 = vld [vmem:[%s5253_s12 + $0x538] sm:$0xff] }
 0x5b5   : > { %v5974_v21 = vpop.f32.mrf.mxu0  ;;  %3907 = vmatprep.subr.bf16.mxu1 %v3371_v27  ;;  %4006 = vmatprep.subr.bf16.mxu0 %v3213_v29  ;;  %v3061_v27 = vunpack.c.h.s8.bf16 %v2725_v24  ;;  %v2724_v29 = vld [vmem:[%s5253_s12 + $0x270] sm:$0xff]  ;;  %v3229_v25 = vunpack.c.l.s8.bf16 %v2813_v31 }
 0x5b7   : > { %v3714_v40 = vpop.f32.mrf.mxu0  ;;  %3908 = vmatpush2.bf16.msra.mxu1 %v3370_v33  ;;  %v3060_v33 = vunpack.c.h.s8.bf16 %v2724_v29 }
 0x5b8   : > { %4007 = vmatpush1.bf16.msra.mxu0 %v3212_v37  ;;  %3909 = vmatprep.subr.bf16.mxu1 %v3363_v16  ;;  %v3284_v37 = vunpack.c.h.s8.bf16 %v2836_v57  ;;  %v3053_v16 = vunpack.c.l.s8.bf16 %v2725_v24  ;;  %v3052_v40 = vunpack.c.l.s8.bf16 %v2724_v29 }
 0x5b9   : > { %v3715_v6 = vpop.f32.mrf.mxu0  ;;  %4008 = vmatprep.subr.bf16.mxu0 %v3205_v2  ;;  %v2717_v2 = vld [vmem:[%s5253_s12 + $0x238] sm:$0xff] }
 0x5ba   : > { %v3269_v6 = vunpack.c.h.s8.bf16 %v2829_v38 }
 0x5bb   : > { %3910 = vmatpush2.bf16.msra.mxu1 %v3362_v43  ;;  %v3276_v43 = vunpack.c.l.s8.bf16 %v2836_v57 }
 0x5bc   : > { %4009 = vmatpush1.bf16.msra.mxu0 %v3204_v60  ;;  %3911 = vmatprep.subr.bf16.mxu1 %v3355_v14  ;;  %v3045_v60 = vunpack.c.h.s8.bf16 %v2717_v2  ;;  %v2716_v14 = vld [vmem:[%s5253_s12 + $0x230] sm:$0xff] }
 0x5bd   : > { %4010 = vmatprep.subr.bf16.mxu0 %v3197_v44  ;;  %v2828_v44 = vld [vmem:[%s5253_s12 + $0x5b0] sm:$0xff]  ;;  %v3044_v45 = vunpack.c.h.s8.bf16 %v2716_v14 }
 0x5be   : > { %v3268_v47 = vunpack.c.h.s8.bf16 %v2828_v44  ;;  %v3260_v54 = vunpack.c.l.s8.bf16 %v2828_v44  ;;  %v2869_v44 = vld [vmem:[%s5253_s12 + $0x6f8] sm:$0xff] }
 0x5bf   : > { %3912 = vmatpush2.bf16.msra.mxu1 %v3354_v10  ;;  %v3037_v10 = vunpack.c.l.s8.bf16 %v2717_v2 }
 0x5c0   : > { %4011 = vmatpush1.bf16.msra.mxu0 %v3196_v46  ;;  %3963 = vmatprep.subr.bf16.mxu1 %v3093_v49  ;;  %v3261_v46 = vunpack.c.l.s8.bf16 %v2829_v38  ;;  %v2773_v49 = vld [vmem:[%s5253_s12 + $0x3f8] sm:$0xff]  ;;  %v2748_v38 = vld [vmem:[%s5253_s12 + $0x330] sm:$0xff] }
 0x5c1   : > { %4012 = vmatprep.subr.bf16.mxu0 %v3189_v53  ;;  %v3036_v53 = vunpack.c.l.s8.bf16 %v2716_v14 }
 0x5c2   : > { %v5982_v36 = vpop.f32.mrf.mxu1  ;;  %3914 = vmatmul.mubr.bf16.vlgmr.msra.gmra.mxu1 %v5813_v42 }
 0x5c3   : > { %3964 = vmatpush1.bf16.msra.mxu1 %v3092_v55  ;;  %3995 = vmatprep.mubr.bf16.mxu1 %v5648_v9  ;;  %v3172_v9 = vunpack.c.h.s8.bf16 %v2780_v35  ;;  %v3157_v55 = vunpack.c.h.s8.bf16 %v2773_v49 }
 0x5c4   : > { %v5987_v15 = vpop.f32.mrf.mxu1  ;;  %4013 = vmatpush1.bf16.msra.mxu0 %v3188_v59  ;;  %3965 = vmatprep.subr.bf16.mxu1 %v3085_v12  ;;  %v2772_v59 = vld [vmem:[%s5253_s12 + $0x3f0] sm:$0xff]  ;;  %v3253_v12 = vunpack.c.h.s8.bf16 %v2821_v52 }
 0x5c5   : > { %4014 = vmatprep.subr.bf16.mxu0 %v3181_v61  ;;  %v2820_v61 = vld [vmem:[%s5253_s12 + $0x570] sm:$0xff]  ;;  %v3156_v62 = vunpack.c.h.s8.bf16 %v2772_v59 }
 0x5c6   : > { %v3673_v50 = vpop.f32.mrf.mxu1  ;;  %v3252_v3 = vunpack.c.h.s8.bf16 %v2820_v61  ;;  %v3244_v35 = vunpack.c.l.s8.bf16 %v2820_v61 }
 0x5c7   : > { %3966 = vmatpush1.bf16.msra.mxu1 %v3084_v7  ;;  %v3149_v7 = vunpack.c.l.s8.bf16 %v2773_v49 }
 0x5c8   : > { %v3674_v1 = vpop.f32.mrf.mxu1  ;;  %4015 = vmatpush1.bf16.msra.mxu0 %v3180_v22  ;;  %3967 = vmatprep.subr.bf16.mxu1 %v3077_v48  ;;  %v3245_v22 = vunpack.c.l.s8.bf16 %v2821_v52  ;;  %v2765_v48 = vld [vmem:[%s5253_s12 + $0x3b8] sm:$0xff]  ;;  %v3341_v52 = vunpack.c.l.s8.bf16 %v2869_v44 }
 0x5c9   : > { %4016 = vmatprep.subr.bf16.mxu0 %v3173_v11  ;;  %v3148_v11 = vunpack.c.l.s8.bf16 %v2772_v59  ;;  %v3141_v50 = vunpack.c.h.s8.bf16 %v2765_v48  ;;  %v3237_v1 = vunpack.c.h.s8.bf16 %v2813_v31  ;;  %v3133_v24 = vunpack.c.l.s8.bf16 %v2765_v48 }
 0x5cb   : > { %3968 = vmatpush1.bf16.msra.mxu1 %v3076_v51  ;;  %v2764_v51 = vld [vmem:[%s5253_s12 + $0x3b0] sm:$0xff] }
 0x5cc   : > { %4017 = vmatpush1.bf16.msra.mxu0 %v3172_v9  ;;  %3969 = vmatprep.subr.bf16.mxu1 %v3069_v13  ;;  %v2812_v9 = vld [vmem:[%s5253_s12 + $0x530] sm:$0xff]  ;;  %v3140_v13 = vunpack.c.h.s8.bf16 %v2764_v51 }
 0x5cd   : > { %4018 = vmatprep.subr.bf16.mxu0 %v3165_v58  ;;  %v3236_v58 = vunpack.c.h.s8.bf16 %v2812_v9 }
 0x5cf   : > { %3970 = vmatpush1.bf16.msra.mxu1 %v3068_v26  ;;  %v2757_v26 = vld [vmem:[%s5253_s12 + $0x378] sm:$0xff] }
 0x5d0   : > { %4019 = vmatpush1.bf16.msra.mxu0 %v3164_v63  ;;  %3971 = vmatprep.subr.bf16.mxu1 %v3061_v27  ;;  %v3132_v63 = vunpack.c.l.s8.bf16 %v2764_v51  ;;  %v3228_v27 = vunpack.c.l.s8.bf16 %v2812_v9  ;;  %v3125_v29 = vunpack.c.h.s8.bf16 %v2757_v26 }
 0x5d1   : > { %4020 = vmatprep.subr.bf16.mxu0 %v3285_v30  ;;  %v2756_v30 = vld [vmem:[%s5253_s12 + $0x370] sm:$0xff] }
 0x5d2   : > { %v3124_v57 = vunpack.c.h.s8.bf16 %v2756_v30 }
 0x5d3   : > { %3972 = vmatpush1.bf16.msra.mxu1 %v3060_v33  ;;  %v3117_v33 = vunpack.c.l.s8.bf16 %v2757_v26  ;;  %v2901_v26 = vld [vmem:[%s5253_s12 + $0x7f8] sm:$0xff] }
 0x5d4   : > { %4021 = vmatpush2.bf16.msra.mxu0 %v3284_v37  ;;  %3973 = vmatprep.subr.bf16.mxu1 %v3053_v16  ;;  %v2749_v37 = vld [vmem:[%s5253_s12 + $0x338] sm:$0xff] }
 0x5d5   : > { %4022 = vmatprep.subr.bf16.mxu0 %v3277_v17  ;;  %v3116_v17 = vunpack.c.l.s8.bf16 %v2756_v30  ;;  %v3109_v2 = vunpack.c.h.s8.bf16 %v2749_v37  ;;  %v3101_v14 = vunpack.c.l.s8.bf16 %v2749_v37 }
 0x5d7   : > { %3974 = vmatpush1.bf16.msra.mxu1 %v3052_v40 }
 0x5d8   : > { %4023 = vmatpush2.bf16.msra.mxu0 %v3276_v43  ;;  %3975 = vmatprep.subr.bf16.mxu1 %v3045_v60  ;;  %v3108_v60 = vunpack.c.h.s8.bf16 %v2748_v38 }
 0x5d9   : > { %4024 = vmatprep.subr.bf16.mxu0 %v3269_v6 }
 0x5db   : > { %3976 = vmatpush1.bf16.msra.mxu1 %v3044_v45  ;;  %v3100_v45 = vunpack.c.l.s8.bf16 %v2748_v38 }
 0x5dc   : > { %4025 = vmatpush2.bf16.msra.mxu0 %v3268_v47  ;;  %3977 = vmatprep.subr.bf16.mxu1 %v3037_v10  ;;  %v3349_v47 = vunpack.c.h.s8.bf16 %v2869_v44  ;;  %v3670_v10 = vadd.f32 %v5982_v36, %v5926_v23  ;;  %v2884_v44 = vld [vmem:[%s5253_s12 + $0x770] sm:$0xff] }
 0x5dd   : > { %4026 = vmatprep.subr.bf16.mxu0 %v3261_v46  ;;  %v3672_v46 = vadd.f32 %v5987_v15, %v5931_v20  ;;  %v3417_v20 = vld [vmem:[#allocation3 + $0x20] sm:$0xff] }
 0x5df   : > { %3978 = vmatpush1.bf16.msra.mxu1 %v3036_v53  ;;  %v3711_v53 = vadd.f32 %v5969_v32, %v3670_v10  ;;  %v3713_v23 = vadd.f32 %v5974_v21, %v3672_v46  ;;  %v2853_v21 = vld [vmem:[%s5253_s12 + $0x678] sm:$0xff]  ;;  %v3372_v46 = vunpack.c.l.s8.bf16 %v2884_v44 }
 0x5e0   : > { %4027 = vmatpush2.bf16.msra.mxu0 %v3260_v54  ;;  %3979 = vmatprep.subr.bf16.mxu1 %v3157_v55  ;;  %v2861_v54 = vld [vmem:[%s5253_s12 + $0x6b8] sm:$0xff]  ;;  %v3416_v55 = vld [vmem:[#allocation3 + $0x10] sm:$0xff]  ;;  %v3309_v51 = vunpack.c.l.s8.bf16 %v2853_v21 }
 0x5e1   : > { %4028 = vmatprep.subr.bf16.mxu0 %v3253_v12  ;;  %v3333_v61 = vunpack.c.h.s8.bf16 %v2861_v54 }
 0x5e3   : > { %3980 = vmatpush2.bf16.msra.mxu1 %v3156_v62  ;;  %v2860_v62 = vld [vmem:[%s5253_s12 + $0x6b0] sm:$0xff] }
 0x5e4   : > { %4029 = vmatpush2.bf16.msra.mxu0 %v3252_v3  ;;  %3981 = vmatprep.subr.bf16.mxu1 %v3149_v7  ;;  %v3324_v31 = vunpack.c.l.s8.bf16 %v2860_v62 }
 0x5e5   : > { %4030 = vmatprep.subr.bf16.mxu0 %v3245_v22 }
 0x5e7   : > { %3982 = vmatpush2.bf16.msra.mxu1 %v3148_v11  ;;  %v3317_v11 = vunpack.c.h.s8.bf16 %v2853_v21 }
 0x5e8   : > { %4031 = vmatpush2.bf16.msra.mxu0 %v3244_v35  ;;  %3983 = vmatprep.subr.bf16.mxu1 %v3141_v50  ;;  %v2852_v35 = vld [vmem:[%s5253_s12 + $0x670] sm:$0xff] }
 0x5e9   : > { %4032 = vmatprep.subr.bf16.mxu0 %v3237_v1  ;;  %v3316_v50 = vunpack.c.h.s8.bf16 %v2852_v35  ;;  %v2845_v1 = vld [vmem:[%s5253_s12 + $0x638] sm:$0xff]  ;;  %v3308_v9 = vunpack.c.l.s8.bf16 %v2852_v35 }
 0x5ea   : > { %v3419_v35 = vld [vmem:[#allocation3 + $0x8] sm:$0xff] }
 0x5eb   : > { %3984 = vmatpush2.bf16.msra.mxu1 %v3140_v13  ;;  %v3301_v13 = vunpack.c.h.s8.bf16 %v2845_v1 }
 0x5ec   : > { %4033 = vmatpush2.bf16.msra.mxu0 %v3236_v58  ;;  %3985 = vmatprep.subr.bf16.mxu1 %v3133_v24  ;;  %v2844_v58 = vld [vmem:[%s5253_s12 + $0x630] sm:$0xff] }
 0x5ed   : > { %4034 = vmatprep.subr.bf16.mxu0 %v3229_v25  ;;  %v3300_v24 = vunpack.c.h.s8.bf16 %v2844_v58  ;;  %v3293_v25 = vunpack.c.l.s8.bf16 %v2845_v1 }
 0x5ef   : > { %3986 = vmatpush2.bf16.msra.mxu1 %v3132_v63  ;;  %v3292_v63 = vunpack.c.l.s8.bf16 %v2844_v58 }
 0x5f0   : > { %4035 = vmatpush2.bf16.msra.mxu0 %v3228_v27  ;;  %3987 = vmatprep.subr.bf16.mxu1 %v3125_v29  ;;  %v3413_v27 = vunpack.c.h.s8.bf16 %v2901_v26  ;;  %v2900_v29 = vld [vmem:[%s5253_s12 + $0x7f0] sm:$0xff] }
 0x5f1   : > { %v3412_v30 = vunpack.c.h.s8.bf16 %v2900_v29  ;;  %v3404_v37 = vunpack.c.l.s8.bf16 %v2900_v29 }
 0x5f3   : > { %v6010_v16 = vpop.f32.mrf.mxu0  ;;  %3988 = vmatpush2.bf16.msra.mxu1 %v3124_v57  ;;  %4037 = vmatmul.mubr.bf16.vlgmr.msra.gmra.mxu0 %v5770_v8  ;;  %v2868_v8 = vld [vmem:[%s5253_s12 + $0x6f0] sm:$0xff]  ;;  %v3405_v57 = vunpack.c.l.s8.bf16 %v2901_v26 }
 0x5f4   : > { %3989 = vmatprep.subr.bf16.mxu1 %v3117_v33  ;;  %v3348_v49 = vunpack.c.h.s8.bf16 %v2868_v8  ;;  %v3340_v36 = vunpack.c.l.s8.bf16 %v2868_v8  ;;  %v2893_v33 = vld [vmem:[%s5253_s12 + $0x7b8] sm:$0xff] }
 0x5f5   : > { %v6014_v40 = vpop.f32.mrf.mxu0  ;;  %v2877_v8 = vld [vmem:[%s5253_s12 + $0x738] sm:$0xff] }
 0x5f7   : > { %v3796_v43 = vpop.f32.mrf.mxu0  ;;  %3990 = vmatpush2.bf16.msra.mxu1 %v3116_v17  ;;  %v3397_v17 = vunpack.c.h.s8.bf16 %v2893_v33 }
 0x5f8   : > { %3991 = vmatprep.subr.bf16.mxu1 %v3109_v2  ;;  %v2892_v2 = vld [vmem:[%s5253_s12 + $0x7b0] sm:$0xff]  ;;  %v3389_v43 = vunpack.c.l.s8.bf16 %v2893_v33  ;;  %v3420_v33 = vld [vmem:[#allocation3 + $0x30] sm:$0xff] }
 0x5f9   : > { %v3797_v6 = vpop.f32.mrf.mxu0  ;;  %v3396_v38 = vunpack.c.h.s8.bf16 %v2892_v2 }
 0x5fb   : > { %3992 = vmatpush2.bf16.msra.mxu1 %v3108_v60  ;;  %v2885_v60 = vld [vmem:[%s5253_s12 + $0x778] sm:$0xff] }
 0x5fc   : > { %3993 = vmatprep.subr.bf16.mxu1 %v3101_v14  ;;  %v3388_v14 = vunpack.c.l.s8.bf16 %v2892_v2  ;;  %v3381_v6 = vunpack.c.h.s8.bf16 %v2885_v60 }
 0x5ff   : > { %3994 = vmatpush2.bf16.msra.mxu1 %v3100_v45  ;;  %v3380_v45 = vunpack.c.h.s8.bf16 %v2884_v44 }
 0x600   : > { %4045 = vmatprep.subr.bf16.mxu1 %v3349_v47  ;;  %v3373_v47 = vunpack.c.l.s8.bf16 %v2885_v60 }
 0x602   : > { %v3751_v59 = vpop.f32.mrf.mxu1  ;;  %3996 = vmatmul.mubr.bf16.vlgmr.msra.gmra.mxu1 %v5707_v5  ;;  %v3332_v5 = vunpack.c.h.s8.bf16 %v2860_v62 }
 0x603   : > { %v3752_v12 = vadd.f32 %v3751_v59, %v3711_v53  ;;  %4046 = vmatpush1.bf16.msra.mxu1 %v3348_v49  ;;  %4077 = vmatprep.mubr.bf16.mxu1 %v5811_v4  ;;  %v3325_v4 = vunpack.c.l.s8.bf16 %v2861_v54  ;;  %v3365_v49 = vunpack.c.h.s8.bf16 %v2877_v8  ;;  %v3357_v59 = vunpack.c.l.s8.bf16 %v2877_v8 }
 0x604   : > { %v3753_v15 = vpop.f32.mrf.mxu1  ;;  %4047 = vmatprep.subr.bf16.mxu1 %v3341_v52  ;;  %v2876_v52 = vld [vmem:[%s5253_s12 + $0x730] sm:$0xff] }
 0x605   : > { %v4088_v3 = vadd.f32 %v3752_v12, %v3416_v55  ;;  %v3754_v32 = vadd.f32 %v3753_v15, %v3713_v23  ;;  %v3364_v55 = vunpack.c.h.s8.bf16 %v2876_v52  ;;  %v3356_v23 = vunpack.c.l.s8.bf16 %v2876_v52 }
 0x606   : > { %v3755_v7 = vpop.f32.mrf.mxu1 }
 0x607   : > { %4096 = vst [vmem:[#allocation3 + $0x10] sm:$0xff] %v4088_v3  ;;  %v4089_v22 = vadd.f32 %v3754_v32, %v3417_v20  ;;  %4048 = vmatpush1.bf16.msra.mxu1 %v3340_v36 }
 0x608   : > { %v3756_v48 = vpop.f32.mrf.mxu1  ;;  %4049 = vmatprep.subr.bf16.mxu1 %v3333_v61 }
 0x609   : > { %4097 = vst [vmem:[#allocation3 + $0x20] sm:$0xff] %v4089_v22 }
 0x60b   : > { %4050 = vmatpush1.bf16.msra.mxu1 %v3332_v5 }
 0x60c   : > { %4051 = vmatprep.subr.bf16.mxu1 %v3325_v4  ;;  %v3418_v4 = vld [vmem:[#allocation3 + $0x28] sm:$0xff] }
 0x60f   : > { %4052 = vmatpush1.bf16.msra.mxu1 %v3324_v31 }
 0x610   : > { %4053 = vmatprep.subr.bf16.mxu1 %v3317_v11 }
 0x613   : > { %4054 = vmatpush1.bf16.msra.mxu1 %v3316_v50 }
 0x614   : > { %4055 = vmatprep.subr.bf16.mxu1 %v3309_v51 }
 0x617   : > { %4056 = vmatpush1.bf16.msra.mxu1 %v3308_v9 }
 0x618   : > { %4057 = vmatprep.subr.bf16.mxu1 %v3301_v13 }
 0x61b   : > { %4058 = vmatpush1.bf16.msra.mxu1 %v3300_v24 }
 0x61c   : > { %4059 = vmatprep.subr.bf16.mxu1 %v3293_v25 }
 0x61f   : > { %4060 = vmatpush1.bf16.msra.mxu1 %v3292_v63 }
 0x620   : > { %4061 = vmatprep.subr.bf16.mxu1 %v3413_v27 }
 0x623   : > { %4062 = vmatpush2.bf16.msra.mxu1 %v3412_v30 }
 0x624   : > { %4063 = vmatprep.subr.bf16.mxu1 %v3405_v57 }
 0x627   : > { %4064 = vmatpush2.bf16.msra.mxu1 %v3404_v37 }
 0x628   : > { %4065 = vmatprep.subr.bf16.mxu1 %v3397_v17 }
 0x62b   : > { %4066 = vmatpush2.bf16.msra.mxu1 %v3396_v38  ;;  %v3421_v38 = vld [vmem:[#allocation3 + $0x38] sm:$0xff] }
 0x62c   : > { %4067 = vmatprep.subr.bf16.mxu1 %v3389_v43 }
 0x62f   : > { %4068 = vmatpush2.bf16.msra.mxu1 %v3388_v14 }
 0x630   : > { %4069 = vmatprep.subr.bf16.mxu1 %v3381_v6 }
 0x633   : > { %v3874_v10 = vpop.f32.mrf.mxu0  ;;  %4070 = vmatpush2.bf16.msra.mxu1 %v3380_v45 }
 0x634   : > { %4071 = vmatprep.subr.bf16.mxu1 %v3373_v47 }
 0x635   : > { %v3876_v53 = vpop.f32.mrf.mxu0 }
 0x637   : > { %v3878_v54 = vpop.f32.mrf.mxu0  ;;  %4072 = vmatpush2.bf16.msra.mxu1 %v3372_v46 }
 0x638   : > { %4073 = vmatprep.subr.bf16.mxu1 %v3365_v49 }
 0x639   : > { %v3879_v12 = vpop.f32.mrf.mxu0 }
 0x63b   : > { %4074 = vmatpush2.bf16.msra.mxu1 %v3364_v55 }
 0x63c   : > { %4075 = vmatprep.subr.bf16.mxu1 %v3357_v59 }
 0x63f   : > { %4076 = vmatpush2.bf16.msra.mxu1 %v3356_v23 }
 0x642   : > { %v3833_v36 = vpop.f32.mrf.mxu1  ;;  %4078 = vmatmul.mubr.bf16.vlgmr.msra.gmra.mxu1 %v5813_v42 }
 0x643   : > { %v3834_v22 = vadd.f32 %v3833_v36, %v6010_v16 }
 0x644   : > { %v3835_v20 = vpop.f32.mrf.mxu1 }
 0x645   : > { %v3836_v5 = vadd.f32 %v3835_v20, %v6014_v40  ;;  %v3875_v48 = vadd.f32 %v3874_v10, %v3834_v22 }
 0x646   : > { %v3837_v15 = vpop.f32.mrf.mxu1 }
 0x647   : > { %v3877_v11 = vadd.f32 %v3876_v53, %v3836_v5 }
 0x648   : > { %v3838_v61 = vpop.f32.mrf.mxu1 }
 0x673   : > { %v3956_v62 = vpop.f32.mrf.mxu0 }
 0x675   : > { %v3958_v3 = vpop.f32.mrf.mxu0 }
 0x677   : > { %v3960_v32 = vpop.f32.mrf.mxu0 }
 0x679   : > { %v3961_v7 = vpop.f32.mrf.mxu0 }
 0x682   : > { %v3915_v21 = vpop.f32.mrf.mxu1 }
 0x683   : > { %v3916_v31 = vadd.f32 %v3915_v21, %v3875_v48 }
 0x684   : > { %v3917_v50 = vpop.f32.mrf.mxu1 }
 0x685   : > { %v4090_v51 = vadd.f32 %v3916_v31, %v3418_v4  ;;  %v3918_v42 = vadd.f32 %v3917_v50, %v3877_v11 }
 0x686   : > { %v3919_v1 = vpop.f32.mrf.mxu1 }
 0x687   : > { %4098 = vst [vmem:[#allocation3 + $0x28] sm:$0xff] %v4090_v51  ;;  %v4091_v9 = vadd.f32 %v3918_v42, %v3419_v35 }
 0x688   : > { %v3920_v13 = vpop.f32.mrf.mxu1 }
 0x689   : > { %4099 = vst [vmem:[#allocation3 + $0x8] sm:$0xff] %v4091_v9 }
 0x6b3   : > { %v4038_v58 = vpop.f32.mrf.mxu0 }
 0x6b5   : > { %v4040_v24 = vpop.f32.mrf.mxu0 }
 0x6b7   : > { %v4042_v25 = vpop.f32.mrf.mxu0 }
 0x6b9   : > { %v4043_v16 = vpop.f32.mrf.mxu0 }
 0x6c2   : > { %v3997_v26 = vpop.f32.mrf.mxu1 }
 0x6c3   : > { %v3998_v29 = vadd.f32 %v3997_v26, %v3956_v62 }
 0x6c4   : > { %v3999_v40 = vpop.f32.mrf.mxu1 }
 0x6c5   : > { %v4000_v30 = vadd.f32 %v3999_v40, %v3958_v3  ;;  %v4039_v57 = vadd.f32 %v4038_v58, %v3998_v29 }
 0x6c6   : > { %v4001_v63 = vpop.f32.mrf.mxu1 }
 0x6c7   : > { %v4041_v2 = vadd.f32 %v4040_v24, %v4000_v30 }
 0x6c8   : > { %v4002_v27 = vpop.f32.mrf.mxu1 }
 0x702   : > { %v4079_v37 = vpop.f32.mrf.mxu1 }
 0x703   : > { %v4080_v17 = vadd.f32 %v4079_v37, %v4039_v57 }
 0x704   : > { %v4081_v43 = vpop.f32.mrf.mxu1 }
 0x705   : > { %v4092_v60 = vadd.f32 %v4080_v17, %v3420_v33  ;;  %v4082_v14 = vadd.f32 %v4081_v43, %v4041_v2  ;;  %4105 = sbr.rel (%p4478_p4) target bundleno = 1831 (0x727), region = 100 }
 0x706   : > { %v4083_v6 = vpop.f32.mrf.mxu1 }
 0x707   : > { %4100 = vst [vmem:[#allocation3 + $0x30] sm:$0xff] %v4092_v60  ;;  %v4093_v44 = vadd.f32 %v4082_v14, %v3421_v38 }
 0x708   : > { %v4084_v45 = vpop.f32.mrf.mxu1 }
 0x709   : > { %4101 = vst [vmem:[#allocation3 + $0x38] sm:$0xff] %v4093_v44 }
 0x70a   : > { %v4106_v47 = vld [vmem:[#allocation3] sm:$0xff]  ;;  %v4114_v8 = vld [vmem:[#allocation15] sm:$0xff]  ;;  %v4164_v10 = vld [vmem:[#allocation17] sm:$0xff] }
 0x70b   : > { %v4119_v46 = vrot.slane %v4114_v8, %v5676_v0  ;;  %v4169_v49 = vrot.slane %v4164_v10, %v5676_v0  ;;  %v4107_v52 = vld [vmem:[#allocation3 + $0x18] sm:$0xff]  ;;  %v4123_v53 = vrot.slane %v4114_v8, %v5615_v34  ;;  %v4173_v54 = vrot.slane %v4164_v10, %v5615_v34  ;;  %v4108_v55 = vld [vmem:[#allocation3 + $0x10] sm:$0xff]  ;;  %v4109_v59 = vld [vmem:[#allocation3 + $0x20] sm:$0xff] }
 0x70c   : > { %v4127_v12 = vrot.slane %v4114_v8, %v5680_v18  ;;  %v4177_v23 = vrot.slane %v4164_v10, %v5680_v18  ;;  %v4131_v36 = vrot.slane %v4114_v8, %v5618_v19  ;;  %v4181_v20 = vrot.slane %v4164_v10, %v5618_v19  ;;  %v4110_v15 = vld [vmem:[#allocation3 + $0x28] sm:$0xff] }
 0x70d   : > { %v4156_v61 = vmul.f32 %v4119_v46, %v4106_v47  ;;  %v4157_v62 = vmul.f32 %v4123_v53, %v4107_v52  ;;  %v4135_v0 = vrot.slane %v4114_v8, %v5751_v39  ;;  %v4185_v3 = vrot.slane %v4164_v10, %v5751_v39  ;;  %v4111_v32 = vld [vmem:[#allocation3 + $0x8] sm:$0xff] }
 0x70e   : > { %v4158_v7 = vmul.f32 %v4127_v12, %v4108_v55  ;;  %v4159_v34 = vmul.f32 %v4131_v36, %v4109_v59  ;;  %v4139_v22 = vrot.slane %v4114_v8, %v5710_v41  ;;  %v4189_v5 = vrot.slane %v4164_v10, %v5710_v41  ;;  %v4112_v48 = vld [vmem:[#allocation3 + $0x30] sm:$0xff] }
 0x70f   : > { %v4206_v18 = vadd.f32 %v4169_v49, %v4156_v61  ;;  %v4207_v4 = vadd.f32 %v4173_v54, %v4157_v62  ;;  %v4160_v21 = vmul.f32 %v4135_v0, %v4110_v15  ;;  %v4143_v19 = vrot.slane %v4114_v8, %v5791_v56 }
 0x710   : > { %v4208_v31 = vadd.f32 %v4177_v23, %v4158_v7  ;;  %v4209_v11 = vadd.f32 %v4181_v20, %v4159_v34  ;;  %v4161_v35 = vmul.f32 %v4139_v22, %v4111_v32  ;;  %v4193_v50 = vrot.slane %v4164_v10, %v5791_v56  ;;  %v4113_v51 = vld [vmem:[#allocation3 + $0x38] sm:$0xff] }
 0x711   : > { %4607 = vtanh.f32 %v4206_v18  ;;  %v4210_v39 = vadd.f32 %v4185_v3, %v4160_v21  ;;  %v4162_v42 = vmul.f32 %v4143_v19, %v4112_v48  ;;  %v4147_v1 = vrot.slane %v4114_v8, %v5794_v28 }
 0x712   : > { %4609 = vtanh.f32 %v4207_v4  ;;  %v4211_v9 = vadd.f32 %v4189_v5, %v4161_v35  ;;  %v4197_v41 = vrot.slane %v4164_v10, %v5794_v28 }
 0x713   : > { %4611 = vtanh.f32 %v4208_v31  ;;  %v4212_v13 = vadd.f32 %v4193_v50, %v4162_v42  ;;  %v4163_v58 = vmul.f32 %v4147_v1, %v4113_v51 }
 0x714   : > { %4613 = vtanh.f32 %v4209_v11 }
 0x715   : > { %4615 = vtanh.f32 %v4210_v39  ;;  %v4213_v24 = vadd.f32 %v4197_v41, %v4163_v58 }
 0x716   : > { %4617 = vtanh.f32 %v4211_v9 }
 0x717   : > { %4619 = vtanh.f32 %v4212_v13 }
 0x718   : > { %4621 = vtanh.f32 %v4213_v24 }
 0x71e   : > { %v4608_v56 = vpop.eup %4607 }
 0x71f   : > { %v4610_v25 = vpop.eup %4609  ;;  %4222 = vst [vmem:[%s6166_s22] sm:$0xff] %v4608_v56 }
 0x720   : > { %v4612_v16 = vpop.eup %4611  ;;  %4223 = vst [vmem:[%s6166_s22 + $0x8] sm:$0xff] %v4610_v25 }
 0x721   : > { %v4614_v28 = vpop.eup %4613  ;;  %4224 = vst [vmem:[%s6166_s22 + $0x10] sm:$0xff] %v4612_v16 }
 0x722   : > { %v4616_v26 = vpop.eup %4615  ;;  %4225 = vst [vmem:[%s6166_s22 + $0x18] sm:$0xff] %v4614_v28 }
 0x723   : > { %v4618_v40 = vpop.eup %4617  ;;  %4226 = vst [vmem:[%s6166_s22 + $0x20] sm:$0xff] %v4616_v26 }
 0x724   : > { %v4620_v63 = vpop.eup %4619  ;;  %4227 = vst [vmem:[%s6166_s22 + $0x28] sm:$0xff] %v4618_v40 }
 0x725   : > { %v4622_v27 = vpop.eup %4621  ;;  %4228 = vst [vmem:[%s6166_s22 + $0x30] sm:$0xff] %v4620_v63 }
 0x726   : > { %4229 = vst [vmem:[%s6166_s22 + $0x38] sm:$0xff] %v4622_v27 }
 0x727 PF: > { %s6167_s12 = sld [smem:[#allocation25_spill]] }
 0x728   : > { %s6168_s30 = sld [smem:[#allocation23_spill]] }
 0x729   : > { %s6169_s10 = sld [smem:[#allocation24_spill]] }
 0x72a   : > { %s6170_s11 = sld [smem:[#allocation26_spill]] }
 0x72d   : > { %p25_p6 = scmp.ge.s32.totalorder %s6167_s12, 6  }
 0x72f   :  { %27 = sbr.rel (!%p25_p6) target bundleno = 13 (0xd), region = 156 }
 0x734   :  { %4241 = vsyncpa [#allocation5], 1 }
 0x735   :  { %4243 = vsyncpa [#allocation5 + $0x1], 1 }
 0x736   :  { %4244 = vsyncpa [#allocation7], 1 }
 0x737   :  { %4245 = vsyncpa [#allocation10], 1 }
 0x738   :  { %4247 = vsyncpa [#allocation10 + $0x1], 1 }
 0x739   :  { %4248 = vsyncpa [#allocation13], 1 }
 0x73a   :  { %4250 = vsyncpa [#allocation13 + $0x1], 1 }
 0x73b   :  { %4251 = vsyncpa [#allocation16], 1 }

</bundles_post_ra>
